<compile_context>
chip_gen: v7x
topology: tpu7x:2x2x1
jax: 0.10.0
libtpu: 0.0.40
codegen_flags: <defaults>
</compile_context>

<pallas_src>
from math import sqrt

import jax
import jax.numpy as jnp
import numpy as np
from jax.experimental import pallas as pl
from jax.experimental.pallas import tpu as pltpu

# ---- small hyperparameters consistent with the module ----
B = 2          # batch
T = 8          # sequence length (max_len=None -> no truncation)
E = 32         # embedding_dim
H = 32         # hidden_size  (4H = 128 -> gates fill exactly one vreg row)
V = 64         # vocab_size (includes PAD id 1)
PAD_ID = 1
NUM_LAYERS = 2  # kernel hard-codes layer 0 + layer 1 (bidirectional)

# TODO(synk): LSTM inter-layer dropout (p=0.4) is train-only in PyTorch; eval forward is
# dropout-free, so it is intentionally omitted.


def elmo_kernel(emb_ref, mask_ref,
                w_ih0f, w_hh0f, b0f,
                w_ih0b, w_hh0b, b0b,
                w_ih1f, w_hh1f, b1f,
                w_ih1b, w_hh1b, b1b,
                w_lin, b_lin,
                out_ref,
                x1f_scr, x1b_scr):
    f32 = jnp.float32

    emb = emb_ref[...]                              # (T*B, E) float32, time-major rows
    maskb = mask_ref[...] > 0.5                     # (T*B, H) bool, computed once

    # Hoist loop-invariant recurrent weights (bf16) out of the loops.
    whh0f = w_hh0f[...]
    whh0b = w_hh0b[...]
    whh1f = w_hh1f[...]
    whh1b = w_hh1b[...]

    # ---- layer-0 input projections: one batched GEMM per direction (bias folded in) ----
    proj0f = jnp.dot(emb, w_ih0f[...], preferred_element_type=f32) + b0f[...]   # (T*B, 4H)
    proj0b = jnp.dot(emb, w_ih0b[...], preferred_element_type=f32) + b0b[...]

    def cell_step(proj_t, h, c, whh, valid):
        # gate pre-activations = precomputed input part + recurrent part (bf16 MXU, f32 acc)
        gates = proj_t + jnp.dot(h.astype(jnp.bfloat16), whh,
                                 preferred_element_type=f32)                    # (B, 4H)
        s = jax.nn.sigmoid(gates)                   # single EUP pass over the full vreg
        i = s[:, 0:H]
        f = s[:, H:2 * H]
        g = 2.0 * s[:, 2 * H:3 * H] - 1.0           # == tanh(z): g columns pre-scaled by 2
        o = s[:, 3 * H:4 * H]
        c_new = f * c + i * g
        h_new = o * jnp.tanh(c_new)
        # Length masking reproduces pack_padded_sequence semantics for the final hidden
        # state: timesteps t >= length[b] leave (h, c) untouched for sequence b.
        return jnp.where(valid, h_new, h), jnp.where(valid, c_new, c)

    zero = jnp.zeros((B, H), f32)

    # ---- layer 0: fwd (time t) and bwd (time T-1-t) fused, fully unrolled ----
    hf = cf = hb = cb = zero
    for s_idx in range(T):
        tf, tb = s_idx, T - 1 - s_idx
        rf, rb = tf * B, tb * B
        hf, cf = cell_step(proj0f[rf:rf + B], hf, cf, whh0f, maskb[rf:rf + B])
        hb, cb = cell_step(proj0b[rb:rb + B], hb, cb, whh0b, maskb[rb:rb + B])
        x1f_scr[rf:rf + B, :] = hf                  # static-index store of the per-step h
        x1b_scr[rb:rb + B, :] = hb

    # ---- layer-1 input projections, batched over all timesteps (no per-step concat) ----
    x1f = x1f_scr[...]                              # (T*B, H)
    x1b = x1b_scr[...]
    wi1f = w_ih1f[...]                              # (2H, 4H)
    wi1b = w_ih1b[...]
    proj1f = (jnp.dot(x1f, wi1f[:H], preferred_element_type=f32)
              + jnp.dot(x1b, wi1f[H:], preferred_element_type=f32) + b1f[...])
    proj1b = (jnp.dot(x1f, wi1b[:H], preferred_element_type=f32)
              + jnp.dot(x1b, wi1b[H:], preferred_element_type=f32) + b1b[...])

    # ---- layer 1: fwd + bwd fused; only final hidden states are needed ----
    hf = cf = hb = cb = zero
    for s_idx in range(T):
        tf, tb = s_idx, T - 1 - s_idx
        rf, rb = tf * B, tb * B
        hf, cf = cell_step(proj1f[rf:rf + B], hf, cf, whh1f, maskb[rf:rf + B])
        hb, cb = cell_step(proj1b[rb:rb + B], hb, cb, whh1b, maskb[rb:rb + B])

    # ---- hn[last layer] (fwd ++ bwd) -> linear -> log_softmax (split W avoids lane concat) ----
    wl = w_lin[...]                                 # (2H, V)
    logits = (jnp.dot(hf, wl[:H], preferred_element_type=f32)
              + jnp.dot(hb, wl[H:], preferred_element_type=f32) + b_lin[...])   # (B, V)
    m = jnp.max(logits, axis=-1, keepdims=True)
    shifted = logits - m
    lse = jnp.log(jnp.sum(jnp.exp(shifted), axis=-1, keepdims=True))
    out_ref[...] = shifted - lse


def elmo_pallas(emb_flat, mask_flat, params):
    n_inputs = 2 + len(params)
    in_specs = [pl.BlockSpec(memory_space=pltpu.MemorySpace.VMEM)
                for _ in range(n_inputs)]
    return pl.pallas_call(
        elmo_kernel,
        out_shape=jax.ShapeDtypeStruct((B, V), jnp.float32),
        in_specs=in_specs,
        out_specs=pl.BlockSpec(memory_space=pltpu.MemorySpace.VMEM),
        scratch_shapes=[pltpu.VMEM((T * B, H), jnp.float32),   # layer-0 fwd h_t (flat rows)
                        pltpu.VMEM((T * B, H), jnp.float32)],  # layer-0 bwd h_t (flat rows)
    )(emb_flat, mask_flat, *params)


def init_params(key):
    ks = jax.random.split(key, 16)
    bound = 1.0 / sqrt(H)

    def u(k, shape, b=bound):
        return jax.random.uniform(k, shape, jnp.float32, -b, b)

    emb_table = jax.random.normal(ks[0], (V, E), jnp.float32) * 0.1
    # per (layer, direction): W_ih (in, 4H), W_hh (H, 4H), bias (1, 4H) [b_ih + b_hh fused]
    cells = []
    in_sizes = [E, E, 2 * H, 2 * H]          # l0 fwd, l0 bwd, l1 fwd, l1 bwd
    for idx, in_sz in enumerate(in_sizes):
        k1, k2, k3 = jax.random.split(ks[1 + idx], 3)
        cells += [u(k1, (in_sz, 4 * H)), u(k2, (H, 4 * H)), u(k3, (1, 4 * H))]
    lb = 1.0 / sqrt(2 * H)
    w_lin = u(ks[10], (2 * H, V), lb)
    b_lin = u(ks[11], (1, V), lb)
    return emb_table, cells + [w_lin, b_lin]


def prep_kernel_params(params):
    """Kernel-side parameter layout: fold the 2x of tanh(z)=2*sigmoid(2z)-1 into the
    g-gate columns of every W_ih / W_hh / bias, and store W_hh in bf16 for the MXU."""
    (w_ih0f, w_hh0f, b0f, w_ih0b, w_hh0b, b0b,
     w_ih1f, w_hh1f, b1f, w_ih1b, w_hh1b, b1b, w_lin, b_lin) = params

    def scale_g(w):
        return w.at[..., 2 * H:3 * H].multiply(2.0)

    out = []
    for w_ih, w_hh, b in ((w_ih0f, w_hh0f, b0f), (w_ih0b, w_hh0b, b0b),
                          (w_ih1f, w_hh1f, b1f), (w_ih1b, w_hh1b, b1b)):
        out += [scale_g(w_ih),
                scale_g(w_hh).astype(jnp.bfloat16),
                scale_g(b)]
    out += [w_lin, b_lin]
    return out


def elmo_reference(tokens, emb_table, params):
    """Pure NumPy reference with identical (packed-LSTM) semantics, original f32 params."""
    tokens = np.asarray(tokens)
    emb_table = np.asarray(emb_table)
    p = [np.asarray(x) for x in params]
    (w_ih0f, w_hh0f, b0f, w_ih0b, w_hh0b, b0b,
     w_ih1f, w_hh1f, b1f, w_ih1b, w_hh1b, b1b, w_lin, b_lin) = p

    def sigmoid(x):
        return 1.0 / (1.0 + np.exp(-x))

    lengths = (tokens != PAD_ID).sum(-1)
    x0 = emb_table[tokens]                               # (B, T, E)

    def run(x_seq, w_ih, w_hh, b, reverse):
        h = np.zeros((B, H), np.float32)
        c = np.zeros((B, H), np.float32)
        outs = np.zeros((B, T, H), np.float32)
        order = range(T - 1, -1, -1) if reverse else range(T)
        for t in order:
            gates = x_seq[:, t] @ w_ih + h @ w_hh + b
            i = sigmoid(gates[:, :H]); f = sigmoid(gates[:, H:2 * H])
            g = np.tanh(gates[:, 2 * H:3 * H]); o = sigmoid(gates[:, 3 * H:])
            c_new = f * c + i * g
            h_new = o * np.tanh(c_new)
            valid = (lengths > t)[:, None]
            h = np.where(valid, h_new, h)
            c = np.where(valid, c_new, c)
            outs[:, t] = h
        return outs, h

    of, _ = run(x0, w_ih0f, w_hh0f, b0f, False)
    ob, _ = run(x0, w_ih0b, w_hh0b, b0b, True)
    x1 = np.concatenate([of, ob], axis=-1)
    _, h1f = run(x1, w_ih1f, w_hh1f, b1f, False)
    _, h1b = run(x1, w_ih1b, w_hh1b, b1b, True)
    feat = np.concatenate([h1f, h1b], axis=-1)
    logits = feat @ w_lin + b_lin
    m = logits.max(-1, keepdims=True)
    sh = logits - m
    return sh - np.log(np.exp(sh).sum(-1, keepdims=True))


if __name__ == "__main__":
    key = jax.random.PRNGKey(0)
    k_param, k_tok = jax.random.split(key)
    emb_table, params = init_params(k_param)

    # Token ids in [2, V); id 1 is padding. Seq 0 has full length T, seq 1 length 5.
    tokens = jax.random.randint(k_tok, (B, T), 2, V, dtype=jnp.int32)
    tokens = tokens.at[1, 5:].set(PAD_ID)

    # glue (plain JAX): embedding gather + length mask (replaces pack_padded_sequence)
    embeds = emb_table[tokens]                                     # (B, T, E)
    emb_flat = jnp.transpose(embeds, (1, 0, 2)).reshape(T * B, E)  # time-major flat rows
    lengths = jnp.sum(tokens != PAD_ID, axis=-1)                   # (B,)
    mask_tb = (jnp.arange(T)[:, None] < lengths[None, :]).astype(jnp.float32)   # (T, B)
    mask_flat = jnp.broadcast_to(mask_tb[:, :, None], (T, B, H)).reshape(T * B, H)

    kparams = prep_kernel_params(params)

    out = elmo_pallas(emb_flat, mask_flat, kparams)
    out = jax.block_until_ready(out)

    ref = elmo_reference(tokens, emb_table, params)
    # bf16 recurrent matmul operands (f32 accumulation) -> slightly looser tolerance.
    np.testing.assert_allclose(np.asarray(out), ref, atol=3e-2, rtol=0)
    assert out.shape == (B, V) and out.dtype == jnp.float32
    print("KERNEL_OK")
</pallas_src>

<mosaic_0001>
module attributes {stable_mosaic.version = 11 : i64} {
  func.func @elmo_kernel(%arg0: memref<16x32xf32, #tpu.memory_space<vmem>>, %arg1: memref<16x32xf32, #tpu.memory_space<vmem>>, %arg2: memref<32x128xf32, #tpu.memory_space<vmem>>, %arg3: memref<32x128xbf16, #tpu.memory_space<vmem>>, %arg4: memref<1x128xf32, #tpu.memory_space<vmem>>, %arg5: memref<32x128xf32, #tpu.memory_space<vmem>>, %arg6: memref<32x128xbf16, #tpu.memory_space<vmem>>, %arg7: memref<1x128xf32, #tpu.memory_space<vmem>>, %arg8: memref<64x128xf32, #tpu.memory_space<vmem>>, %arg9: memref<32x128xbf16, #tpu.memory_space<vmem>>, %arg10: memref<1x128xf32, #tpu.memory_space<vmem>>, %arg11: memref<64x128xf32, #tpu.memory_space<vmem>>, %arg12: memref<32x128xbf16, #tpu.memory_space<vmem>>, %arg13: memref<1x128xf32, #tpu.memory_space<vmem>>, %arg14: memref<64x64xf32, #tpu.memory_space<vmem>>, %arg15: memref<1x64xf32, #tpu.memory_space<vmem>>, %arg16: memref<2x64xf32, #tpu.memory_space<vmem>>, %arg17: memref<16x32xf32, #tpu.memory_space<vmem>>, %arg18: memref<16x32xf32, #tpu.memory_space<vmem>>) attributes {dimension_semantics = [], scalar_prefetch = 0 : i64, scratch_operands = 2 : i64, tpu.core_type = #tpu.core_type<tc>} {
    %c0 = arith.constant 0 : index
    %c0_0 = arith.constant 0 : index
    %0 = vector.load %arg0[%c0, %c0_0] : memref<16x32xf32, #tpu.memory_space<vmem>>, vector<16x32xf32>
    %c0_1 = arith.constant 0 : index
    %c0_2 = arith.constant 0 : index
    %1 = vector.load %arg1[%c0_1, %c0_2] : memref<16x32xf32, #tpu.memory_space<vmem>>, vector<16x32xf32>
    %cst = arith.constant 5.000000e-01 : f32
    %2 = vector.broadcast %cst : f32 to vector<16x32xf32>
    %3 = arith.cmpf ogt, %1, %2 : vector<16x32xf32>
    %c0_3 = arith.constant 0 : index
    %c0_4 = arith.constant 0 : index
    %4 = vector.load %arg3[%c0_3, %c0_4] : memref<32x128xbf16, #tpu.memory_space<vmem>>, vector<32x128xbf16>
    %c0_5 = arith.constant 0 : index
    %c0_6 = arith.constant 0 : index
    %5 = vector.load %arg6[%c0_5, %c0_6] : memref<32x128xbf16, #tpu.memory_space<vmem>>, vector<32x128xbf16>
    %c0_7 = arith.constant 0 : index
    %c0_8 = arith.constant 0 : index
    %6 = vector.load %arg9[%c0_7, %c0_8] : memref<32x128xbf16, #tpu.memory_space<vmem>>, vector<32x128xbf16>
    %c0_9 = arith.constant 0 : index
    %c0_10 = arith.constant 0 : index
    %7 = vector.load %arg12[%c0_9, %c0_10] : memref<32x128xbf16, #tpu.memory_space<vmem>>, vector<32x128xbf16>
    %c0_11 = arith.constant 0 : index
    %c0_12 = arith.constant 0 : index
    %8 = vector.load %arg2[%c0_11, %c0_12] : memref<32x128xf32, #tpu.memory_space<vmem>>, vector<32x128xf32>
    %cst_13 = arith.constant dense<0.000000e+00> : vector<16x128xf32>
    %9 = tpu.matmul %0, %8, %cst_13 {dimension_numbers = #tpu.dot_dimension_numbers<[1], [0], [0], [1], [0, 0, 1, 1], [], []>} : vector<16x32xf32>, vector<32x128xf32>, vector<16x128xf32> -> vector<16x128xf32>
    %c0_14 = arith.constant 0 : index
    %c0_15 = arith.constant 0 : index
    %10 = vector.load %arg4[%c0_14, %c0_15] : memref<1x128xf32, #tpu.memory_space<vmem>>, vector<1x128xf32>
    %11 = vector.broadcast %10 : vector<1x128xf32> to vector<16x128xf32>
    %12 = arith.addf %9, %11 : vector<16x128xf32>
    %c0_16 = arith.constant 0 : index
    %c0_17 = arith.constant 0 : index
    %13 = vector.load %arg5[%c0_16, %c0_17] : memref<32x128xf32, #tpu.memory_space<vmem>>, vector<32x128xf32>
    %cst_18 = arith.constant dense<0.000000e+00> : vector<16x128xf32>
    %14 = tpu.matmul %0, %13, %cst_18 {dimension_numbers = #tpu.dot_dimension_numbers<[1], [0], [0], [1], [0, 0, 1, 1], [], []>} : vector<16x32xf32>, vector<32x128xf32>, vector<16x128xf32> -> vector<16x128xf32>
    %c0_19 = arith.constant 0 : index
    %c0_20 = arith.constant 0 : index
    %15 = vector.load %arg7[%c0_19, %c0_20] : memref<1x128xf32, #tpu.memory_space<vmem>>, vector<1x128xf32>
    %16 = vector.broadcast %15 : vector<1x128xf32> to vector<16x128xf32>
    %17 = arith.addf %14, %16 : vector<16x128xf32>
    %cst_21 = arith.constant 0.000000e+00 : f32
    %18 = vector.broadcast %cst_21 : f32 to vector<2x32xf32>
    %19 = vector.extract_strided_slice %12 {offsets = [0, 0], sizes = [2, 128], strides = [1, 1]} : vector<16x128xf32> to vector<2x128xf32>
    %20 = vector.extract_strided_slice %3 {offsets = [0, 0], sizes = [2, 32], strides = [1, 1]} : vector<16x32xi1> to vector<2x32xi1>
    %21 = arith.truncf %18 : vector<2x32xf32> to vector<2x32xbf16>
    %cst_22 = arith.constant dense<0.000000e+00> : vector<2x128xf32>
    %22 = tpu.matmul %21, %4, %cst_22 {dimension_numbers = #tpu.dot_dimension_numbers<[1], [0], [0], [1], [0, 0, 1, 1], [], []>} : vector<2x32xbf16>, vector<32x128xbf16>, vector<2x128xf32> -> vector<2x128xf32>
    %23 = arith.addf %19, %22 : vector<2x128xf32>
    %24 = arith.negf %23 : vector<2x128xf32>
    %25 = math.exp %24 : vector<2x128xf32>
    %cst_23 = arith.constant 1.000000e+00 : f32
    %26 = vector.broadcast %cst_23 : f32 to vector<2x128xf32>
    %27 = arith.addf %26, %25 : vector<2x128xf32>
    %28 = arith.divf %26, %27 : vector<2x128xf32>
    %29 = vector.extract_strided_slice %28 {offsets = [0, 0], sizes = [2, 32], strides = [1, 1]} : vector<2x128xf32> to vector<2x32xf32>
    %30 = vector.extract_strided_slice %28 {offsets = [0, 32], sizes = [2, 32], strides = [1, 1]} : vector<2x128xf32> to vector<2x32xf32>
    %31 = vector.extract_strided_slice %28 {offsets = [0, 64], sizes = [2, 32], strides = [1, 1]} : vector<2x128xf32> to vector<2x32xf32>
    %cst_24 = arith.constant 2.000000e+00 : f32
    %32 = vector.broadcast %cst_24 : f32 to vector<2x32xf32>
    %33 = arith.mulf %32, %31 : vector<2x32xf32>
    %cst_25 = arith.constant 1.000000e+00 : f32
    %34 = vector.broadcast %cst_25 : f32 to vector<2x32xf32>
    %35 = arith.subf %33, %34 : vector<2x32xf32>
    %36 = vector.extract_strided_slice %28 {offsets = [0, 96], sizes = [2, 32], strides = [1, 1]} : vector<2x128xf32> to vector<2x32xf32>
    %37 = arith.mulf %30, %18 : vector<2x32xf32>
    %38 = arith.mulf %29, %35 : vector<2x32xf32>
    %39 = arith.addf %37, %38 : vector<2x32xf32>
    %40 = math.tanh %39 : vector<2x32xf32>
    %41 = arith.mulf %36, %40 : vector<2x32xf32>
    %42 = arith.select %20, %41, %18 : vector<2x32xi1>, vector<2x32xf32>
    %43 = arith.select %20, %39, %18 : vector<2x32xi1>, vector<2x32xf32>
    %44 = vector.extract_strided_slice %17 {offsets = [14, 0], sizes = [2, 128], strides = [1, 1]} : vector<16x128xf32> to vector<2x128xf32>
    %45 = vector.extract_strided_slice %3 {offsets = [14, 0], sizes = [2, 32], strides = [1, 1]} : vector<16x32xi1> to vector<2x32xi1>
    %46 = arith.truncf %18 : vector<2x32xf32> to vector<2x32xbf16>
    %cst_26 = arith.constant dense<0.000000e+00> : vector<2x128xf32>
    %47 = tpu.matmul %46, %5, %cst_26 {dimension_numbers = #tpu.dot_dimension_numbers<[1], [0], [0], [1], [0, 0, 1, 1], [], []>} : vector<2x32xbf16>, vector<32x128xbf16>, vector<2x128xf32> -> vector<2x128xf32>
    %48 = arith.addf %44, %47 : vector<2x128xf32>
    %49 = arith.negf %48 : vector<2x128xf32>
    %50 = math.exp %49 : vector<2x128xf32>
    %cst_27 = arith.constant 1.000000e+00 : f32
    %51 = vector.broadcast %cst_27 : f32 to vector<2x128xf32>
    %52 = arith.addf %51, %50 : vector<2x128xf32>
    %53 = arith.divf %51, %52 : vector<2x128xf32>
    %54 = vector.extract_strided_slice %53 {offsets = [0, 0], sizes = [2, 32], strides = [1, 1]} : vector<2x128xf32> to vector<2x32xf32>
    %55 = vector.extract_strided_slice %53 {offsets = [0, 32], sizes = [2, 32], strides = [1, 1]} : vector<2x128xf32> to vector<2x32xf32>
    %56 = vector.extract_strided_slice %53 {offsets = [0, 64], sizes = [2, 32], strides = [1, 1]} : vector<2x128xf32> to vector<2x32xf32>
    %cst_28 = arith.constant 2.000000e+00 : f32
    %57 = vector.broadcast %cst_28 : f32 to vector<2x32xf32>
    %58 = arith.mulf %57, %56 : vector<2x32xf32>
    %cst_29 = arith.constant 1.000000e+00 : f32
    %59 = vector.broadcast %cst_29 : f32 to vector<2x32xf32>
    %60 = arith.subf %58, %59 : vector<2x32xf32>
    %61 = vector.extract_strided_slice %53 {offsets = [0, 96], sizes = [2, 32], strides = [1, 1]} : vector<2x128xf32> to vector<2x32xf32>
    %62 = arith.mulf %55, %18 : vector<2x32xf32>
    %63 = arith.mulf %54, %60 : vector<2x32xf32>
    %64 = arith.addf %62, %63 : vector<2x32xf32>
    %65 = math.tanh %64 : vector<2x32xf32>
    %66 = arith.mulf %61, %65 : vector<2x32xf32>
    %67 = arith.select %45, %66, %18 : vector<2x32xi1>, vector<2x32xf32>
    %68 = arith.select %45, %64, %18 : vector<2x32xi1>, vector<2x32xf32>
    %c0_30 = arith.constant 0 : index
    %c0_31 = arith.constant 0 : index
    %69 = vector.load %arg17[%c0_30, %c0_31] : memref<16x32xf32, #tpu.memory_space<vmem>>, vector<2x32xf32>
    tpu.vector_store %arg17[%c0_30, %c0_31], %42 {strides = array<i32>} : memref<16x32xf32, #tpu.memory_space<vmem>>, vector<2x32xf32>,
    %c14 = arith.constant 14 : index
    %c0_32 = arith.constant 0 : index
    %70 = vector.load %arg18[%c14, %c0_32] : memref<16x32xf32, #tpu.memory_space<vmem>>, vector<2x32xf32>
    tpu.vector_store %arg18[%c14, %c0_32], %67 {strides = array<i32>} : memref<16x32xf32, #tpu.memory_space<vmem>>, vector<2x32xf32>,
    %71 = vector.extract_strided_slice %12 {offsets = [2, 0], sizes = [2, 128], strides = [1, 1]} : vector<16x128xf32> to vector<2x128xf32>
    %72 = vector.extract_strided_slice %3 {offsets = [2, 0], sizes = [2, 32], strides = [1, 1]} : vector<16x32xi1> to vector<2x32xi1>
    %73 = arith.truncf %42 : vector<2x32xf32> to vector<2x32xbf16>
    %cst_33 = arith.constant dense<0.000000e+00> : vector<2x128xf32>
    %74 = tpu.matmul %73, %4, %cst_33 {dimension_numbers = #tpu.dot_dimension_numbers<[1], [0], [0], [1], [0, 0, 1, 1], [], []>} : vector<2x32xbf16>, vector<32x128xbf16>, vector<2x128xf32> -> vector<2x128xf32>
    %75 = arith.addf %71, %74 : vector<2x128xf32>
    %76 = arith.negf %75 : vector<2x128xf32>
    %77 = math.exp %76 : vector<2x128xf32>
    %cst_34 = arith.constant 1.000000e+00 : f32
    %78 = vector.broadcast %cst_34 : f32 to vector<2x128xf32>
    %79 = arith.addf %78, %77 : vector<2x128xf32>
    %80 = arith.divf %78, %79 : vector<2x128xf32>
    %81 = vector.extract_strided_slice %80 {offsets = [0, 0], sizes = [2, 32], strides = [1, 1]} : vector<2x128xf32> to vector<2x32xf32>
    %82 = vector.extract_strided_slice %80 {offsets = [0, 32], sizes = [2, 32], strides = [1, 1]} : vector<2x128xf32> to vector<2x32xf32>
    %83 = vector.extract_strided_slice %80 {offsets = [0, 64], sizes = [2, 32], strides = [1, 1]} : vector<2x128xf32> to vector<2x32xf32>
    %cst_35 = arith.constant 2.000000e+00 : f32
    %84 = vector.broadcast %cst_35 : f32 to vector<2x32xf32>
    %85 = arith.mulf %84, %83 : vector<2x32xf32>
    %cst_36 = arith.constant 1.000000e+00 : f32
    %86 = vector.broadcast %cst_36 : f32 to vector<2x32xf32>
    %87 = arith.subf %85, %86 : vector<2x32xf32>
    %88 = vector.extract_strided_slice %80 {offsets = [0, 96], sizes = [2, 32], strides = [1, 1]} : vector<2x128xf32> to vector<2x32xf32>
    %89 = arith.mulf %82, %43 : vector<2x32xf32>
    %90 = arith.mulf %81, %87 : vector<2x32xf32>
    %91 = arith.addf %89, %90 : vector<2x32xf32>
    %92 = math.tanh %91 : vector<2x32xf32>
    %93 = arith.mulf %88, %92 : vector<2x32xf32>
    %94 = arith.select %72, %93, %42 : vector<2x32xi1>, vector<2x32xf32>
    %95 = arith.select %72, %91, %43 : vector<2x32xi1>, vector<2x32xf32>
    %96 = vector.extract_strided_slice %17 {offsets = [12, 0], sizes = [2, 128], strides = [1, 1]} : vector<16x128xf32> to vector<2x128xf32>
    %97 = vector.extract_strided_slice %3 {offsets = [12, 0], sizes = [2, 32], strides = [1, 1]} : vector<16x32xi1> to vector<2x32xi1>
    %98 = arith.truncf %67 : vector<2x32xf32> to vector<2x32xbf16>
    %cst_37 = arith.constant dense<0.000000e+00> : vector<2x128xf32>
    %99 = tpu.matmul %98, %5, %cst_37 {dimension_numbers = #tpu.dot_dimension_numbers<[1], [0], [0], [1], [0, 0, 1, 1], [], []>} : vector<2x32xbf16>, vector<32x128xbf16>, vector<2x128xf32> -> vector<2x128xf32>
    %100 = arith.addf %96, %99 : vector<2x128xf32>
    %101 = arith.negf %100 : vector<2x128xf32>
    %102 = math.exp %101 : vector<2x128xf32>
    %cst_38 = arith.constant 1.000000e+00 : f32
    %103 = vector.broadcast %cst_38 : f32 to vector<2x128xf32>
    %104 = arith.addf %103, %102 : vector<2x128xf32>
    %105 = arith.divf %103, %104 : vector<2x128xf32>
    %106 = vector.extract_strided_slice %105 {offsets = [0, 0], sizes = [2, 32], strides = [1, 1]} : vector<2x128xf32> to vector<2x32xf32>
    %107 = vector.extract_strided_slice %105 {offsets = [0, 32], sizes = [2, 32], strides = [1, 1]} : vector<2x128xf32> to vector<2x32xf32>
    %108 = vector.extract_strided_slice %105 {offsets = [0, 64], sizes = [2, 32], strides = [1, 1]} : vector<2x128xf32> to vector<2x32xf32>
    %cst_39 = arith.constant 2.000000e+00 : f32
    %109 = vector.broadcast %cst_39 : f32 to vector<2x32xf32>
    %110 = arith.mulf %109, %108 : vector<2x32xf32>
    %cst_40 = arith.constant 1.000000e+00 : f32
    %111 = vector.broadcast %cst_40 : f32 to vector<2x32xf32>
    %112 = arith.subf %110, %111 : vector<2x32xf32>
    %113 = vector.extract_strided_slice %105 {offsets = [0, 96], sizes = [2, 32], strides = [1, 1]} : vector<2x128xf32> to vector<2x32xf32>
    %114 = arith.mulf %107, %68 : vector<2x32xf32>
    %115 = arith.mulf %106, %112 : vector<2x32xf32>
    %116 = arith.addf %114, %115 : vector<2x32xf32>
    %117 = math.tanh %116 : vector<2x32xf32>
    %118 = arith.mulf %113, %117 : vector<2x32xf32>
    %119 = arith.select %97, %118, %67 : vector<2x32xi1>, vector<2x32xf32>
    %120 = arith.select %97, %116, %68 : vector<2x32xi1>, vector<2x32xf32>
    %c2 = arith.constant 2 : index
    %c0_41 = arith.constant 0 : index
    %121 = vector.load %arg17[%c2, %c0_41] : memref<16x32xf32, #tpu.memory_space<vmem>>, vector<2x32xf32>
    tpu.vector_store %arg17[%c2, %c0_41], %94 {strides = array<i32>} : memref<16x32xf32, #tpu.memory_space<vmem>>, vector<2x32xf32>,
    %c12 = arith.constant 12 : index
    %c0_42 = arith.constant 0 : index
    %122 = vector.load %arg18[%c12, %c0_42] : memref<16x32xf32, #tpu.memory_space<vmem>>, vector<2x32xf32>
    tpu.vector_store %arg18[%c12, %c0_42], %119 {strides = array<i32>} : memref<16x32xf32, #tpu.memory_space<vmem>>, vector<2x32xf32>,
    %123 = vector.extract_strided_slice %12 {offsets = [4, 0], sizes = [2, 128], strides = [1, 1]} : vector<16x128xf32> to vector<2x128xf32>
    %124 = vector.extract_strided_slice %3 {offsets = [4, 0], sizes = [2, 32], strides = [1, 1]} : vector<16x32xi1> to vector<2x32xi1>
    %125 = arith.truncf %94 : vector<2x32xf32> to vector<2x32xbf16>
    %cst_43 = arith.constant dense<0.000000e+00> : vector<2x128xf32>
    %126 = tpu.matmul %125, %4, %cst_43 {dimension_numbers = #tpu.dot_dimension_numbers<[1], [0], [0], [1], [0, 0, 1, 1], [], []>} : vector<2x32xbf16>, vector<32x128xbf16>, vector<2x128xf32> -> vector<2x128xf32>
    %127 = arith.addf %123, %126 : vector<2x128xf32>
    %128 = arith.negf %127 : vector<2x128xf32>
    %129 = math.exp %128 : vector<2x128xf32>
    %cst_44 = arith.constant 1.000000e+00 : f32
    %130 = vector.broadcast %cst_44 : f32 to vector<2x128xf32>
    %131 = arith.addf %130, %129 : vector<2x128xf32>
    %132 = arith.divf %130, %131 : vector<2x128xf32>
    %133 = vector.extract_strided_slice %132 {offsets = [0, 0], sizes = [2, 32], strides = [1, 1]} : vector<2x128xf32> to vector<2x32xf32>
    %134 = vector.extract_strided_slice %132 {offsets = [0, 32], sizes = [2, 32], strides = [1, 1]} : vector<2x128xf32> to vector<2x32xf32>
    %135 = vector.extract_strided_slice %132 {offsets = [0, 64], sizes = [2, 32], strides = [1, 1]} : vector<2x128xf32> to vector<2x32xf32>
    %cst_45 = arith.constant 2.000000e+00 : f32
    %136 = vector.broadcast %cst_45 : f32 to vector<2x32xf32>
    %137 = arith.mulf %136, %135 : vector<2x32xf32>
    %cst_46 = arith.constant 1.000000e+00 : f32
    %138 = vector.broadcast %cst_46 : f32 to vector<2x32xf32>
    %139 = arith.subf %137, %138 : vector<2x32xf32>
    %140 = vector.extract_strided_slice %132 {offsets = [0, 96], sizes = [2, 32], strides = [1, 1]} : vector<2x128xf32> to vector<2x32xf32>
    %141 = arith.mulf %134, %95 : vector<2x32xf32>
    %142 = arith.mulf %133, %139 : vector<2x32xf32>
    %143 = arith.addf %141, %142 : vector<2x32xf32>
    %144 = math.tanh %143 : vector<2x32xf32>
    %145 = arith.mulf %140, %144 : vector<2x32xf32>
    %146 = arith.select %124, %145, %94 : vector<2x32xi1>, vector<2x32xf32>
    %147 = arith.select %124, %143, %95 : vector<2x32xi1>, vector<2x32xf32>
    %148 = vector.extract_strided_slice %17 {offsets = [10, 0], sizes = [2, 128], strides = [1, 1]} : vector<16x128xf32> to vector<2x128xf32>
    %149 = vector.extract_strided_slice %3 {offsets = [10, 0], sizes = [2, 32], strides = [1, 1]} : vector<16x32xi1> to vector<2x32xi1>
    %150 = arith.truncf %119 : vector<2x32xf32> to vector<2x32xbf16>
    %cst_47 = arith.constant dense<0.000000e+00> : vector<2x128xf32>
    %151 = tpu.matmul %150, %5, %cst_47 {dimension_numbers = #tpu.dot_dimension_numbers<[1], [0], [0], [1], [0, 0, 1, 1], [], []>} : vector<2x32xbf16>, vector<32x128xbf16>, vector<2x128xf32> -> vector<2x128xf32>
    %152 = arith.addf %148, %151 : vector<2x128xf32>
    %153 = arith.negf %152 : vector<2x128xf32>
    %154 = math.exp %153 : vector<2x128xf32>
    %cst_48 = arith.constant 1.000000e+00 : f32
    %155 = vector.broadcast %cst_48 : f32 to vector<2x128xf32>
    %156 = arith.addf %155, %154 : vector<2x128xf32>
    %157 = arith.divf %155, %156 : vector<2x128xf32>
    %158 = vector.extract_strided_slice %157 {offsets = [0, 0], sizes = [2, 32], strides = [1, 1]} : vector<2x128xf32> to vector<2x32xf32>
    %159 = vector.extract_strided_slice %157 {offsets = [0, 32], sizes = [2, 32], strides = [1, 1]} : vector<2x128xf32> to vector<2x32xf32>
    %160 = vector.extract_strided_slice %157 {offsets = [0, 64], sizes = [2, 32], strides = [1, 1]} : vector<2x128xf32> to vector<2x32xf32>
    %cst_49 = arith.constant 2.000000e+00 : f32
    %161 = vector.broadcast %cst_49 : f32 to vector<2x32xf32>
    %162 = arith.mulf %161, %160 : vector<2x32xf32>
    %cst_50 = arith.constant 1.000000e+00 : f32
    %163 = vector.broadcast %cst_50 : f32 to vector<2x32xf32>
    %164 = arith.subf %162, %163 : vector<2x32xf32>
    %165 = vector.extract_strided_slice %157 {offsets = [0, 96], sizes = [2, 32], strides = [1, 1]} : vector<2x128xf32> to vector<2x32xf32>
    %166 = arith.mulf %159, %120 : vector<2x32xf32>
    %167 = arith.mulf %158, %164 : vector<2x32xf32>
    %168 = arith.addf %166, %167 : vector<2x32xf32>
    %169 = math.tanh %168 : vector<2x32xf32>
    %170 = arith.mulf %165, %169 : vector<2x32xf32>
    %171 = arith.select %149, %170, %119 : vector<2x32xi1>, vector<2x32xf32>
    %172 = arith.select %149, %168, %120 : vector<2x32xi1>, vector<2x32xf32>
    %c4 = arith.constant 4 : index
    %c0_51 = arith.constant 0 : index
    %173 = vector.load %arg17[%c4, %c0_51] : memref<16x32xf32, #tpu.memory_space<vmem>>, vector<2x32xf32>
    tpu.vector_store %arg17[%c4, %c0_51], %146 {strides = array<i32>} : memref<16x32xf32, #tpu.memory_space<vmem>>, vector<2x32xf32>,
    %c10 = arith.constant 10 : index
    %c0_52 = arith.constant 0 : index
    %174 = vector.load %arg18[%c10, %c0_52] : memref<16x32xf32, #tpu.memory_space<vmem>>, vector<2x32xf32>
    tpu.vector_store %arg18[%c10, %c0_52], %171 {strides = array<i32>} : memref<16x32xf32, #tpu.memory_space<vmem>>, vector<2x32xf32>,
    %175 = vector.extract_strided_slice %12 {offsets = [6, 0], sizes = [2, 128], strides = [1, 1]} : vector<16x128xf32> to vector<2x128xf32>
    %176 = vector.extract_strided_slice %3 {offsets = [6, 0], sizes = [2, 32], strides = [1, 1]} : vector<16x32xi1> to vector<2x32xi1>
    %177 = arith.truncf %146 : vector<2x32xf32> to vector<2x32xbf16>
    %cst_53 = arith.constant dense<0.000000e+00> : vector<2x128xf32>
    %178 = tpu.matmul %177, %4, %cst_53 {dimension_numbers = #tpu.dot_dimension_numbers<[1], [0], [0], [1], [0, 0, 1, 1], [], []>} : vector<2x32xbf16>, vector<32x128xbf16>, vector<2x128xf32> -> vector<2x128xf32>
    %179 = arith.addf %175, %178 : vector<2x128xf32>
    %180 = arith.negf %179 : vector<2x128xf32>
    %181 = math.exp %180 : vector<2x128xf32>
    %cst_54 = arith.constant 1.000000e+00 : f32
    %182 = vector.broadcast %cst_54 : f32 to vector<2x128xf32>
    %183 = arith.addf %182, %181 : vector<2x128xf32>
    %184 = arith.divf %182, %183 : vector<2x128xf32>
    %185 = vector.extract_strided_slice %184 {offsets = [0, 0], sizes = [2, 32], strides = [1, 1]} : vector<2x128xf32> to vector<2x32xf32>
    %186 = vector.extract_strided_slice %184 {offsets = [0, 32], sizes = [2, 32], strides = [1, 1]} : vector<2x128xf32> to vector<2x32xf32>
    %187 = vector.extract_strided_slice %184 {offsets = [0, 64], sizes = [2, 32], strides = [1, 1]} : vector<2x128xf32> to vector<2x32xf32>
    %cst_55 = arith.constant 2.000000e+00 : f32
    %188 = vector.broadcast %cst_55 : f32 to vector<2x32xf32>
    %189 = arith.mulf %188, %187 : vector<2x32xf32>
    %cst_56 = arith.constant 1.000000e+00 : f32
    %190 = vector.broadcast %cst_56 : f32 to vector<2x32xf32>
    %191 = arith.subf %189, %190 : vector<2x32xf32>
    %192 = vector.extract_strided_slice %184 {offsets = [0, 96], sizes = [2, 32], strides = [1, 1]} : vector<2x128xf32> to vector<2x32xf32>
    %193 = arith.mulf %186, %147 : vector<2x32xf32>
    %194 = arith.mulf %185, %191 : vector<2x32xf32>
    %195 = arith.addf %193, %194 : vector<2x32xf32>
    %196 = math.tanh %195 : vector<2x32xf32>
    %197 = arith.mulf %192, %196 : vector<2x32xf32>
    %198 = arith.select %176, %197, %146 : vector<2x32xi1>, vector<2x32xf32>
    %199 = arith.select %176, %195, %147 : vector<2x32xi1>, vector<2x32xf32>
    %200 = vector.extract_strided_slice %17 {offsets = [8, 0], sizes = [2, 128], strides = [1, 1]} : vector<16x128xf32> to vector<2x128xf32>
    %201 = vector.extract_strided_slice %3 {offsets = [8, 0], sizes = [2, 32], strides = [1, 1]} : vector<16x32xi1> to vector<2x32xi1>
    %202 = arith.truncf %171 : vector<2x32xf32> to vector<2x32xbf16>
    %cst_57 = arith.constant dense<0.000000e+00> : vector<2x128xf32>
    %203 = tpu.matmul %202, %5, %cst_57 {dimension_numbers = #tpu.dot_dimension_numbers<[1], [0], [0], [1], [0, 0, 1, 1], [], []>} : vector<2x32xbf16>, vector<32x128xbf16>, vector<2x128xf32> -> vector<2x128xf32>
    %204 = arith.addf %200, %203 : vector<2x128xf32>
    %205 = arith.negf %204 : vector<2x128xf32>
    %206 = math.exp %205 : vector<2x128xf32>
    %cst_58 = arith.constant 1.000000e+00 : f32
    %207 = vector.broadcast %cst_58 : f32 to vector<2x128xf32>
    %208 = arith.addf %207, %206 : vector<2x128xf32>
    %209 = arith.divf %207, %208 : vector<2x128xf32>
    %210 = vector.extract_strided_slice %209 {offsets = [0, 0], sizes = [2, 32], strides = [1, 1]} : vector<2x128xf32> to vector<2x32xf32>
    %211 = vector.extract_strided_slice %209 {offsets = [0, 32], sizes = [2, 32], strides = [1, 1]} : vector<2x128xf32> to vector<2x32xf32>
    %212 = vector.extract_strided_slice %209 {offsets = [0, 64], sizes = [2, 32], strides = [1, 1]} : vector<2x128xf32> to vector<2x32xf32>
    %cst_59 = arith.constant 2.000000e+00 : f32
    %213 = vector.broadcast %cst_59 : f32 to vector<2x32xf32>
    %214 = arith.mulf %213, %212 : vector<2x32xf32>
    %cst_60 = arith.constant 1.000000e+00 : f32
    %215 = vector.broadcast %cst_60 : f32 to vector<2x32xf32>
    %216 = arith.subf %214, %215 : vector<2x32xf32>
    %217 = vector.extract_strided_slice %209 {offsets = [0, 96], sizes = [2, 32], strides = [1, 1]} : vector<2x128xf32> to vector<2x32xf32>
    %218 = arith.mulf %211, %172 : vector<2x32xf32>
    %219 = arith.mulf %210, %216 : vector<2x32xf32>
    %220 = arith.addf %218, %219 : vector<2x32xf32>
    %221 = math.tanh %220 : vector<2x32xf32>
    %222 = arith.mulf %217, %221 : vector<2x32xf32>
    %223 = arith.select %201, %222, %171 : vector<2x32xi1>, vector<2x32xf32>
    %224 = arith.select %201, %220, %172 : vector<2x32xi1>, vector<2x32xf32>
    %c6 = arith.constant 6 : index
    %c0_61 = arith.constant 0 : index
    %225 = vector.load %arg17[%c6, %c0_61] : memref<16x32xf32, #tpu.memory_space<vmem>>, vector<2x32xf32>
    tpu.vector_store %arg17[%c6, %c0_61], %198 {strides = array<i32>} : memref<16x32xf32, #tpu.memory_space<vmem>>, vector<2x32xf32>,
    %c8 = arith.constant 8 : index
    %c0_62 = arith.constant 0 : index
    %226 = vector.load %arg18[%c8, %c0_62] : memref<16x32xf32, #tpu.memory_space<vmem>>, vector<2x32xf32>
    tpu.vector_store %arg18[%c8, %c0_62], %223 {strides = array<i32>} : memref<16x32xf32, #tpu.memory_space<vmem>>, vector<2x32xf32>,
    %227 = vector.extract_strided_slice %12 {offsets = [8, 0], sizes = [2, 128], strides = [1, 1]} : vector<16x128xf32> to vector<2x128xf32>
    %228 = vector.extract_strided_slice %3 {offsets = [8, 0], sizes = [2, 32], strides = [1, 1]} : vector<16x32xi1> to vector<2x32xi1>
    %229 = arith.truncf %198 : vector<2x32xf32> to vector<2x32xbf16>
    %cst_63 = arith.constant dense<0.000000e+00> : vector<2x128xf32>
    %230 = tpu.matmul %229, %4, %cst_63 {dimension_numbers = #tpu.dot_dimension_numbers<[1], [0], [0], [1], [0, 0, 1, 1], [], []>} : vector<2x32xbf16>, vector<32x128xbf16>, vector<2x128xf32> -> vector<2x128xf32>
    %231 = arith.addf %227, %230 : vector<2x128xf32>
    %232 = arith.negf %231 : vector<2x128xf32>
    %233 = math.exp %232 : vector<2x128xf32>
    %cst_64 = arith.constant 1.000000e+00 : f32
    %234 = vector.broadcast %cst_64 : f32 to vector<2x128xf32>
    %235 = arith.addf %234, %233 : vector<2x128xf32>
    %236 = arith.divf %234, %235 : vector<2x128xf32>
    %237 = vector.extract_strided_slice %236 {offsets = [0, 0], sizes = [2, 32], strides = [1, 1]} : vector<2x128xf32> to vector<2x32xf32>
    %238 = vector.extract_strided_slice %236 {offsets = [0, 32], sizes = [2, 32], strides = [1, 1]} : vector<2x128xf32> to vector<2x32xf32>
    %239 = vector.extract_strided_slice %236 {offsets = [0, 64], sizes = [2, 32], strides = [1, 1]} : vector<2x128xf32> to vector<2x32xf32>
    %cst_65 = arith.constant 2.000000e+00 : f32
    %240 = vector.broadcast %cst_65 : f32 to vector<2x32xf32>
    %241 = arith.mulf %240, %239 : vector<2x32xf32>
    %cst_66 = arith.constant 1.000000e+00 : f32
    %242 = vector.broadcast %cst_66 : f32 to vector<2x32xf32>
    %243 = arith.subf %241, %242 : vector<2x32xf32>
    %244 = vector.extract_strided_slice %236 {offsets = [0, 96], sizes = [2, 32], strides = [1, 1]} : vector<2x128xf32> to vector<2x32xf32>
    %245 = arith.mulf %238, %199 : vector<2x32xf32>
    %246 = arith.mulf %237, %243 : vector<2x32xf32>
    %247 = arith.addf %245, %246 : vector<2x32xf32>
    %248 = math.tanh %247 : vector<2x32xf32>
    %249 = arith.mulf %244, %248 : vector<2x32xf32>
    %250 = arith.select %228, %249, %198 : vector<2x32xi1>, vector<2x32xf32>
    %251 = arith.select %228, %247, %199 : vector<2x32xi1>, vector<2x32xf32>
    %252 = vector.extract_strided_slice %17 {offsets = [6, 0], sizes = [2, 128], strides = [1, 1]} : vector<16x128xf32> to vector<2x128xf32>
    %253 = vector.extract_strided_slice %3 {offsets = [6, 0], sizes = [2, 32], strides = [1, 1]} : vector<16x32xi1> to vector<2x32xi1>
    %254 = arith.truncf %223 : vector<2x32xf32> to vector<2x32xbf16>
    %cst_67 = arith.constant dense<0.000000e+00> : vector<2x128xf32>
    %255 = tpu.matmul %254, %5, %cst_67 {dimension_numbers = #tpu.dot_dimension_numbers<[1], [0], [0], [1], [0, 0, 1, 1], [], []>} : vector<2x32xbf16>, vector<32x128xbf16>, vector<2x128xf32> -> vector<2x128xf32>
    %256 = arith.addf %252, %255 : vector<2x128xf32>
    %257 = arith.negf %256 : vector<2x128xf32>
    %258 = math.exp %257 : vector<2x128xf32>
    %cst_68 = arith.constant 1.000000e+00 : f32
    %259 = vector.broadcast %cst_68 : f32 to vector<2x128xf32>
    %260 = arith.addf %259, %258 : vector<2x128xf32>
    %261 = arith.divf %259, %260 : vector<2x128xf32>
    %262 = vector.extract_strided_slice %261 {offsets = [0, 0], sizes = [2, 32], strides = [1, 1]} : vector<2x128xf32> to vector<2x32xf32>
    %263 = vector.extract_strided_slice %261 {offsets = [0, 32], sizes = [2, 32], strides = [1, 1]} : vector<2x128xf32> to vector<2x32xf32>
    %264 = vector.extract_strided_slice %261 {offsets = [0, 64], sizes = [2, 32], strides = [1, 1]} : vector<2x128xf32> to vector<2x32xf32>
    %cst_69 = arith.constant 2.000000e+00 : f32
    %265 = vector.broadcast %cst_69 : f32 to vector<2x32xf32>
    %266 = arith.mulf %265, %264 : vector<2x32xf32>
    %cst_70 = arith.constant 1.000000e+00 : f32
    %267 = vector.broadcast %cst_70 : f32 to vector<2x32xf32>
    %268 = arith.subf %266, %267 : vector<2x32xf32>
    %269 = vector.extract_strided_slice %261 {offsets = [0, 96], sizes = [2, 32], strides = [1, 1]} : vector<2x128xf32> to vector<2x32xf32>
    %270 = arith.mulf %263, %224 : vector<2x32xf32>
    %271 = arith.mulf %262, %268 : vector<2x32xf32>
    %272 = arith.addf %270, %271 : vector<2x32xf32>
    %273 = math.tanh %272 : vector<2x32xf32>
    %274 = arith.mulf %269, %273 : vector<2x32xf32>
    %275 = arith.select %253, %274, %223 : vector<2x32xi1>, vector<2x32xf32>
    %276 = arith.select %253, %272, %224 : vector<2x32xi1>, vector<2x32xf32>
    %c8_71 = arith.constant 8 : index
    %c0_72 = arith.constant 0 : index
    %277 = vector.load %arg17[%c8_71, %c0_72] : memref<16x32xf32, #tpu.memory_space<vmem>>, vector<2x32xf32>
    tpu.vector_store %arg17[%c8_71, %c0_72], %250 {strides = array<i32>} : memref<16x32xf32, #tpu.memory_space<vmem>>, vector<2x32xf32>,
    %c6_73 = arith.constant 6 : index
    %c0_74 = arith.constant 0 : index
    %278 = vector.load %arg18[%c6_73, %c0_74] : memref<16x32xf32, #tpu.memory_space<vmem>>, vector<2x32xf32>
    tpu.vector_store %arg18[%c6_73, %c0_74], %275 {strides = array<i32>} : memref<16x32xf32, #tpu.memory_space<vmem>>, vector<2x32xf32>,
    %279 = vector.extract_strided_slice %12 {offsets = [10, 0], sizes = [2, 128], strides = [1, 1]} : vector<16x128xf32> to vector<2x128xf32>
    %280 = vector.extract_strided_slice %3 {offsets = [10, 0], sizes = [2, 32], strides = [1, 1]} : vector<16x32xi1> to vector<2x32xi1>
    %281 = arith.truncf %250 : vector<2x32xf32> to vector<2x32xbf16>
    %cst_75 = arith.constant dense<0.000000e+00> : vector<2x128xf32>
    %282 = tpu.matmul %281, %4, %cst_75 {dimension_numbers = #tpu.dot_dimension_numbers<[1], [0], [0], [1], [0, 0, 1, 1], [], []>} : vector<2x32xbf16>, vector<32x128xbf16>, vector<2x128xf32> -> vector<2x128xf32>
    %283 = arith.addf %279, %282 : vector<2x128xf32>
    %284 = arith.negf %283 : vector<2x128xf32>
    %285 = math.exp %284 : vector<2x128xf32>
    %cst_76 = arith.constant 1.000000e+00 : f32
    %286 = vector.broadcast %cst_76 : f32 to vector<2x128xf32>
    %287 = arith.addf %286, %285 : vector<2x128xf32>
    %288 = arith.divf %286, %287 : vector<2x128xf32>
    %289 = vector.extract_strided_slice %288 {offsets = [0, 0], sizes = [2, 32], strides = [1, 1]} : vector<2x128xf32> to vector<2x32xf32>
    %290 = vector.extract_strided_slice %288 {offsets = [0, 32], sizes = [2, 32], strides = [1, 1]} : vector<2x128xf32> to vector<2x32xf32>
    %291 = vector.extract_strided_slice %288 {offsets = [0, 64], sizes = [2, 32], strides = [1, 1]} : vector<2x128xf32> to vector<2x32xf32>
    %cst_77 = arith.constant 2.000000e+00 : f32
    %292 = vector.broadcast %cst_77 : f32 to vector<2x32xf32>
    %293 = arith.mulf %292, %291 : vector<2x32xf32>
    %cst_78 = arith.constant 1.000000e+00 : f32
    %294 = vector.broadcast %cst_78 : f32 to vector<2x32xf32>
    %295 = arith.subf %293, %294 : vector<2x32xf32>
    %296 = vector.extract_strided_slice %288 {offsets = [0, 96], sizes = [2, 32], strides = [1, 1]} : vector<2x128xf32> to vector<2x32xf32>
    %297 = arith.mulf %290, %251 : vector<2x32xf32>
    %298 = arith.mulf %289, %295 : vector<2x32xf32>
    %299 = arith.addf %297, %298 : vector<2x32xf32>
    %300 = math.tanh %299 : vector<2x32xf32>
    %301 = arith.mulf %296, %300 : vector<2x32xf32>
    %302 = arith.select %280, %301, %250 : vector<2x32xi1>, vector<2x32xf32>
    %303 = arith.select %280, %299, %251 : vector<2x32xi1>, vector<2x32xf32>
    %304 = vector.extract_strided_slice %17 {offsets = [4, 0], sizes = [2, 128], strides = [1, 1]} : vector<16x128xf32> to vector<2x128xf32>
    %305 = vector.extract_strided_slice %3 {offsets = [4, 0], sizes = [2, 32], strides = [1, 1]} : vector<16x32xi1> to vector<2x32xi1>
    %306 = arith.truncf %275 : vector<2x32xf32> to vector<2x32xbf16>
    %cst_79 = arith.constant dense<0.000000e+00> : vector<2x128xf32>
    %307 = tpu.matmul %306, %5, %cst_79 {dimension_numbers = #tpu.dot_dimension_numbers<[1], [0], [0], [1], [0, 0, 1, 1], [], []>} : vector<2x32xbf16>, vector<32x128xbf16>, vector<2x128xf32> -> vector<2x128xf32>
    %308 = arith.addf %304, %307 : vector<2x128xf32>
    %309 = arith.negf %308 : vector<2x128xf32>
    %310 = math.exp %309 : vector<2x128xf32>
    %cst_80 = arith.constant 1.000000e+00 : f32
    %311 = vector.broadcast %cst_80 : f32 to vector<2x128xf32>
    %312 = arith.addf %311, %310 : vector<2x128xf32>
    %313 = arith.divf %311, %312 : vector<2x128xf32>
    %314 = vector.extract_strided_slice %313 {offsets = [0, 0], sizes = [2, 32], strides = [1, 1]} : vector<2x128xf32> to vector<2x32xf32>
    %315 = vector.extract_strided_slice %313 {offsets = [0, 32], sizes = [2, 32], strides = [1, 1]} : vector<2x128xf32> to vector<2x32xf32>
    %316 = vector.extract_strided_slice %313 {offsets = [0, 64], sizes = [2, 32], strides = [1, 1]} : vector<2x128xf32> to vector<2x32xf32>
    %cst_81 = arith.constant 2.000000e+00 : f32
    %317 = vector.broadcast %cst_81 : f32 to vector<2x32xf32>
    %318 = arith.mulf %317, %316 : vector<2x32xf32>
    %cst_82 = arith.constant 1.000000e+00 : f32
    %319 = vector.broadcast %cst_82 : f32 to vector<2x32xf32>
    %320 = arith.subf %318, %319 : vector<2x32xf32>
    %321 = vector.extract_strided_slice %313 {offsets = [0, 96], sizes = [2, 32], strides = [1, 1]} : vector<2x128xf32> to vector<2x32xf32>
    %322 = arith.mulf %315, %276 : vector<2x32xf32>
    %323 = arith.mulf %314, %320 : vector<2x32xf32>
    %324 = arith.addf %322, %323 : vector<2x32xf32>
    %325 = math.tanh %324 : vector<2x32xf32>
    %326 = arith.mulf %321, %325 : vector<2x32xf32>
    %327 = arith.select %305, %326, %275 : vector<2x32xi1>, vector<2x32xf32>
    %328 = arith.select %305, %324, %276 : vector<2x32xi1>, vector<2x32xf32>
    %c10_83 = arith.constant 10 : index
    %c0_84 = arith.constant 0 : index
    %329 = vector.load %arg17[%c10_83, %c0_84] : memref<16x32xf32, #tpu.memory_space<vmem>>, vector<2x32xf32>
    tpu.vector_store %arg17[%c10_83, %c0_84], %302 {strides = array<i32>} : memref<16x32xf32, #tpu.memory_space<vmem>>, vector<2x32xf32>,
    %c4_85 = arith.constant 4 : index
    %c0_86 = arith.constant 0 : index
    %330 = vector.load %arg18[%c4_85, %c0_86] : memref<16x32xf32, #tpu.memory_space<vmem>>, vector<2x32xf32>
    tpu.vector_store %arg18[%c4_85, %c0_86], %327 {strides = array<i32>} : memref<16x32xf32, #tpu.memory_space<vmem>>, vector<2x32xf32>,
    %331 = vector.extract_strided_slice %12 {offsets = [12, 0], sizes = [2, 128], strides = [1, 1]} : vector<16x128xf32> to vector<2x128xf32>
    %332 = vector.extract_strided_slice %3 {offsets = [12, 0], sizes = [2, 32], strides = [1, 1]} : vector<16x32xi1> to vector<2x32xi1>
    %333 = arith.truncf %302 : vector<2x32xf32> to vector<2x32xbf16>
    %cst_87 = arith.constant dense<0.000000e+00> : vector<2x128xf32>
    %334 = tpu.matmul %333, %4, %cst_87 {dimension_numbers = #tpu.dot_dimension_numbers<[1], [0], [0], [1], [0, 0, 1, 1], [], []>} : vector<2x32xbf16>, vector<32x128xbf16>, vector<2x128xf32> -> vector<2x128xf32>
    %335 = arith.addf %331, %334 : vector<2x128xf32>
    %336 = arith.negf %335 : vector<2x128xf32>
    %337 = math.exp %336 : vector<2x128xf32>
    %cst_88 = arith.constant 1.000000e+00 : f32
    %338 = vector.broadcast %cst_88 : f32 to vector<2x128xf32>
    %339 = arith.addf %338, %337 : vector<2x128xf32>
    %340 = arith.divf %338, %339 : vector<2x128xf32>
    %341 = vector.extract_strided_slice %340 {offsets = [0, 0], sizes = [2, 32], strides = [1, 1]} : vector<2x128xf32> to vector<2x32xf32>
    %342 = vector.extract_strided_slice %340 {offsets = [0, 32], sizes = [2, 32], strides = [1, 1]} : vector<2x128xf32> to vector<2x32xf32>
    %343 = vector.extract_strided_slice %340 {offsets = [0, 64], sizes = [2, 32], strides = [1, 1]} : vector<2x128xf32> to vector<2x32xf32>
    %cst_89 = arith.constant 2.000000e+00 : f32
    %344 = vector.broadcast %cst_89 : f32 to vector<2x32xf32>
    %345 = arith.mulf %344, %343 : vector<2x32xf32>
    %cst_90 = arith.constant 1.000000e+00 : f32
    %346 = vector.broadcast %cst_90 : f32 to vector<2x32xf32>
    %347 = arith.subf %345, %346 : vector<2x32xf32>
    %348 = vector.extract_strided_slice %340 {offsets = [0, 96], sizes = [2, 32], strides = [1, 1]} : vector<2x128xf32> to vector<2x32xf32>
    %349 = arith.mulf %342, %303 : vector<2x32xf32>
    %350 = arith.mulf %341, %347 : vector<2x32xf32>
    %351 = arith.addf %349, %350 : vector<2x32xf32>
    %352 = math.tanh %351 : vector<2x32xf32>
    %353 = arith.mulf %348, %352 : vector<2x32xf32>
    %354 = arith.select %332, %353, %302 : vector<2x32xi1>, vector<2x32xf32>
    %355 = arith.select %332, %351, %303 : vector<2x32xi1>, vector<2x32xf32>
    %356 = vector.extract_strided_slice %17 {offsets = [2, 0], sizes = [2, 128], strides = [1, 1]} : vector<16x128xf32> to vector<2x128xf32>
    %357 = vector.extract_strided_slice %3 {offsets = [2, 0], sizes = [2, 32], strides = [1, 1]} : vector<16x32xi1> to vector<2x32xi1>
    %358 = arith.truncf %327 : vector<2x32xf32> to vector<2x32xbf16>
    %cst_91 = arith.constant dense<0.000000e+00> : vector<2x128xf32>
    %359 = tpu.matmul %358, %5, %cst_91 {dimension_numbers = #tpu.dot_dimension_numbers<[1], [0], [0], [1], [0, 0, 1, 1], [], []>} : vector<2x32xbf16>, vector<32x128xbf16>, vector<2x128xf32> -> vector<2x128xf32>
    %360 = arith.addf %356, %359 : vector<2x128xf32>
    %361 = arith.negf %360 : vector<2x128xf32>
    %362 = math.exp %361 : vector<2x128xf32>
    %cst_92 = arith.constant 1.000000e+00 : f32
    %363 = vector.broadcast %cst_92 : f32 to vector<2x128xf32>
    %364 = arith.addf %363, %362 : vector<2x128xf32>
    %365 = arith.divf %363, %364 : vector<2x128xf32>
    %366 = vector.extract_strided_slice %365 {offsets = [0, 0], sizes = [2, 32], strides = [1, 1]} : vector<2x128xf32> to vector<2x32xf32>
    %367 = vector.extract_strided_slice %365 {offsets = [0, 32], sizes = [2, 32], strides = [1, 1]} : vector<2x128xf32> to vector<2x32xf32>
    %368 = vector.extract_strided_slice %365 {offsets = [0, 64], sizes = [2, 32], strides = [1, 1]} : vector<2x128xf32> to vector<2x32xf32>
    %cst_93 = arith.constant 2.000000e+00 : f32
    %369 = vector.broadcast %cst_93 : f32 to vector<2x32xf32>
    %370 = arith.mulf %369, %368 : vector<2x32xf32>
    %cst_94 = arith.constant 1.000000e+00 : f32
    %371 = vector.broadcast %cst_94 : f32 to vector<2x32xf32>
    %372 = arith.subf %370, %371 : vector<2x32xf32>
    %373 = vector.extract_strided_slice %365 {offsets = [0, 96], sizes = [2, 32], strides = [1, 1]} : vector<2x128xf32> to vector<2x32xf32>
    %374 = arith.mulf %367, %328 : vector<2x32xf32>
    %375 = arith.mulf %366, %372 : vector<2x32xf32>
    %376 = arith.addf %374, %375 : vector<2x32xf32>
    %377 = math.tanh %376 : vector<2x32xf32>
    %378 = arith.mulf %373, %377 : vector<2x32xf32>
    %379 = arith.select %357, %378, %327 : vector<2x32xi1>, vector<2x32xf32>
    %380 = arith.select %357, %376, %328 : vector<2x32xi1>, vector<2x32xf32>
    %c12_95 = arith.constant 12 : index
    %c0_96 = arith.constant 0 : index
    %381 = vector.load %arg17[%c12_95, %c0_96] : memref<16x32xf32, #tpu.memory_space<vmem>>, vector<2x32xf32>
    tpu.vector_store %arg17[%c12_95, %c0_96], %354 {strides = array<i32>} : memref<16x32xf32, #tpu.memory_space<vmem>>, vector<2x32xf32>,
    %c2_97 = arith.constant 2 : index
    %c0_98 = arith.constant 0 : index
    %382 = vector.load %arg18[%c2_97, %c0_98] : memref<16x32xf32, #tpu.memory_space<vmem>>, vector<2x32xf32>
    tpu.vector_store %arg18[%c2_97, %c0_98], %379 {strides = array<i32>} : memref<16x32xf32, #tpu.memory_space<vmem>>, vector<2x32xf32>,
    %383 = vector.extract_strided_slice %12 {offsets = [14, 0], sizes = [2, 128], strides = [1, 1]} : vector<16x128xf32> to vector<2x128xf32>
    %384 = vector.extract_strided_slice %3 {offsets = [14, 0], sizes = [2, 32], strides = [1, 1]} : vector<16x32xi1> to vector<2x32xi1>
    %385 = arith.truncf %354 : vector<2x32xf32> to vector<2x32xbf16>
    %cst_99 = arith.constant dense<0.000000e+00> : vector<2x128xf32>
    %386 = tpu.matmul %385, %4, %cst_99 {dimension_numbers = #tpu.dot_dimension_numbers<[1], [0], [0], [1], [0, 0, 1, 1], [], []>} : vector<2x32xbf16>, vector<32x128xbf16>, vector<2x128xf32> -> vector<2x128xf32>
    %387 = arith.addf %383, %386 : vector<2x128xf32>
    %388 = arith.negf %387 : vector<2x128xf32>
    %389 = math.exp %388 : vector<2x128xf32>
    %cst_100 = arith.constant 1.000000e+00 : f32
    %390 = vector.broadcast %cst_100 : f32 to vector<2x128xf32>
    %391 = arith.addf %390, %389 : vector<2x128xf32>
    %392 = arith.divf %390, %391 : vector<2x128xf32>
    %393 = vector.extract_strided_slice %392 {offsets = [0, 0], sizes = [2, 32], strides = [1, 1]} : vector<2x128xf32> to vector<2x32xf32>
    %394 = vector.extract_strided_slice %392 {offsets = [0, 32], sizes = [2, 32], strides = [1, 1]} : vector<2x128xf32> to vector<2x32xf32>
    %395 = vector.extract_strided_slice %392 {offsets = [0, 64], sizes = [2, 32], strides = [1, 1]} : vector<2x128xf32> to vector<2x32xf32>
    %cst_101 = arith.constant 2.000000e+00 : f32
    %396 = vector.broadcast %cst_101 : f32 to vector<2x32xf32>
    %397 = arith.mulf %396, %395 : vector<2x32xf32>
    %cst_102 = arith.constant 1.000000e+00 : f32
    %398 = vector.broadcast %cst_102 : f32 to vector<2x32xf32>
    %399 = arith.subf %397, %398 : vector<2x32xf32>
    %400 = vector.extract_strided_slice %392 {offsets = [0, 96], sizes = [2, 32], strides = [1, 1]} : vector<2x128xf32> to vector<2x32xf32>
    %401 = arith.mulf %394, %355 : vector<2x32xf32>
    %402 = arith.mulf %393, %399 : vector<2x32xf32>
    %403 = arith.addf %401, %402 : vector<2x32xf32>
    %404 = math.tanh %403 : vector<2x32xf32>
    %405 = arith.mulf %400, %404 : vector<2x32xf32>
    %406 = arith.select %384, %405, %354 : vector<2x32xi1>, vector<2x32xf32>
    %407 = vector.extract_strided_slice %17 {offsets = [0, 0], sizes = [2, 128], strides = [1, 1]} : vector<16x128xf32> to vector<2x128xf32>
    %408 = vector.extract_strided_slice %3 {offsets = [0, 0], sizes = [2, 32], strides = [1, 1]} : vector<16x32xi1> to vector<2x32xi1>
    %409 = arith.truncf %379 : vector<2x32xf32> to vector<2x32xbf16>
    %cst_103 = arith.constant dense<0.000000e+00> : vector<2x128xf32>
    %410 = tpu.matmul %409, %5, %cst_103 {dimension_numbers = #tpu.dot_dimension_numbers<[1], [0], [0], [1], [0, 0, 1, 1], [], []>} : vector<2x32xbf16>, vector<32x128xbf16>, vector<2x128xf32> -> vector<2x128xf32>
    %411 = arith.addf %407, %410 : vector<2x128xf32>
    %412 = arith.negf %411 : vector<2x128xf32>
    %413 = math.exp %412 : vector<2x128xf32>
    %cst_104 = arith.constant 1.000000e+00 : f32
    %414 = vector.broadcast %cst_104 : f32 to vector<2x128xf32>
    %415 = arith.addf %414, %413 : vector<2x128xf32>
    %416 = arith.divf %414, %415 : vector<2x128xf32>
    %417 = vector.extract_strided_slice %416 {offsets = [0, 0], sizes = [2, 32], strides = [1, 1]} : vector<2x128xf32> to vector<2x32xf32>
    %418 = vector.extract_strided_slice %416 {offsets = [0, 32], sizes = [2, 32], strides = [1, 1]} : vector<2x128xf32> to vector<2x32xf32>
    %419 = vector.extract_strided_slice %416 {offsets = [0, 64], sizes = [2, 32], strides = [1, 1]} : vector<2x128xf32> to vector<2x32xf32>
    %cst_105 = arith.constant 2.000000e+00 : f32
    %420 = vector.broadcast %cst_105 : f32 to vector<2x32xf32>
    %421 = arith.mulf %420, %419 : vector<2x32xf32>
    %cst_106 = arith.constant 1.000000e+00 : f32
    %422 = vector.broadcast %cst_106 : f32 to vector<2x32xf32>
    %423 = arith.subf %421, %422 : vector<2x32xf32>
    %424 = vector.extract_strided_slice %416 {offsets = [0, 96], sizes = [2, 32], strides = [1, 1]} : vector<2x128xf32> to vector<2x32xf32>
    %425 = arith.mulf %418, %380 : vector<2x32xf32>
    %426 = arith.mulf %417, %423 : vector<2x32xf32>
    %427 = arith.addf %425, %426 : vector<2x32xf32>
    %428 = math.tanh %427 : vector<2x32xf32>
    %429 = arith.mulf %424, %428 : vector<2x32xf32>
    %430 = arith.select %408, %429, %379 : vector<2x32xi1>, vector<2x32xf32>
    %c14_107 = arith.constant 14 : index
    %c0_108 = arith.constant 0 : index
    %431 = vector.load %arg17[%c14_107, %c0_108] : memref<16x32xf32, #tpu.memory_space<vmem>>, vector<2x32xf32>
    tpu.vector_store %arg17[%c14_107, %c0_108], %406 {strides = array<i32>} : memref<16x32xf32, #tpu.memory_space<vmem>>, vector<2x32xf32>,
    %c0_109 = arith.constant 0 : index
    %c0_110 = arith.constant 0 : index
    %432 = vector.load %arg18[%c0_109, %c0_110] : memref<16x32xf32, #tpu.memory_space<vmem>>, vector<2x32xf32>
    tpu.vector_store %arg18[%c0_109, %c0_110], %430 {strides = array<i32>} : memref<16x32xf32, #tpu.memory_space<vmem>>, vector<2x32xf32>,
    %c0_111 = arith.constant 0 : index
    %c0_112 = arith.constant 0 : index
    %433 = vector.load %arg17[%c0_111, %c0_112] : memref<16x32xf32, #tpu.memory_space<vmem>>, vector<16x32xf32>
    %c0_113 = arith.constant 0 : index
    %c0_114 = arith.constant 0 : index
    %434 = vector.load %arg18[%c0_113, %c0_114] : memref<16x32xf32, #tpu.memory_space<vmem>>, vector<16x32xf32>
    %c0_115 = arith.constant 0 : index
    %c0_116 = arith.constant 0 : index
    %435 = vector.load %arg8[%c0_115, %c0_116] : memref<64x128xf32, #tpu.memory_space<vmem>>, vector<64x128xf32>
    %c0_117 = arith.constant 0 : index
    %c0_118 = arith.constant 0 : index
    %436 = vector.load %arg11[%c0_117, %c0_118] : memref<64x128xf32, #tpu.memory_space<vmem>>, vector<64x128xf32>
    %437 = vector.extract_strided_slice %435 {offsets = [0, 0], sizes = [32, 128], strides = [1, 1]} : vector<64x128xf32> to vector<32x128xf32>
    %cst_119 = arith.constant dense<0.000000e+00> : vector<16x128xf32>
    %438 = tpu.matmul %433, %437, %cst_119 {dimension_numbers = #tpu.dot_dimension_numbers<[1], [0], [0], [1], [0, 0, 1, 1], [], []>} : vector<16x32xf32>, vector<32x128xf32>, vector<16x128xf32> -> vector<16x128xf32>
    %439 = vector.extract_strided_slice %435 {offsets = [32, 0], sizes = [32, 128], strides = [1, 1]} : vector<64x128xf32> to vector<32x128xf32>
    %cst_120 = arith.constant dense<0.000000e+00> : vector<16x128xf32>
    %440 = tpu.matmul %434, %439, %cst_120 {dimension_numbers = #tpu.dot_dimension_numbers<[1], [0], [0], [1], [0, 0, 1, 1], [], []>} : vector<16x32xf32>, vector<32x128xf32>, vector<16x128xf32> -> vector<16x128xf32>
    %441 = arith.addf %438, %440 : vector<16x128xf32>
    %c0_121 = arith.constant 0 : index
    %c0_122 = arith.constant 0 : index
    %442 = vector.load %arg10[%c0_121, %c0_122] : memref<1x128xf32, #tpu.memory_space<vmem>>, vector<1x128xf32>
    %443 = vector.broadcast %442 : vector<1x128xf32> to vector<16x128xf32>
    %444 = arith.addf %441, %443 : vector<16x128xf32>
    %445 = vector.extract_strided_slice %436 {offsets = [0, 0], sizes = [32, 128], strides = [1, 1]} : vector<64x128xf32> to vector<32x128xf32>
    %cst_123 = arith.constant dense<0.000000e+00> : vector<16x128xf32>
    %446 = tpu.matmul %433, %445, %cst_123 {dimension_numbers = #tpu.dot_dimension_numbers<[1], [0], [0], [1], [0, 0, 1, 1], [], []>} : vector<16x32xf32>, vector<32x128xf32>, vector<16x128xf32> -> vector<16x128xf32>
    %447 = vector.extract_strided_slice %436 {offsets = [32, 0], sizes = [32, 128], strides = [1, 1]} : vector<64x128xf32> to vector<32x128xf32>
    %cst_124 = arith.constant dense<0.000000e+00> : vector<16x128xf32>
    %448 = tpu.matmul %434, %447, %cst_124 {dimension_numbers = #tpu.dot_dimension_numbers<[1], [0], [0], [1], [0, 0, 1, 1], [], []>} : vector<16x32xf32>, vector<32x128xf32>, vector<16x128xf32> -> vector<16x128xf32>
    %449 = arith.addf %446, %448 : vector<16x128xf32>
    %c0_125 = arith.constant 0 : index
    %c0_126 = arith.constant 0 : index
    %450 = vector.load %arg13[%c0_125, %c0_126] : memref<1x128xf32, #tpu.memory_space<vmem>>, vector<1x128xf32>
    %451 = vector.broadcast %450 : vector<1x128xf32> to vector<16x128xf32>
    %452 = arith.addf %449, %451 : vector<16x128xf32>
    %453 = vector.extract_strided_slice %444 {offsets = [0, 0], sizes = [2, 128], strides = [1, 1]} : vector<16x128xf32> to vector<2x128xf32>
    %454 = vector.extract_strided_slice %3 {offsets = [0, 0], sizes = [2, 32], strides = [1, 1]} : vector<16x32xi1> to vector<2x32xi1>
    %455 = arith.truncf %18 : vector<2x32xf32> to vector<2x32xbf16>
    %cst_127 = arith.constant dense<0.000000e+00> : vector<2x128xf32>
    %456 = tpu.matmul %455, %6, %cst_127 {dimension_numbers = #tpu.dot_dimension_numbers<[1], [0], [0], [1], [0, 0, 1, 1], [], []>} : vector<2x32xbf16>, vector<32x128xbf16>, vector<2x128xf32> -> vector<2x128xf32>
    %457 = arith.addf %453, %456 : vector<2x128xf32>
    %458 = arith.negf %457 : vector<2x128xf32>
    %459 = math.exp %458 : vector<2x128xf32>
    %cst_128 = arith.constant 1.000000e+00 : f32
    %460 = vector.broadcast %cst_128 : f32 to vector<2x128xf32>
    %461 = arith.addf %460, %459 : vector<2x128xf32>
    %462 = arith.divf %460, %461 : vector<2x128xf32>
    %463 = vector.extract_strided_slice %462 {offsets = [0, 0], sizes = [2, 32], strides = [1, 1]} : vector<2x128xf32> to vector<2x32xf32>
    %464 = vector.extract_strided_slice %462 {offsets = [0, 32], sizes = [2, 32], strides = [1, 1]} : vector<2x128xf32> to vector<2x32xf32>
    %465 = vector.extract_strided_slice %462 {offsets = [0, 64], sizes = [2, 32], strides = [1, 1]} : vector<2x128xf32> to vector<2x32xf32>
    %cst_129 = arith.constant 2.000000e+00 : f32
    %466 = vector.broadcast %cst_129 : f32 to vector<2x32xf32>
    %467 = arith.mulf %466, %465 : vector<2x32xf32>
    %cst_130 = arith.constant 1.000000e+00 : f32
    %468 = vector.broadcast %cst_130 : f32 to vector<2x32xf32>
    %469 = arith.subf %467, %468 : vector<2x32xf32>
    %470 = vector.extract_strided_slice %462 {offsets = [0, 96], sizes = [2, 32], strides = [1, 1]} : vector<2x128xf32> to vector<2x32xf32>
    %471 = arith.mulf %464, %18 : vector<2x32xf32>
    %472 = arith.mulf %463, %469 : vector<2x32xf32>
    %473 = arith.addf %471, %472 : vector<2x32xf32>
    %474 = math.tanh %473 : vector<2x32xf32>
    %475 = arith.mulf %470, %474 : vector<2x32xf32>
    %476 = arith.select %454, %475, %18 : vector<2x32xi1>, vector<2x32xf32>
    %477 = arith.select %454, %473, %18 : vector<2x32xi1>, vector<2x32xf32>
    %478 = vector.extract_strided_slice %452 {offsets = [14, 0], sizes = [2, 128], strides = [1, 1]} : vector<16x128xf32> to vector<2x128xf32>
    %479 = vector.extract_strided_slice %3 {offsets = [14, 0], sizes = [2, 32], strides = [1, 1]} : vector<16x32xi1> to vector<2x32xi1>
    %480 = arith.truncf %18 : vector<2x32xf32> to vector<2x32xbf16>
    %cst_131 = arith.constant dense<0.000000e+00> : vector<2x128xf32>
    %481 = tpu.matmul %480, %7, %cst_131 {dimension_numbers = #tpu.dot_dimension_numbers<[1], [0], [0], [1], [0, 0, 1, 1], [], []>} : vector<2x32xbf16>, vector<32x128xbf16>, vector<2x128xf32> -> vector<2x128xf32>
    %482 = arith.addf %478, %481 : vector<2x128xf32>
    %483 = arith.negf %482 : vector<2x128xf32>
    %484 = math.exp %483 : vector<2x128xf32>
    %cst_132 = arith.constant 1.000000e+00 : f32
    %485 = vector.broadcast %cst_132 : f32 to vector<2x128xf32>
    %486 = arith.addf %485, %484 : vector<2x128xf32>
    %487 = arith.divf %485, %486 : vector<2x128xf32>
    %488 = vector.extract_strided_slice %487 {offsets = [0, 0], sizes = [2, 32], strides = [1, 1]} : vector<2x128xf32> to vector<2x32xf32>
    %489 = vector.extract_strided_slice %487 {offsets = [0, 32], sizes = [2, 32], strides = [1, 1]} : vector<2x128xf32> to vector<2x32xf32>
    %490 = vector.extract_strided_slice %487 {offsets = [0, 64], sizes = [2, 32], strides = [1, 1]} : vector<2x128xf32> to vector<2x32xf32>
    %cst_133 = arith.constant 2.000000e+00 : f32
    %491 = vector.broadcast %cst_133 : f32 to vector<2x32xf32>
    %492 = arith.mulf %491, %490 : vector<2x32xf32>
    %cst_134 = arith.constant 1.000000e+00 : f32
    %493 = vector.broadcast %cst_134 : f32 to vector<2x32xf32>
    %494 = arith.subf %492, %493 : vector<2x32xf32>
    %495 = vector.extract_strided_slice %487 {offsets = [0, 96], sizes = [2, 32], strides = [1, 1]} : vector<2x128xf32> to vector<2x32xf32>
    %496 = arith.mulf %489, %18 : vector<2x32xf32>
    %497 = arith.mulf %488, %494 : vector<2x32xf32>
    %498 = arith.addf %496, %497 : vector<2x32xf32>
    %499 = math.tanh %498 : vector<2x32xf32>
    %500 = arith.mulf %495, %499 : vector<2x32xf32>
    %501 = arith.select %479, %500, %18 : vector<2x32xi1>, vector<2x32xf32>
    %502 = arith.select %479, %498, %18 : vector<2x32xi1>, vector<2x32xf32>
    %503 = vector.extract_strided_slice %444 {offsets = [2, 0], sizes = [2, 128], strides = [1, 1]} : vector<16x128xf32> to vector<2x128xf32>
    %504 = vector.extract_strided_slice %3 {offsets = [2, 0], sizes = [2, 32], strides = [1, 1]} : vector<16x32xi1> to vector<2x32xi1>
    %505 = arith.truncf %476 : vector<2x32xf32> to vector<2x32xbf16>
    %cst_135 = arith.constant dense<0.000000e+00> : vector<2x128xf32>
    %506 = tpu.matmul %505, %6, %cst_135 {dimension_numbers = #tpu.dot_dimension_numbers<[1], [0], [0], [1], [0, 0, 1, 1], [], []>} : vector<2x32xbf16>, vector<32x128xbf16>, vector<2x128xf32> -> vector<2x128xf32>
    %507 = arith.addf %503, %506 : vector<2x128xf32>
    %508 = arith.negf %507 : vector<2x128xf32>
    %509 = math.exp %508 : vector<2x128xf32>
    %cst_136 = arith.constant 1.000000e+00 : f32
    %510 = vector.broadcast %cst_136 : f32 to vector<2x128xf32>
    %511 = arith.addf %510, %509 : vector<2x128xf32>
    %512 = arith.divf %510, %511 : vector<2x128xf32>
    %513 = vector.extract_strided_slice %512 {offsets = [0, 0], sizes = [2, 32], strides = [1, 1]} : vector<2x128xf32> to vector<2x32xf32>
    %514 = vector.extract_strided_slice %512 {offsets = [0, 32], sizes = [2, 32], strides = [1, 1]} : vector<2x128xf32> to vector<2x32xf32>
    %515 = vector.extract_strided_slice %512 {offsets = [0, 64], sizes = [2, 32], strides = [1, 1]} : vector<2x128xf32> to vector<2x32xf32>
    %cst_137 = arith.constant 2.000000e+00 : f32
    %516 = vector.broadcast %cst_137 : f32 to vector<2x32xf32>
    %517 = arith.mulf %516, %515 : vector<2x32xf32>
    %cst_138 = arith.constant 1.000000e+00 : f32
    %518 = vector.broadcast %cst_138 : f32 to vector<2x32xf32>
    %519 = arith.subf %517, %518 : vector<2x32xf32>
    %520 = vector.extract_strided_slice %512 {offsets = [0, 96], sizes = [2, 32], strides = [1, 1]} : vector<2x128xf32> to vector<2x32xf32>
    %521 = arith.mulf %514, %477 : vector<2x32xf32>
    %522 = arith.mulf %513, %519 : vector<2x32xf32>
    %523 = arith.addf %521, %522 : vector<2x32xf32>
    %524 = math.tanh %523 : vector<2x32xf32>
    %525 = arith.mulf %520, %524 : vector<2x32xf32>
    %526 = arith.select %504, %525, %476 : vector<2x32xi1>, vector<2x32xf32>
    %527 = arith.select %504, %523, %477 : vector<2x32xi1>, vector<2x32xf32>
    %528 = vector.extract_strided_slice %452 {offsets = [12, 0], sizes = [2, 128], strides = [1, 1]} : vector<16x128xf32> to vector<2x128xf32>
    %529 = vector.extract_strided_slice %3 {offsets = [12, 0], sizes = [2, 32], strides = [1, 1]} : vector<16x32xi1> to vector<2x32xi1>
    %530 = arith.truncf %501 : vector<2x32xf32> to vector<2x32xbf16>
    %cst_139 = arith.constant dense<0.000000e+00> : vector<2x128xf32>
    %531 = tpu.matmul %530, %7, %cst_139 {dimension_numbers = #tpu.dot_dimension_numbers<[1], [0], [0], [1], [0, 0, 1, 1], [], []>} : vector<2x32xbf16>, vector<32x128xbf16>, vector<2x128xf32> -> vector<2x128xf32>
    %532 = arith.addf %528, %531 : vector<2x128xf32>
    %533 = arith.negf %532 : vector<2x128xf32>
    %534 = math.exp %533 : vector<2x128xf32>
    %cst_140 = arith.constant 1.000000e+00 : f32
    %535 = vector.broadcast %cst_140 : f32 to vector<2x128xf32>
    %536 = arith.addf %535, %534 : vector<2x128xf32>
    %537 = arith.divf %535, %536 : vector<2x128xf32>
    %538 = vector.extract_strided_slice %537 {offsets = [0, 0], sizes = [2, 32], strides = [1, 1]} : vector<2x128xf32> to vector<2x32xf32>
    %539 = vector.extract_strided_slice %537 {offsets = [0, 32], sizes = [2, 32], strides = [1, 1]} : vector<2x128xf32> to vector<2x32xf32>
    %540 = vector.extract_strided_slice %537 {offsets = [0, 64], sizes = [2, 32], strides = [1, 1]} : vector<2x128xf32> to vector<2x32xf32>
    %cst_141 = arith.constant 2.000000e+00 : f32
    %541 = vector.broadcast %cst_141 : f32 to vector<2x32xf32>
    %542 = arith.mulf %541, %540 : vector<2x32xf32>
    %cst_142 = arith.constant 1.000000e+00 : f32
    %543 = vector.broadcast %cst_142 : f32 to vector<2x32xf32>
    %544 = arith.subf %542, %543 : vector<2x32xf32>
    %545 = vector.extract_strided_slice %537 {offsets = [0, 96], sizes = [2, 32], strides = [1, 1]} : vector<2x128xf32> to vector<2x32xf32>
    %546 = arith.mulf %539, %502 : vector<2x32xf32>
    %547 = arith.mulf %538, %544 : vector<2x32xf32>
    %548 = arith.addf %546, %547 : vector<2x32xf32>
    %549 = math.tanh %548 : vector<2x32xf32>
    %550 = arith.mulf %545, %549 : vector<2x32xf32>
    %551 = arith.select %529, %550, %501 : vector<2x32xi1>, vector<2x32xf32>
    %552 = arith.select %529, %548, %502 : vector<2x32xi1>, vector<2x32xf32>
    %553 = vector.extract_strided_slice %444 {offsets = [4, 0], sizes = [2, 128], strides = [1, 1]} : vector<16x128xf32> to vector<2x128xf32>
    %554 = vector.extract_strided_slice %3 {offsets = [4, 0], sizes = [2, 32], strides = [1, 1]} : vector<16x32xi1> to vector<2x32xi1>
    %555 = arith.truncf %526 : vector<2x32xf32> to vector<2x32xbf16>
    %cst_143 = arith.constant dense<0.000000e+00> : vector<2x128xf32>
    %556 = tpu.matmul %555, %6, %cst_143 {dimension_numbers = #tpu.dot_dimension_numbers<[1], [0], [0], [1], [0, 0, 1, 1], [], []>} : vector<2x32xbf16>, vector<32x128xbf16>, vector<2x128xf32> -> vector<2x128xf32>
    %557 = arith.addf %553, %556 : vector<2x128xf32>
    %558 = arith.negf %557 : vector<2x128xf32>
    %559 = math.exp %558 : vector<2x128xf32>
    %cst_144 = arith.constant 1.000000e+00 : f32
    %560 = vector.broadcast %cst_144 : f32 to vector<2x128xf32>
    %561 = arith.addf %560, %559 : vector<2x128xf32>
    %562 = arith.divf %560, %561 : vector<2x128xf32>
    %563 = vector.extract_strided_slice %562 {offsets = [0, 0], sizes = [2, 32], strides = [1, 1]} : vector<2x128xf32> to vector<2x32xf32>
    %564 = vector.extract_strided_slice %562 {offsets = [0, 32], sizes = [2, 32], strides = [1, 1]} : vector<2x128xf32> to vector<2x32xf32>
    %565 = vector.extract_strided_slice %562 {offsets = [0, 64], sizes = [2, 32], strides = [1, 1]} : vector<2x128xf32> to vector<2x32xf32>
    %cst_145 = arith.constant 2.000000e+00 : f32
    %566 = vector.broadcast %cst_145 : f32 to vector<2x32xf32>
    %567 = arith.mulf %566, %565 : vector<2x32xf32>
    %cst_146 = arith.constant 1.000000e+00 : f32
    %568 = vector.broadcast %cst_146 : f32 to vector<2x32xf32>
    %569 = arith.subf %567, %568 : vector<2x32xf32>
    %570 = vector.extract_strided_slice %562 {offsets = [0, 96], sizes = [2, 32], strides = [1, 1]} : vector<2x128xf32> to vector<2x32xf32>
    %571 = arith.mulf %564, %527 : vector<2x32xf32>
    %572 = arith.mulf %563, %569 : vector<2x32xf32>
    %573 = arith.addf %571, %572 : vector<2x32xf32>
    %574 = math.tanh %573 : vector<2x32xf32>
    %575 = arith.mulf %570, %574 : vector<2x32xf32>
    %576 = arith.select %554, %575, %526 : vector<2x32xi1>, vector<2x32xf32>
    %577 = arith.select %554, %573, %527 : vector<2x32xi1>, vector<2x32xf32>
    %578 = vector.extract_strided_slice %452 {offsets = [10, 0], sizes = [2, 128], strides = [1, 1]} : vector<16x128xf32> to vector<2x128xf32>
    %579 = vector.extract_strided_slice %3 {offsets = [10, 0], sizes = [2, 32], strides = [1, 1]} : vector<16x32xi1> to vector<2x32xi1>
    %580 = arith.truncf %551 : vector<2x32xf32> to vector<2x32xbf16>
    %cst_147 = arith.constant dense<0.000000e+00> : vector<2x128xf32>
    %581 = tpu.matmul %580, %7, %cst_147 {dimension_numbers = #tpu.dot_dimension_numbers<[1], [0], [0], [1], [0, 0, 1, 1], [], []>} : vector<2x32xbf16>, vector<32x128xbf16>, vector<2x128xf32> -> vector<2x128xf32>
    %582 = arith.addf %578, %581 : vector<2x128xf32>
    %583 = arith.negf %582 : vector<2x128xf32>
    %584 = math.exp %583 : vector<2x128xf32>
    %cst_148 = arith.constant 1.000000e+00 : f32
    %585 = vector.broadcast %cst_148 : f32 to vector<2x128xf32>
    %586 = arith.addf %585, %584 : vector<2x128xf32>
    %587 = arith.divf %585, %586 : vector<2x128xf32>
    %588 = vector.extract_strided_slice %587 {offsets = [0, 0], sizes = [2, 32], strides = [1, 1]} : vector<2x128xf32> to vector<2x32xf32>
    %589 = vector.extract_strided_slice %587 {offsets = [0, 32], sizes = [2, 32], strides = [1, 1]} : vector<2x128xf32> to vector<2x32xf32>
    %590 = vector.extract_strided_slice %587 {offsets = [0, 64], sizes = [2, 32], strides = [1, 1]} : vector<2x128xf32> to vector<2x32xf32>
    %cst_149 = arith.constant 2.000000e+00 : f32
    %591 = vector.broadcast %cst_149 : f32 to vector<2x32xf32>
    %592 = arith.mulf %591, %590 : vector<2x32xf32>
    %cst_150 = arith.constant 1.000000e+00 : f32
    %593 = vector.broadcast %cst_150 : f32 to vector<2x32xf32>
    %594 = arith.subf %592, %593 : vector<2x32xf32>
    %595 = vector.extract_strided_slice %587 {offsets = [0, 96], sizes = [2, 32], strides = [1, 1]} : vector<2x128xf32> to vector<2x32xf32>
    %596 = arith.mulf %589, %552 : vector<2x32xf32>
    %597 = arith.mulf %588, %594 : vector<2x32xf32>
    %598 = arith.addf %596, %597 : vector<2x32xf32>
    %599 = math.tanh %598 : vector<2x32xf32>
    %600 = arith.mulf %595, %599 : vector<2x32xf32>
    %601 = arith.select %579, %600, %551 : vector<2x32xi1>, vector<2x32xf32>
    %602 = arith.select %579, %598, %552 : vector<2x32xi1>, vector<2x32xf32>
    %603 = vector.extract_strided_slice %444 {offsets = [6, 0], sizes = [2, 128], strides = [1, 1]} : vector<16x128xf32> to vector<2x128xf32>
    %604 = vector.extract_strided_slice %3 {offsets = [6, 0], sizes = [2, 32], strides = [1, 1]} : vector<16x32xi1> to vector<2x32xi1>
    %605 = arith.truncf %576 : vector<2x32xf32> to vector<2x32xbf16>
    %cst_151 = arith.constant dense<0.000000e+00> : vector<2x128xf32>
    %606 = tpu.matmul %605, %6, %cst_151 {dimension_numbers = #tpu.dot_dimension_numbers<[1], [0], [0], [1], [0, 0, 1, 1], [], []>} : vector<2x32xbf16>, vector<32x128xbf16>, vector<2x128xf32> -> vector<2x128xf32>
    %607 = arith.addf %603, %606 : vector<2x128xf32>
    %608 = arith.negf %607 : vector<2x128xf32>
    %609 = math.exp %608 : vector<2x128xf32>
    %cst_152 = arith.constant 1.000000e+00 : f32
    %610 = vector.broadcast %cst_152 : f32 to vector<2x128xf32>
    %611 = arith.addf %610, %609 : vector<2x128xf32>
    %612 = arith.divf %610, %611 : vector<2x128xf32>
    %613 = vector.extract_strided_slice %612 {offsets = [0, 0], sizes = [2, 32], strides = [1, 1]} : vector<2x128xf32> to vector<2x32xf32>
    %614 = vector.extract_strided_slice %612 {offsets = [0, 32], sizes = [2, 32], strides = [1, 1]} : vector<2x128xf32> to vector<2x32xf32>
    %615 = vector.extract_strided_slice %612 {offsets = [0, 64], sizes = [2, 32], strides = [1, 1]} : vector<2x128xf32> to vector<2x32xf32>
    %cst_153 = arith.constant 2.000000e+00 : f32
    %616 = vector.broadcast %cst_153 : f32 to vector<2x32xf32>
    %617 = arith.mulf %616, %615 : vector<2x32xf32>
    %cst_154 = arith.constant 1.000000e+00 : f32
    %618 = vector.broadcast %cst_154 : f32 to vector<2x32xf32>
    %619 = arith.subf %617, %618 : vector<2x32xf32>
    %620 = vector.extract_strided_slice %612 {offsets = [0, 96], sizes = [2, 32], strides = [1, 1]} : vector<2x128xf32> to vector<2x32xf32>
    %621 = arith.mulf %614, %577 : vector<2x32xf32>
    %622 = arith.mulf %613, %619 : vector<2x32xf32>
    %623 = arith.addf %621, %622 : vector<2x32xf32>
    %624 = math.tanh %623 : vector<2x32xf32>
    %625 = arith.mulf %620, %624 : vector<2x32xf32>
    %626 = arith.select %604, %625, %576 : vector<2x32xi1>, vector<2x32xf32>
    %627 = arith.select %604, %623, %577 : vector<2x32xi1>, vector<2x32xf32>
    %628 = vector.extract_strided_slice %452 {offsets = [8, 0], sizes = [2, 128], strides = [1, 1]} : vector<16x128xf32> to vector<2x128xf32>
    %629 = vector.extract_strided_slice %3 {offsets = [8, 0], sizes = [2, 32], strides = [1, 1]} : vector<16x32xi1> to vector<2x32xi1>
    %630 = arith.truncf %601 : vector<2x32xf32> to vector<2x32xbf16>
    %cst_155 = arith.constant dense<0.000000e+00> : vector<2x128xf32>
    %631 = tpu.matmul %630, %7, %cst_155 {dimension_numbers = #tpu.dot_dimension_numbers<[1], [0], [0], [1], [0, 0, 1, 1], [], []>} : vector<2x32xbf16>, vector<32x128xbf16>, vector<2x128xf32> -> vector<2x128xf32>
    %632 = arith.addf %628, %631 : vector<2x128xf32>
    %633 = arith.negf %632 : vector<2x128xf32>
    %634 = math.exp %633 : vector<2x128xf32>
    %cst_156 = arith.constant 1.000000e+00 : f32
    %635 = vector.broadcast %cst_156 : f32 to vector<2x128xf32>
    %636 = arith.addf %635, %634 : vector<2x128xf32>
    %637 = arith.divf %635, %636 : vector<2x128xf32>
    %638 = vector.extract_strided_slice %637 {offsets = [0, 0], sizes = [2, 32], strides = [1, 1]} : vector<2x128xf32> to vector<2x32xf32>
    %639 = vector.extract_strided_slice %637 {offsets = [0, 32], sizes = [2, 32], strides = [1, 1]} : vector<2x128xf32> to vector<2x32xf32>
    %640 = vector.extract_strided_slice %637 {offsets = [0, 64], sizes = [2, 32], strides = [1, 1]} : vector<2x128xf32> to vector<2x32xf32>
    %cst_157 = arith.constant 2.000000e+00 : f32
    %641 = vector.broadcast %cst_157 : f32 to vector<2x32xf32>
    %642 = arith.mulf %641, %640 : vector<2x32xf32>
    %cst_158 = arith.constant 1.000000e+00 : f32
    %643 = vector.broadcast %cst_158 : f32 to vector<2x32xf32>
    %644 = arith.subf %642, %643 : vector<2x32xf32>
    %645 = vector.extract_strided_slice %637 {offsets = [0, 96], sizes = [2, 32], strides = [1, 1]} : vector<2x128xf32> to vector<2x32xf32>
    %646 = arith.mulf %639, %602 : vector<2x32xf32>
    %647 = arith.mulf %638, %644 : vector<2x32xf32>
    %648 = arith.addf %646, %647 : vector<2x32xf32>
    %649 = math.tanh %648 : vector<2x32xf32>
    %650 = arith.mulf %645, %649 : vector<2x32xf32>
    %651 = arith.select %629, %650, %601 : vector<2x32xi1>, vector<2x32xf32>
    %652 = arith.select %629, %648, %602 : vector<2x32xi1>, vector<2x32xf32>
    %653 = vector.extract_strided_slice %444 {offsets = [8, 0], sizes = [2, 128], strides = [1, 1]} : vector<16x128xf32> to vector<2x128xf32>
    %654 = vector.extract_strided_slice %3 {offsets = [8, 0], sizes = [2, 32], strides = [1, 1]} : vector<16x32xi1> to vector<2x32xi1>
    %655 = arith.truncf %626 : vector<2x32xf32> to vector<2x32xbf16>
    %cst_159 = arith.constant dense<0.000000e+00> : vector<2x128xf32>
    %656 = tpu.matmul %655, %6, %cst_159 {dimension_numbers = #tpu.dot_dimension_numbers<[1], [0], [0], [1], [0, 0, 1, 1], [], []>} : vector<2x32xbf16>, vector<32x128xbf16>, vector<2x128xf32> -> vector<2x128xf32>
    %657 = arith.addf %653, %656 : vector<2x128xf32>
    %658 = arith.negf %657 : vector<2x128xf32>
    %659 = math.exp %658 : vector<2x128xf32>
    %cst_160 = arith.constant 1.000000e+00 : f32
    %660 = vector.broadcast %cst_160 : f32 to vector<2x128xf32>
    %661 = arith.addf %660, %659 : vector<2x128xf32>
    %662 = arith.divf %660, %661 : vector<2x128xf32>
    %663 = vector.extract_strided_slice %662 {offsets = [0, 0], sizes = [2, 32], strides = [1, 1]} : vector<2x128xf32> to vector<2x32xf32>
    %664 = vector.extract_strided_slice %662 {offsets = [0, 32], sizes = [2, 32], strides = [1, 1]} : vector<2x128xf32> to vector<2x32xf32>
    %665 = vector.extract_strided_slice %662 {offsets = [0, 64], sizes = [2, 32], strides = [1, 1]} : vector<2x128xf32> to vector<2x32xf32>
    %cst_161 = arith.constant 2.000000e+00 : f32
    %666 = vector.broadcast %cst_161 : f32 to vector<2x32xf32>
    %667 = arith.mulf %666, %665 : vector<2x32xf32>
    %cst_162 = arith.constant 1.000000e+00 : f32
    %668 = vector.broadcast %cst_162 : f32 to vector<2x32xf32>
    %669 = arith.subf %667, %668 : vector<2x32xf32>
    %670 = vector.extract_strided_slice %662 {offsets = [0, 96], sizes = [2, 32], strides = [1, 1]} : vector<2x128xf32> to vector<2x32xf32>
    %671 = arith.mulf %664, %627 : vector<2x32xf32>
    %672 = arith.mulf %663, %669 : vector<2x32xf32>
    %673 = arith.addf %671, %672 : vector<2x32xf32>
    %674 = math.tanh %673 : vector<2x32xf32>
    %675 = arith.mulf %670, %674 : vector<2x32xf32>
    %676 = arith.select %654, %675, %626 : vector<2x32xi1>, vector<2x32xf32>
    %677 = arith.select %654, %673, %627 : vector<2x32xi1>, vector<2x32xf32>
    %678 = vector.extract_strided_slice %452 {offsets = [6, 0], sizes = [2, 128], strides = [1, 1]} : vector<16x128xf32> to vector<2x128xf32>
    %679 = vector.extract_strided_slice %3 {offsets = [6, 0], sizes = [2, 32], strides = [1, 1]} : vector<16x32xi1> to vector<2x32xi1>
    %680 = arith.truncf %651 : vector<2x32xf32> to vector<2x32xbf16>
    %cst_163 = arith.constant dense<0.000000e+00> : vector<2x128xf32>
    %681 = tpu.matmul %680, %7, %cst_163 {dimension_numbers = #tpu.dot_dimension_numbers<[1], [0], [0], [1], [0, 0, 1, 1], [], []>} : vector<2x32xbf16>, vector<32x128xbf16>, vector<2x128xf32> -> vector<2x128xf32>
    %682 = arith.addf %678, %681 : vector<2x128xf32>
    %683 = arith.negf %682 : vector<2x128xf32>
    %684 = math.exp %683 : vector<2x128xf32>
    %cst_164 = arith.constant 1.000000e+00 : f32
    %685 = vector.broadcast %cst_164 : f32 to vector<2x128xf32>
    %686 = arith.addf %685, %684 : vector<2x128xf32>
    %687 = arith.divf %685, %686 : vector<2x128xf32>
    %688 = vector.extract_strided_slice %687 {offsets = [0, 0], sizes = [2, 32], strides = [1, 1]} : vector<2x128xf32> to vector<2x32xf32>
    %689 = vector.extract_strided_slice %687 {offsets = [0, 32], sizes = [2, 32], strides = [1, 1]} : vector<2x128xf32> to vector<2x32xf32>
    %690 = vector.extract_strided_slice %687 {offsets = [0, 64], sizes = [2, 32], strides = [1, 1]} : vector<2x128xf32> to vector<2x32xf32>
    %cst_165 = arith.constant 2.000000e+00 : f32
    %691 = vector.broadcast %cst_165 : f32 to vector<2x32xf32>
    %692 = arith.mulf %691, %690 : vector<2x32xf32>
    %cst_166 = arith.constant 1.000000e+00 : f32
    %693 = vector.broadcast %cst_166 : f32 to vector<2x32xf32>
    %694 = arith.subf %692, %693 : vector<2x32xf32>
    %695 = vector.extract_strided_slice %687 {offsets = [0, 96], sizes = [2, 32], strides = [1, 1]} : vector<2x128xf32> to vector<2x32xf32>
    %696 = arith.mulf %689, %652 : vector<2x32xf32>
    %697 = arith.mulf %688, %694 : vector<2x32xf32>
    %698 = arith.addf %696, %697 : vector<2x32xf32>
    %699 = math.tanh %698 : vector<2x32xf32>
    %700 = arith.mulf %695, %699 : vector<2x32xf32>
    %701 = arith.select %679, %700, %651 : vector<2x32xi1>, vector<2x32xf32>
    %702 = arith.select %679, %698, %652 : vector<2x32xi1>, vector<2x32xf32>
    %703 = vector.extract_strided_slice %444 {offsets = [10, 0], sizes = [2, 128], strides = [1, 1]} : vector<16x128xf32> to vector<2x128xf32>
    %704 = vector.extract_strided_slice %3 {offsets = [10, 0], sizes = [2, 32], strides = [1, 1]} : vector<16x32xi1> to vector<2x32xi1>
    %705 = arith.truncf %676 : vector<2x32xf32> to vector<2x32xbf16>
    %cst_167 = arith.constant dense<0.000000e+00> : vector<2x128xf32>
    %706 = tpu.matmul %705, %6, %cst_167 {dimension_numbers = #tpu.dot_dimension_numbers<[1], [0], [0], [1], [0, 0, 1, 1], [], []>} : vector<2x32xbf16>, vector<32x128xbf16>, vector<2x128xf32> -> vector<2x128xf32>
    %707 = arith.addf %703, %706 : vector<2x128xf32>
    %708 = arith.negf %707 : vector<2x128xf32>
    %709 = math.exp %708 : vector<2x128xf32>
    %cst_168 = arith.constant 1.000000e+00 : f32
    %710 = vector.broadcast %cst_168 : f32 to vector<2x128xf32>
    %711 = arith.addf %710, %709 : vector<2x128xf32>
    %712 = arith.divf %710, %711 : vector<2x128xf32>
    %713 = vector.extract_strided_slice %712 {offsets = [0, 0], sizes = [2, 32], strides = [1, 1]} : vector<2x128xf32> to vector<2x32xf32>
    %714 = vector.extract_strided_slice %712 {offsets = [0, 32], sizes = [2, 32], strides = [1, 1]} : vector<2x128xf32> to vector<2x32xf32>
    %715 = vector.extract_strided_slice %712 {offsets = [0, 64], sizes = [2, 32], strides = [1, 1]} : vector<2x128xf32> to vector<2x32xf32>
    %cst_169 = arith.constant 2.000000e+00 : f32
    %716 = vector.broadcast %cst_169 : f32 to vector<2x32xf32>
    %717 = arith.mulf %716, %715 : vector<2x32xf32>
    %cst_170 = arith.constant 1.000000e+00 : f32
    %718 = vector.broadcast %cst_170 : f32 to vector<2x32xf32>
    %719 = arith.subf %717, %718 : vector<2x32xf32>
    %720 = vector.extract_strided_slice %712 {offsets = [0, 96], sizes = [2, 32], strides = [1, 1]} : vector<2x128xf32> to vector<2x32xf32>
    %721 = arith.mulf %714, %677 : vector<2x32xf32>
    %722 = arith.mulf %713, %719 : vector<2x32xf32>
    %723 = arith.addf %721, %722 : vector<2x32xf32>
    %724 = math.tanh %723 : vector<2x32xf32>
    %725 = arith.mulf %720, %724 : vector<2x32xf32>
    %726 = arith.select %704, %725, %676 : vector<2x32xi1>, vector<2x32xf32>
    %727 = arith.select %704, %723, %677 : vector<2x32xi1>, vector<2x32xf32>
    %728 = vector.extract_strided_slice %452 {offsets = [4, 0], sizes = [2, 128], strides = [1, 1]} : vector<16x128xf32> to vector<2x128xf32>
    %729 = vector.extract_strided_slice %3 {offsets = [4, 0], sizes = [2, 32], strides = [1, 1]} : vector<16x32xi1> to vector<2x32xi1>
    %730 = arith.truncf %701 : vector<2x32xf32> to vector<2x32xbf16>
    %cst_171 = arith.constant dense<0.000000e+00> : vector<2x128xf32>
    %731 = tpu.matmul %730, %7, %cst_171 {dimension_numbers = #tpu.dot_dimension_numbers<[1], [0], [0], [1], [0, 0, 1, 1], [], []>} : vector<2x32xbf16>, vector<32x128xbf16>, vector<2x128xf32> -> vector<2x128xf32>
    %732 = arith.addf %728, %731 : vector<2x128xf32>
    %733 = arith.negf %732 : vector<2x128xf32>
    %734 = math.exp %733 : vector<2x128xf32>
    %cst_172 = arith.constant 1.000000e+00 : f32
    %735 = vector.broadcast %cst_172 : f32 to vector<2x128xf32>
    %736 = arith.addf %735, %734 : vector<2x128xf32>
    %737 = arith.divf %735, %736 : vector<2x128xf32>
    %738 = vector.extract_strided_slice %737 {offsets = [0, 0], sizes = [2, 32], strides = [1, 1]} : vector<2x128xf32> to vector<2x32xf32>
    %739 = vector.extract_strided_slice %737 {offsets = [0, 32], sizes = [2, 32], strides = [1, 1]} : vector<2x128xf32> to vector<2x32xf32>
    %740 = vector.extract_strided_slice %737 {offsets = [0, 64], sizes = [2, 32], strides = [1, 1]} : vector<2x128xf32> to vector<2x32xf32>
    %cst_173 = arith.constant 2.000000e+00 : f32
    %741 = vector.broadcast %cst_173 : f32 to vector<2x32xf32>
    %742 = arith.mulf %741, %740 : vector<2x32xf32>
    %cst_174 = arith.constant 1.000000e+00 : f32
    %743 = vector.broadcast %cst_174 : f32 to vector<2x32xf32>
    %744 = arith.subf %742, %743 : vector<2x32xf32>
    %745 = vector.extract_strided_slice %737 {offsets = [0, 96], sizes = [2, 32], strides = [1, 1]} : vector<2x128xf32> to vector<2x32xf32>
    %746 = arith.mulf %739, %702 : vector<2x32xf32>
    %747 = arith.mulf %738, %744 : vector<2x32xf32>
    %748 = arith.addf %746, %747 : vector<2x32xf32>
    %749 = math.tanh %748 : vector<2x32xf32>
    %750 = arith.mulf %745, %749 : vector<2x32xf32>
    %751 = arith.select %729, %750, %701 : vector<2x32xi1>, vector<2x32xf32>
    %752 = arith.select %729, %748, %702 : vector<2x32xi1>, vector<2x32xf32>
    %753 = vector.extract_strided_slice %444 {offsets = [12, 0], sizes = [2, 128], strides = [1, 1]} : vector<16x128xf32> to vector<2x128xf32>
    %754 = vector.extract_strided_slice %3 {offsets = [12, 0], sizes = [2, 32], strides = [1, 1]} : vector<16x32xi1> to vector<2x32xi1>
    %755 = arith.truncf %726 : vector<2x32xf32> to vector<2x32xbf16>
    %cst_175 = arith.constant dense<0.000000e+00> : vector<2x128xf32>
    %756 = tpu.matmul %755, %6, %cst_175 {dimension_numbers = #tpu.dot_dimension_numbers<[1], [0], [0], [1], [0, 0, 1, 1], [], []>} : vector<2x32xbf16>, vector<32x128xbf16>, vector<2x128xf32> -> vector<2x128xf32>
    %757 = arith.addf %753, %756 : vector<2x128xf32>
    %758 = arith.negf %757 : vector<2x128xf32>
    %759 = math.exp %758 : vector<2x128xf32>
    %cst_176 = arith.constant 1.000000e+00 : f32
    %760 = vector.broadcast %cst_176 : f32 to vector<2x128xf32>
    %761 = arith.addf %760, %759 : vector<2x128xf32>
    %762 = arith.divf %760, %761 : vector<2x128xf32>
    %763 = vector.extract_strided_slice %762 {offsets = [0, 0], sizes = [2, 32], strides = [1, 1]} : vector<2x128xf32> to vector<2x32xf32>
    %764 = vector.extract_strided_slice %762 {offsets = [0, 32], sizes = [2, 32], strides = [1, 1]} : vector<2x128xf32> to vector<2x32xf32>
    %765 = vector.extract_strided_slice %762 {offsets = [0, 64], sizes = [2, 32], strides = [1, 1]} : vector<2x128xf32> to vector<2x32xf32>
    %cst_177 = arith.constant 2.000000e+00 : f32
    %766 = vector.broadcast %cst_177 : f32 to vector<2x32xf32>
    %767 = arith.mulf %766, %765 : vector<2x32xf32>
    %cst_178 = arith.constant 1.000000e+00 : f32
    %768 = vector.broadcast %cst_178 : f32 to vector<2x32xf32>
    %769 = arith.subf %767, %768 : vector<2x32xf32>
    %770 = vector.extract_strided_slice %762 {offsets = [0, 96], sizes = [2, 32], strides = [1, 1]} : vector<2x128xf32> to vector<2x32xf32>
    %771 = arith.mulf %764, %727 : vector<2x32xf32>
    %772 = arith.mulf %763, %769 : vector<2x32xf32>
    %773 = arith.addf %771, %772 : vector<2x32xf32>
    %774 = math.tanh %773 : vector<2x32xf32>
    %775 = arith.mulf %770, %774 : vector<2x32xf32>
    %776 = arith.select %754, %775, %726 : vector<2x32xi1>, vector<2x32xf32>
    %777 = arith.select %754, %773, %727 : vector<2x32xi1>, vector<2x32xf32>
    %778 = vector.extract_strided_slice %452 {offsets = [2, 0], sizes = [2, 128], strides = [1, 1]} : vector<16x128xf32> to vector<2x128xf32>
    %779 = vector.extract_strided_slice %3 {offsets = [2, 0], sizes = [2, 32], strides = [1, 1]} : vector<16x32xi1> to vector<2x32xi1>
    %780 = arith.truncf %751 : vector<2x32xf32> to vector<2x32xbf16>
    %cst_179 = arith.constant dense<0.000000e+00> : vector<2x128xf32>
    %781 = tpu.matmul %780, %7, %cst_179 {dimension_numbers = #tpu.dot_dimension_numbers<[1], [0], [0], [1], [0, 0, 1, 1], [], []>} : vector<2x32xbf16>, vector<32x128xbf16>, vector<2x128xf32> -> vector<2x128xf32>
    %782 = arith.addf %778, %781 : vector<2x128xf32>
    %783 = arith.negf %782 : vector<2x128xf32>
    %784 = math.exp %783 : vector<2x128xf32>
    %cst_180 = arith.constant 1.000000e+00 : f32
    %785 = vector.broadcast %cst_180 : f32 to vector<2x128xf32>
    %786 = arith.addf %785, %784 : vector<2x128xf32>
    %787 = arith.divf %785, %786 : vector<2x128xf32>
    %788 = vector.extract_strided_slice %787 {offsets = [0, 0], sizes = [2, 32], strides = [1, 1]} : vector<2x128xf32> to vector<2x32xf32>
    %789 = vector.extract_strided_slice %787 {offsets = [0, 32], sizes = [2, 32], strides = [1, 1]} : vector<2x128xf32> to vector<2x32xf32>
    %790 = vector.extract_strided_slice %787 {offsets = [0, 64], sizes = [2, 32], strides = [1, 1]} : vector<2x128xf32> to vector<2x32xf32>
    %cst_181 = arith.constant 2.000000e+00 : f32
    %791 = vector.broadcast %cst_181 : f32 to vector<2x32xf32>
    %792 = arith.mulf %791, %790 : vector<2x32xf32>
    %cst_182 = arith.constant 1.000000e+00 : f32
    %793 = vector.broadcast %cst_182 : f32 to vector<2x32xf32>
    %794 = arith.subf %792, %793 : vector<2x32xf32>
    %795 = vector.extract_strided_slice %787 {offsets = [0, 96], sizes = [2, 32], strides = [1, 1]} : vector<2x128xf32> to vector<2x32xf32>
    %796 = arith.mulf %789, %752 : vector<2x32xf32>
    %797 = arith.mulf %788, %794 : vector<2x32xf32>
    %798 = arith.addf %796, %797 : vector<2x32xf32>
    %799 = math.tanh %798 : vector<2x32xf32>
    %800 = arith.mulf %795, %799 : vector<2x32xf32>
    %801 = arith.select %779, %800, %751 : vector<2x32xi1>, vector<2x32xf32>
    %802 = arith.select %779, %798, %752 : vector<2x32xi1>, vector<2x32xf32>
    %803 = vector.extract_strided_slice %444 {offsets = [14, 0], sizes = [2, 128], strides = [1, 1]} : vector<16x128xf32> to vector<2x128xf32>
    %804 = vector.extract_strided_slice %3 {offsets = [14, 0], sizes = [2, 32], strides = [1, 1]} : vector<16x32xi1> to vector<2x32xi1>
    %805 = arith.truncf %776 : vector<2x32xf32> to vector<2x32xbf16>
    %cst_183 = arith.constant dense<0.000000e+00> : vector<2x128xf32>
    %806 = tpu.matmul %805, %6, %cst_183 {dimension_numbers = #tpu.dot_dimension_numbers<[1], [0], [0], [1], [0, 0, 1, 1], [], []>} : vector<2x32xbf16>, vector<32x128xbf16>, vector<2x128xf32> -> vector<2x128xf32>
    %807 = arith.addf %803, %806 : vector<2x128xf32>
    %808 = arith.negf %807 : vector<2x128xf32>
    %809 = math.exp %808 : vector<2x128xf32>
    %cst_184 = arith.constant 1.000000e+00 : f32
    %810 = vector.broadcast %cst_184 : f32 to vector<2x128xf32>
    %811 = arith.addf %810, %809 : vector<2x128xf32>
    %812 = arith.divf %810, %811 : vector<2x128xf32>
    %813 = vector.extract_strided_slice %812 {offsets = [0, 0], sizes = [2, 32], strides = [1, 1]} : vector<2x128xf32> to vector<2x32xf32>
    %814 = vector.extract_strided_slice %812 {offsets = [0, 32], sizes = [2, 32], strides = [1, 1]} : vector<2x128xf32> to vector<2x32xf32>
    %815 = vector.extract_strided_slice %812 {offsets = [0, 64], sizes = [2, 32], strides = [1, 1]} : vector<2x128xf32> to vector<2x32xf32>
    %cst_185 = arith.constant 2.000000e+00 : f32
    %816 = vector.broadcast %cst_185 : f32 to vector<2x32xf32>
    %817 = arith.mulf %816, %815 : vector<2x32xf32>
    %cst_186 = arith.constant 1.000000e+00 : f32
    %818 = vector.broadcast %cst_186 : f32 to vector<2x32xf32>
    %819 = arith.subf %817, %818 : vector<2x32xf32>
    %820 = vector.extract_strided_slice %812 {offsets = [0, 96], sizes = [2, 32], strides = [1, 1]} : vector<2x128xf32> to vector<2x32xf32>
    %821 = arith.mulf %814, %777 : vector<2x32xf32>
    %822 = arith.mulf %813, %819 : vector<2x32xf32>
    %823 = arith.addf %821, %822 : vector<2x32xf32>
    %824 = math.tanh %823 : vector<2x32xf32>
    %825 = arith.mulf %820, %824 : vector<2x32xf32>
    %826 = arith.select %804, %825, %776 : vector<2x32xi1>, vector<2x32xf32>
    %827 = vector.extract_strided_slice %452 {offsets = [0, 0], sizes = [2, 128], strides = [1, 1]} : vector<16x128xf32> to vector<2x128xf32>
    %828 = vector.extract_strided_slice %3 {offsets = [0, 0], sizes = [2, 32], strides = [1, 1]} : vector<16x32xi1> to vector<2x32xi1>
    %829 = arith.truncf %801 : vector<2x32xf32> to vector<2x32xbf16>
    %cst_187 = arith.constant dense<0.000000e+00> : vector<2x128xf32>
    %830 = tpu.matmul %829, %7, %cst_187 {dimension_numbers = #tpu.dot_dimension_numbers<[1], [0], [0], [1], [0, 0, 1, 1], [], []>} : vector<2x32xbf16>, vector<32x128xbf16>, vector<2x128xf32> -> vector<2x128xf32>
    %831 = arith.addf %827, %830 : vector<2x128xf32>
    %832 = arith.negf %831 : vector<2x128xf32>
    %833 = math.exp %832 : vector<2x128xf32>
    %cst_188 = arith.constant 1.000000e+00 : f32
    %834 = vector.broadcast %cst_188 : f32 to vector<2x128xf32>
    %835 = arith.addf %834, %833 : vector<2x128xf32>
    %836 = arith.divf %834, %835 : vector<2x128xf32>
    %837 = vector.extract_strided_slice %836 {offsets = [0, 0], sizes = [2, 32], strides = [1, 1]} : vector<2x128xf32> to vector<2x32xf32>
    %838 = vector.extract_strided_slice %836 {offsets = [0, 32], sizes = [2, 32], strides = [1, 1]} : vector<2x128xf32> to vector<2x32xf32>
    %839 = vector.extract_strided_slice %836 {offsets = [0, 64], sizes = [2, 32], strides = [1, 1]} : vector<2x128xf32> to vector<2x32xf32>
    %cst_189 = arith.constant 2.000000e+00 : f32
    %840 = vector.broadcast %cst_189 : f32 to vector<2x32xf32>
    %841 = arith.mulf %840, %839 : vector<2x32xf32>
    %cst_190 = arith.constant 1.000000e+00 : f32
    %842 = vector.broadcast %cst_190 : f32 to vector<2x32xf32>
    %843 = arith.subf %841, %842 : vector<2x32xf32>
    %844 = vector.extract_strided_slice %836 {offsets = [0, 96], sizes = [2, 32], strides = [1, 1]} : vector<2x128xf32> to vector<2x32xf32>
    %845 = arith.mulf %838, %802 : vector<2x32xf32>
    %846 = arith.mulf %837, %843 : vector<2x32xf32>
    %847 = arith.addf %845, %846 : vector<2x32xf32>
    %848 = math.tanh %847 : vector<2x32xf32>
    %849 = arith.mulf %844, %848 : vector<2x32xf32>
    %850 = arith.select %828, %849, %801 : vector<2x32xi1>, vector<2x32xf32>
    %c0_191 = arith.constant 0 : index
    %c0_192 = arith.constant 0 : index
    %851 = vector.load %arg14[%c0_191, %c0_192] : memref<64x64xf32, #tpu.memory_space<vmem>>, vector<64x64xf32>
    %852 = vector.extract_strided_slice %851 {offsets = [0, 0], sizes = [32, 64], strides = [1, 1]} : vector<64x64xf32> to vector<32x64xf32>
    %cst_193 = arith.constant dense<0.000000e+00> : vector<2x64xf32>
    %853 = tpu.matmul %826, %852, %cst_193 {dimension_numbers = #tpu.dot_dimension_numbers<[1], [0], [0], [1], [0, 0, 1, 1], [], []>} : vector<2x32xf32>, vector<32x64xf32>, vector<2x64xf32> -> vector<2x64xf32>
    %854 = vector.extract_strided_slice %851 {offsets = [32, 0], sizes = [32, 64], strides = [1, 1]} : vector<64x64xf32> to vector<32x64xf32>
    %cst_194 = arith.constant dense<0.000000e+00> : vector<2x64xf32>
    %855 = tpu.matmul %850, %854, %cst_194 {dimension_numbers = #tpu.dot_dimension_numbers<[1], [0], [0], [1], [0, 0, 1, 1], [], []>} : vector<2x32xf32>, vector<32x64xf32>, vector<2x64xf32> -> vector<2x64xf32>
    %856 = arith.addf %853, %855 : vector<2x64xf32>
    %c0_195 = arith.constant 0 : index
    %c0_196 = arith.constant 0 : index
    %857 = vector.load %arg15[%c0_195, %c0_196] : memref<1x64xf32, #tpu.memory_space<vmem>>, vector<1x64xf32>
    %858 = vector.broadcast %857 : vector<1x64xf32> to vector<2x64xf32>
    %859 = arith.addf %856, %858 : vector<2x64xf32>
    %cst_197 = arith.constant dense<0xFF800000> : vector<2xf32>
    %860 = vector.multi_reduction <maximumf>, %859, %cst_197 [1] : vector<2x64xf32> to vector<2xf32>
    %861 = vector.shape_cast %860 : vector<2xf32> to vector<2x1xf32>
    %862 = vector.broadcast %861 : vector<2x1xf32> to vector<2x64xf32>
    %863 = arith.subf %859, %862 : vector<2x64xf32>
    %864 = math.exp %863 : vector<2x64xf32>
    %cst_198 = arith.constant dense<0.000000e+00> : vector<2xf32>
    %865 = vector.multi_reduction <add>, %864, %cst_198 [1] : vector<2x64xf32> to vector<2xf32>
    %866 = vector.shape_cast %865 : vector<2xf32> to vector<2x1xf32>
    %867 = math.log %866 : vector<2x1xf32>
    %868 = vector.broadcast %867 : vector<2x1xf32> to vector<2x64xf32>
    %869 = arith.subf %863, %868 : vector<2x64xf32>
    %c0_199 = arith.constant 0 : index
    %c0_200 = arith.constant 0 : index
    %870 = vector.load %arg16[%c0_199, %c0_200] : memref<2x64xf32, #tpu.memory_space<vmem>>, vector<2x64xf32>
    tpu.vector_store %arg16[%c0_199, %c0_200], %869 {strides = array<i32>} : memref<2x64xf32, #tpu.memory_space<vmem>>, vector<2x64xf32>,
    return
  }
}

</mosaic_0001>

<bundles_post_ra>
// kernel: tpu_custom_call.1
= control target key start
LH: loop header
LB: loop body
LE: loop exit
PB: predicated region body
PF: predicated region fallthrough
CT: control target
= control target key end

     0   :  { %s6270_s0 = inlined_call_operand.hbm [shape: f32[16,32], index: 0, kind: input, shape index: {}]   ;;  %s6271_s1 = inlined_call_operand.hbm [shape: f32[16,32], index: 1, kind: input, shape index: {}]   ;;  %s6272_s2 = inlined_call_operand.hbm [shape: f32[32,128], index: 2, kind: input, shape index: {}]   ;;  %s6273_s3 = inlined_call_operand.hbm [shape: bf16[32,128], index: 3, kind: input, shape index: {}]   ;;  %s6274_s4 = inlined_call_operand.vmem [shape: f32[1,128], index: 4, kind: input, shape index: {}]   ;;  %s6275_s5 = inlined_call_operand.hbm [shape: f32[32,128], index: 5, kind: input, shape index: {}]   ;;  %s6276_s6 = inlined_call_operand.vmem [shape: bf16[32,128], index: 6, kind: input, shape index: {}]   ;;  %s6277_s7 = inlined_call_operand.vmem [shape: f32[1,128], index: 7, kind: input, shape index: {}]   ;;  %s6278_s8 = inlined_call_operand.hbm [shape: f32[64,128], index: 8, kind: input, shape index: {}]   ;;  %s6279_s9 = inlined_call_operand.vmem [shape: bf16[32,128], index: 9, kind: input, shape index: {}]   ;;  %s6280_s10 = inlined_call_operand.vmem [shape: f32[1,128], index: 10, kind: input, shape index: {}]   ;;  %s6281_s11 = inlined_call_operand.hbm [shape: f32[64,128], index: 11, kind: input, shape index: {}]   ;;  %s6282_s12 = inlined_call_operand.hbm [shape: bf16[32,128], index: 12, kind: input, shape index: {}]   ;;  %s6283_s13 = inlined_call_operand.vmem [shape: f32[1,128], index: 13, kind: input, shape index: {}]   ;;  %s6284_s14 = inlined_call_operand.hbm [shape: f32[64,64], index: 14, kind: input, shape index: {}]   ;;  %s6285_s15 = inlined_call_operand.vmem [shape: f32[1,64], index: 15, kind: input, shape index: {}]   ;;  %s6286_s16 = inlined_call_operand.hbm [shape: f32[2,64], index: 16, kind: output, shape index: {}]  }
   0x1   :  { %6293 = sst [smem:[#allocation26_spill]] %s6270_s0 }
   0x2   :  { %6294 = sst [smem:[#allocation27_spill]] %s6286_s16 }
   0x3   :  { %21 = vsyncpa [#allocation5], 0 }
   0x4   :  { %22 = vsyncpa [#allocation8], 0 }
   0x5   :  { %23 = vsyncpa [#allocation11], 0 }
   0x6   :  { %24 = vsyncpa [#allocation14], 0 }
   0x7   :  { %25 = vsyncpa [#allocation17], 0 }
   0x8   :  { %26 = vsyncpa [#allocation6], 0  ;;  %s5016_s21 = smov [#allocation7]   ;;  %s5017_s23 = smov [#allocation10]  }
   0x9   :  { %s44_s22 = sshll.u32 %s5016_s21, 4  ;;  %s68_s24 = sshll.u32 %s5017_s23, 4  ;;  %s45_s22 = int_to_ptr.vmem [resolvable:$true] %s44_s22  ;;  %s5121_s24 = int_to_ptr.vmem [resolvable:$true] %s68_s24 }
   0xa   :  { %s4784_s27 = scalar_lea.hbm %s6271_s1, 256 }
   0xb   :  { %p4785_p0 = scmp.ne.s32.totalorder %s6271_s1, %s4784_s27  ;;  %p4788_p1 = scmp.lt.u32.totalorder %s4784_s27, %s6271_s1 }
   0xd   :  { %p4790_p2 = pnand %p4788_p1, %p4785_p0 }
   0xf   :  { %4793 = shalt.err (!%p4790_p2)
}
  0x10   :  { %s4794_s17 = scalar_lea.vmem %s45_s22, 256  ;;  %p4799_p4 = scmp.lt.s32.totalorder %s45_s22, %s45_s22 }
  0x11   :  { %p4795_p3 = scmp.ne.s32.totalorder %s45_s22, %s4794_s17  ;;  %p4800_p5 = scmp.lt.s32.totalorder %s4794_s17, %s4794_s17 }
  0x13   :  { %p4801_p6 = por %p4800_p5, %p4799_p4 }
  0x15   :  { %p4802_p7 = pnand %p4801_p6, %p4795_p3 }
  0x17   :  { %4805 = shalt.err (!%p4802_p7)
}
  0x18   :  { %s6288_s18 = smov 128   ;;  %s6290_s19 = smov 8  }
  0x19   :  { %50 = dma.hbm_to_vmem [thread:$0]  %s6271_s1, 256, %s45_s22, [#allocation8], %s6288_s18, %s6288_s18, %s6290_s19  }
  0x1a   :  { %s4806_s26 = scalar_lea.hbm %s6273_s3, 256 }
  0x1b   :  { %p4807_p8 = scmp.ne.s32.totalorder %s6273_s3, %s4806_s26  ;;  %p4810_p9 = scmp.lt.u32.totalorder %s4806_s26, %s6273_s3 }
  0x1d   :  { %p4812_p10 = pnand %p4810_p9, %p4807_p8 }
  0x1f   :  { %4815 = shalt.err (!%p4812_p10)
}
  0x20   :  { %s4816_s0 = scalar_lea.vmem %s5121_s24, 256  ;;  %p4821_p12 = scmp.lt.s32.totalorder %s5121_s24, %s5121_s24 }
  0x21   :  { %p4817_p11 = scmp.ne.s32.totalorder %s5121_s24, %s4816_s0  ;;  %p4822_p13 = scmp.lt.s32.totalorder %s4816_s0, %s4816_s0 }
  0x23   :  { %p4823_p0 = por %p4822_p13, %p4821_p12 }
  0x25   :  { %p4824_p1 = pnand %p4823_p0, %p4817_p11 }
  0x27   :  { %4827 = shalt.err (!%p4824_p1)
}
  0x28   :  { %s5020_s1 = smov 64   ;;  %s5021_s22 = smov 4  }
  0x29   :  { %74 = dma.hbm_to_vmem [thread:$0]  %s6273_s3, 256, %s5121_s24, [#allocation11], %s5020_s1, %s5020_s1, %s5021_s22  }
  0x2a   :  { %s5022_s21 = smov [#allocation13]   ;;  %s5023_s25 = smov [#allocation16]  }
  0x2b   :  { %s98_s23 = sshll.u32 %s5022_s21, 4  ;;  %s126_s26 = sshll.u32 %s5023_s25, 4  ;;  %s99_s23 = int_to_ptr.vmem [resolvable:$true] %s98_s23  ;;  %s5158_s26 = int_to_ptr.vmem [resolvable:$true] %s126_s26 }
  0x2c   :  { %s4828_s29 = scalar_lea.hbm %s6278_s8, 1024 }
  0x2d   :  { %p4829_p2 = scmp.ne.s32.totalorder %s6278_s8, %s4828_s29  ;;  %p4832_p3 = scmp.lt.u32.totalorder %s4828_s29, %s6278_s8 }
  0x2f   :  { %p4834_p4 = pnand %p4832_p3, %p4829_p2 }
  0x31   :  { %4837 = shalt.err (!%p4834_p4)
}
  0x32   :  { %s4838_s3 = scalar_lea.vmem %s99_s23, 1024  ;;  %p4843_p6 = scmp.lt.s32.totalorder %s99_s23, %s99_s23 }
  0x33   :  { %p4839_p5 = scmp.ne.s32.totalorder %s99_s23, %s4838_s3  ;;  %p4844_p7 = scmp.lt.s32.totalorder %s4838_s3, %s4838_s3 }
  0x35   :  { %p4845_p8 = por %p4844_p7, %p4843_p6 }
  0x37   :  { %p4846_p9 = pnand %p4845_p8, %p4839_p5 }
  0x39   :  { %4849 = shalt.err (!%p4846_p9)
}
  0x3a   :  { %s6295_s24 = smov 8   ;;  %s6296_s17 = smov 128  }
  0x3b   :  { %104 = dma.hbm_to_vmem [thread:$0]  %s6278_s8, 1024, %s99_s23, [#allocation14], %s6296_s17, %s6296_s17, %s6295_s24  }
  0x3c   :  { %s4850_s18 = scalar_lea.hbm %s6282_s12, 256 }
  0x3d   :  { %p4851_p10 = scmp.ne.s32.totalorder %s6282_s12, %s4850_s18  ;;  %p4854_p11 = scmp.lt.u32.totalorder %s4850_s18, %s6282_s12 }
  0x3f   :  { %p4856_p12 = pnand %p4854_p11, %p4851_p10 }
  0x41   :  { %4859 = shalt.err (!%p4856_p12)
}
  0x42   :  { %s4860_s0 = scalar_lea.vmem %s5158_s26, 256  ;;  %p4865_p0 = scmp.lt.s32.totalorder %s5158_s26, %s5158_s26 }
  0x43   :  { %p4861_p13 = scmp.ne.s32.totalorder %s5158_s26, %s4860_s0  ;;  %p4866_p1 = scmp.lt.s32.totalorder %s4860_s0, %s4860_s0 }
  0x45   :  { %p4867_p2 = por %p4866_p1, %p4865_p0 }
  0x47   :  { %p4868_p3 = pnand %p4867_p2, %p4861_p13 }
  0x49   :  { %4871 = shalt.err (!%p4868_p3)
}
  0x4a   :  { %132 = dma.hbm_to_vmem [thread:$0]  %s6282_s12, 256, %s5158_s26, [#allocation17], %s5020_s1, %s5020_s1, %s5021_s22  }
  0x4b   :  { %s5024_s3 = smov [#allocation4]   ;;  %s5025_s21 = smov [#allocation9]  }
  0x4c   :  { %s32_s20 = sshll.u32 %s5024_s3, 4  ;;  %s56_s25 = sshll.u32 %s5025_s21, 4  ;;  %s33_s20 = int_to_ptr.vmem [resolvable:$true] %s32_s20  ;;  %s5195_s25 = int_to_ptr.vmem [resolvable:$true] %s56_s25 }
  0x4d   :  { %s6297_s19 = sld [smem:[#allocation26_spill]] }
  0x53   :  { %s4872_s28 = scalar_lea.hbm %s6297_s19, 256 }
  0x54   :  { %p4873_p4 = scmp.ne.s32.totalorder %s6297_s19, %s4872_s28  ;;  %p4876_p5 = scmp.lt.u32.totalorder %s4872_s28, %s6297_s19 }
  0x56   :  { %p4878_p6 = pnand %p4876_p5, %p4873_p4 }
  0x58   :  { %4881 = shalt.err (!%p4878_p6)
}
  0x59   :  { %s4882_s12 = scalar_lea.vmem %s33_s20, 256  ;;  %p4887_p8 = scmp.lt.s32.totalorder %s33_s20, %s33_s20 }
  0x5a   :  { %p4883_p7 = scmp.ne.s32.totalorder %s33_s20, %s4882_s12  ;;  %p4888_p9 = scmp.lt.s32.totalorder %s4882_s12, %s4882_s12 }
  0x5c   :  { %p4889_p10 = por %p4888_p9, %p4887_p8 }
  0x5e   :  { %p4890_p11 = pnand %p4889_p10, %p4883_p7 }
  0x60   :  { %4893 = shalt.err (!%p4890_p11)
}
  0x61   :  { %38 = dma.hbm_to_vmem [thread:$0]  %s6297_s19, 256, %s33_s20, [#allocation5], %s6296_s17, %s6296_s17, %s6295_s24  }
  0x62   :  { %s4894_s16 = scalar_lea.hbm %s6272_s2, 512 }
  0x63   :  { %p4895_p12 = scmp.ne.s32.totalorder %s6272_s2, %s4894_s16  ;;  %p4898_p13 = scmp.lt.u32.totalorder %s4894_s16, %s6272_s2 }
  0x65   :  { %p4900_p0 = pnand %p4898_p13, %p4895_p12 }
  0x67   :  { %4903 = shalt.err (!%p4900_p0)
}
  0x68   :  { %s4904_s28 = scalar_lea.vmem %s5195_s25, 512  ;;  %p4909_p2 = scmp.lt.s32.totalorder %s5195_s25, %s5195_s25 }
  0x69   :  { %p4905_p1 = scmp.ne.s32.totalorder %s5195_s25, %s4904_s28  ;;  %p4910_p3 = scmp.lt.s32.totalorder %s4904_s28, %s4904_s28 }
  0x6b   :  { %p4911_p4 = por %p4910_p3, %p4909_p2 }
  0x6d   :  { %p4912_p5 = pnand %p4911_p4, %p4905_p1 }
  0x6f   :  { %4915 = shalt.err (!%p4912_p5)
}
  0x70   :  { %62 = dma.hbm_to_vmem [thread:$0]  %s6272_s2, 512, %s5195_s25, [#allocation8], %s6296_s17, %s6296_s17, %s6295_s24  }
  0x71   :  { %s5026_s29 = smov [#allocation12]   ;;  %s5027_s0 = smov [#allocation15]  }
  0x72   :  { %s82_s30 = sshll.u32 %s5026_s29, 4  ;;  %s114_s12 = sshll.u32 %s5027_s0, 4  ;;  %s83_s30 = int_to_ptr.vmem [resolvable:$true] %s82_s30  ;;  %s5232_s12 = int_to_ptr.vmem [resolvable:$true] %s114_s12 }
  0x73   :  { %s4916_s8 = scalar_lea.hbm %s6275_s5, 512 }
  0x74   :  { %p4917_p6 = scmp.ne.s32.totalorder %s6275_s5, %s4916_s8  ;;  %p4920_p7 = scmp.lt.u32.totalorder %s4916_s8, %s6275_s5 }
  0x76   :  { %p4922_p8 = pnand %p4920_p7, %p4917_p6 }
  0x78   :  { %4925 = shalt.err (!%p4922_p8)
}
  0x79   :  { %s4926_s2 = scalar_lea.vmem %s83_s30, 512  ;;  %p4931_p10 = scmp.lt.s32.totalorder %s83_s30, %s83_s30 }
  0x7a   :  { %p4927_p9 = scmp.ne.s32.totalorder %s83_s30, %s4926_s2  ;;  %p4932_p11 = scmp.lt.s32.totalorder %s4926_s2, %s4926_s2 }
  0x7c   :  { %p4933_p12 = por %p4932_p11, %p4931_p10 }
  0x7e   :  { %p4934_p13 = pnand %p4933_p12, %p4927_p9 }
  0x80   :  { %4937 = shalt.err (!%p4934_p13)
}
  0x81   :  { %88 = dma.hbm_to_vmem [thread:$0]  %s6275_s5, 512, %s83_s30, [#allocation11], %s6296_s17, %s6296_s17, %s6295_s24  }
  0x82   :  { %s4938_s20 = scalar_lea.hbm %s6281_s11, 1024 }
  0x83   :  { %p4939_p0 = scmp.ne.s32.totalorder %s6281_s11, %s4938_s20  ;;  %p4942_p1 = scmp.lt.u32.totalorder %s4938_s20, %s6281_s11 }
  0x85   :  { %p4944_p2 = pnand %p4942_p1, %p4939_p0 }
  0x87   :  { %4947 = shalt.err (!%p4944_p2)
}
  0x88   :  { %s4948_s26 = scalar_lea.vmem %s5232_s12, 1024  ;;  %p4953_p4 = scmp.lt.s32.totalorder %s5232_s12, %s5232_s12 }
  0x89   :  { %p4949_p3 = scmp.ne.s32.totalorder %s5232_s12, %s4948_s26  ;;  %p4954_p5 = scmp.lt.s32.totalorder %s4948_s26, %s4948_s26 }
  0x8b   :  { %p4955_p6 = por %p4954_p5, %p4953_p4 }
  0x8d   :  { %p4956_p7 = pnand %p4955_p6, %p4949_p3 }
  0x8f   :  { %4959 = shalt.err (!%p4956_p7)
}
  0x90   :  { %120 = dma.hbm_to_vmem [thread:$0]  %s6281_s11, 1024, %s5232_s12, [#allocation14], %s6296_s17, %s6296_s17, %s6295_s24  }
  0x91   :  { %s5028_s8 = smov [#allocation18]   ;;  %s4960_s21 = scalar_lea.hbm %s6284_s14, 1024 }
  0x92   :  { %s140_s23 = sshll.u32 %s5028_s8, 4  ;;  %p4961_p8 = scmp.ne.s32.totalorder %s6284_s14, %s4960_s21  ;;  %s141_s23 = int_to_ptr.vmem [resolvable:$true] %s140_s23 }
  0x93   :  { %p4964_p9 = scmp.lt.u32.totalorder %s4960_s21, %s6284_s14 }
  0x95   :  { %p4966_p10 = pnand %p4964_p9, %p4961_p8 }
  0x97   :  { %4969 = shalt.err (!%p4966_p10)
}
  0x98   :  { %s4970_s28 = scalar_lea.vmem %s141_s23, 1024  ;;  %p4975_p12 = scmp.lt.s32.totalorder %s141_s23, %s141_s23 }
  0x99   :  { %p4971_p11 = scmp.ne.s32.totalorder %s141_s23, %s4970_s28  ;;  %p4976_p13 = scmp.lt.s32.totalorder %s4970_s28, %s4970_s28 }
  0x9b   :  { %p4977_p0 = por %p4976_p13, %p4975_p12 }
  0x9d   :  { %p4978_p1 = pnand %p4977_p0, %p4971_p11 }
  0x9f   :  { %4981 = shalt.err (!%p4978_p1)
}
  0xa0   :  { %146 = dma.hbm_to_vmem [thread:$0]  %s6284_s14, 1024, %s141_s23, [#allocation17], %s6296_s17, %s6296_s17, %s6295_s24  }
  0xa1   :  { %5004 = dma.done.wait [#allocation5], 256  }
  0xa2   :  { %5005 = vsyncadd [#allocation5], 4294967040 }
  0xa3   :  { %5006 = dma.done.wait [#allocation8], 768  }
  0xa4   :  { %5007 = vsyncadd [#allocation8], 4294966528 }
  0xa5   :  { %5008 = dma.done.wait [#allocation11], 768  }
  0xa6   :  { %5009 = vsyncadd [#allocation11], 4294966528 }
  0xa7   :  { %5010 = dma.done.wait [#allocation14], 2048  }
  0xa8   :  { %5011 = vsyncadd [#allocation14], 4294965248 }
  0xa9   :  { %5012 = dma.done.wait [#allocation17], 1280  }
  0xaa   :  { %5013 = vsyncadd [#allocation17], 4294966016  ;;  %v292_v0 = vld [vmem:[#allocation12] sm:$0xff]  ;;  %v293_v1 = vld [vmem:[#allocation12 + $0x8] sm:$0xff]  ;;  %vm210_vm0 = vcmask 261120   ;;  %v5029_v16 = vmov 0.0  }
  0xab   :  { %v294_v2 = vld [vmem:[#allocation12 + $0x10] sm:$0xff]  ;;  %v4496_v3 = vpack.c.bf16 %v293_v1, %v292_v0  ;;  %v295_v4 = vld [vmem:[#allocation12 + $0x18] sm:$0xff]  ;;  %v201_v10 = vld [vmem:[#allocation9 + $0x10] sm:$0xff]  ;;  %vm5030_vm1 = vmmov 0   ;;  %v5031_v19 = vmov 0   ;;  %vm562_vm3 = vcmask 261126  }
  0xac   :  { %v199_v5 = vld [vmem:[#allocation9] sm:$0xff]  ;;  %v200_v6 = vld [vmem:[#allocation9 + $0x8] sm:$0xff]  ;;  %v4500_v7 = vpack.c.bf16 %v295_v4, %v294_v2  ;;  %v202_v11 = vld [vmem:[#allocation9 + $0x18] sm:$0xff]  ;;  %vm560_vm5 = vcmask 254976   ;;  %vm752_vm6 = vcmask 259076   ;;  %vm750_vm7 = vcmask 257026  }
  0xad   :  { %v4488_v8 = vpack.c.bf16 %v200_v6, %v199_v5  ;;  %v177_v9 = vld [vmem:[#allocation4] sm:$0xff]  ;;  %4497 = vmatprep.subr.bf16.mxu1 %v4496_v3  ;;  %v4492_v12 = vpack.c.bf16 %v202_v11, %v201_v10  ;;  %v178_v13 = vld [vmem:[#allocation4 + $0x8] sm:$0xff]  ;;  %v5356_v5 = vld [vmem:[#allocation7 + $0x8] sm:$0xff]  ;;  %vm3850_vm8 = vcmask 517120   ;;  %s5035_s11 = smov [#allocation19]  }
  0xae   :  { %4163 = vmatprep.mubr.msk.f32.mxu1 %vm210_vm0, %v177_v9  ;;  %4499 = vmatpush3.bf16.msra.mxu1 %v4496_v3  ;;  %v5288_v14 = vld [vmem:[%s6276_s6] sm:$0xff]   ;;  %v5300_v17 = vld [vmem:[%s6276_s6 + $0x8] sm:$0xff]   ;;  %vm182_vm2 = vcmp.gt.f32.partialorder %v5356_v5, 0.5  ;;  %v5359_v6 = vld [vmem:[#allocation7] sm:$0xff] }
  0xaf   :  { %4489 = vmatprep.subr.bf16.mxu0 %v4488_v8  ;;  %4501 = vmatprep.subr.bf16.mxu1 %v4500_v7  ;;  %v5291_v15 = vld [vmem:[#allocation10] sm:$0xff]   ;;  %v5305_v18 = vld [vmem:[#allocation10 + $0x8] sm:$0xff]   ;;  %vm181_vm4 = vcmp.gt.f32.partialorder %v5359_v6, 0.5 }
  0xb0   :  { %4491 = vmatpush3.bf16.msra.mxu0 %v4488_v8  ;;  %4152 = vmatprep.mubr.msk.f32.mxu0 %vm210_vm0, %v177_v9  ;;  %v3886_v20 = vld [vmem:[%s6277_s7] ss:$0 sm:$0xff]  ;;  %s5033_s7 = smov 96  }
  0xb1   :  { %4493 = vmatprep.subr.bf16.mxu0 %v4492_v12  ;;  %v3883_v21 = vld [vmem:[%s6274_s4] ss:$0 sm:$0xff]  ;;  %s5032_s4 = smov 32  }
  0xb2   :  { %4503 = vmatpush3.bf16.msra.mxu1 %v4500_v7 }
  0xb3   :  { %4174 = vmatprep.subr.bf16.mxu1 %v5029_v16 }
  0xb4   :  { %4495 = vmatpush3.bf16.msra.mxu0 %v4492_v12 }
  0xb5   :  { %4166 = vmatprep.subr.bf16.mxu0 %v5029_v16  ;;  %4164 = vmatmul.mubr.msk.f32.vlgmr.msra.gmra.mrb[0].mxu1 %vm210_vm0, %v178_v13 }
  0xb6   :  { %4175 = vmatpush3.bf16.msra.mxu1 %v5288_v14  ;;  %4178 = vmatprep.mubr.msk.bf16.mxu1 %vm5030_vm1, %v5029_v16 }
  0xb7   :  { %4153 = vmatmul.mubr.msk.f32.vlgmr.msra.gmra.mrb[0].mxu0 %vm210_vm0, %v178_v13  ;;  %4176 = vmatprep.subr.bf16.mxu1 %v5029_v16 }
  0xb8   :  { %4167 = vmatpush3.bf16.msra.mxu0 %v5291_v15  ;;  %4170 = vmatprep.mubr.msk.bf16.mxu0 %vm5030_vm1, %v5029_v16 }
  0xb9   :  { %4168 = vmatprep.subr.bf16.mxu0 %v5029_v16 }
  0xba   :  { %4177 = vmatpush3.bf16.msra.mxu1 %v5300_v17 }
  0xbb   :  { %4190 = vmatprep.subr.bf16.mxu1 %v5029_v16 }
  0xbc   :  { %4169 = vmatpush3.bf16.msra.mxu0 %v5305_v18 }
  0xbd   :  { %4182 = vmatprep.subr.bf16.mxu0 %v5029_v16  ;;  %4179 = vmatmul.mubr.bf16.vlgmr.msra.gmra.mrb[4].mxu1 %v5031_v19 }
  0xbe   :  { %4191 = vmatpush3.bf16.msra.mxu1 %v5288_v14  ;;  %4194 = vmatprep.mubr.msk.bf16.mxu1 %vm5030_vm1, %v5029_v16 }
  0xbf   :  { %4171 = vmatmul.mubr.bf16.vlgmr.msra.gmra.mrb[4].mxu0 %v5031_v19  ;;  %4192 = vmatprep.subr.bf16.mxu1 %v5029_v16 }
  0xc0   :  { %4183 = vmatpush3.bf16.msra.mxu0 %v5291_v15  ;;  %4186 = vmatprep.mubr.msk.bf16.mxu0 %vm5030_vm1, %v5029_v16 }
  0xc1   :  { %4184 = vmatprep.subr.bf16.mxu0 %v5029_v16 }
  0xc2   :  { %4193 = vmatpush3.bf16.msra.mxu1 %v5300_v17 }
  0xc3   :  { %4206 = vmatprep.subr.bf16.mxu1 %v5029_v16 }
  0xc4   :  { %4185 = vmatpush3.bf16.msra.mxu0 %v5305_v18 }
  0xc5   :  { %4198 = vmatprep.subr.bf16.mxu0 %v5029_v16 }
 0x188   :  { %v4165_v22 = vpop.f32.mrb[0].mxu1 }
 0x189   :  { %v369_v23 = vpop.f32.mrb[1].mxu1  ;;  %v5342_v30 = vadd.f32 %v4165_v22, %v3886_v20 }
 0x18a   :  { %v4154_v24 = vpop.f32.mrb[0].mxu0  ;;  %v5336_v25 = vadd.f32 %v3886_v20, %v369_v23 }
 0x18b   :  { %v5338_v26 = vadd.f32 %v4154_v24, %v3883_v21  ;;  %v283_v27 = vpop.f32.mrb[1].mxu0 }
 0x18c   :  { %v5340_v28 = vadd.f32 %v3883_v21, %v283_v27 }
 0x190   :  { %v515_v29 = vpop.f32.mrb[4].mxu1 }
 0x191   :  { %v522_v31 = vrot.slane %v515_v29, 2  ;;  %v4180_v32 = vpop.f32.mrb[5].mxu1 }
 0x192   :  { %v427_v33 = vpop.f32.mrb[4].mxu0  ;;  %v518_v34 = vpop.f32.mrb[6].mxu1 }
 0x193   :  { %v433_v35 = vadd.f32 %v427_v33, %v5340_v28  ;;  %v4172_v36 = vpop.f32.mrb[5].mxu0  ;;  %v524_v37 = vadd.f32 %v522_v31, %v5342_v30  ;;  %v4181_v38 = vpop.f32.mrb[7].mxu1 }
 0x194   :  { %v430_v39 = vpop.f32.mrb[6].mxu0 }
 0x195   :  { %v3891_v40 = vmul.f32 -1.442695, %v433_v35  ;;  %v4173_v41 = vpop.f32.mrb[7].mxu0  ;;  %v3895_v42 = vmul.f32 -1.442695, %v524_v37 }
 0x197   :  { %4580 = vpow2.f32 %v3891_v40 }
 0x198   :  { %4582 = vpow2.f32 %v3895_v42 }
 0x1a1   :  { %v4581_v43 = vpop.eup %4580 }
 0x1a2   :  { %v4583_v44 = vpop.eup %4582  ;;  %v437_v45 = vadd.f32 1.0, %v4581_v43 }
 0x1a3   :  { %v528_v46 = vadd.f32 1.0, %v4583_v44 }
 0x1a4   :  { %4584 = vrcp.f32 %v437_v45 }
 0x1a5   :  { %4586 = vrcp.f32 %v528_v46 }
 0x1ae   :  { %v4585_v47 = vpop.eup %4584 }
 0x1af   :  { %v4587_v48 = vpop.eup %4586  ;;  %v440_v50 = vmul.f32 2.0, %v4585_v47  ;;  %v442_v60 = vmul.f32 0.0, %v4585_v47 }
 0x1b0   :  { %v531_v49 = vmul.f32 2.0, %v4587_v48  ;;  %v533_v57 = vmul.f32 0.0, %v4587_v48 }
 0x1b1   :  { %v3892_v52 = vadd.f32 -1.0, %v440_v50 }
 0x1b2   :  { %v3896_v51 = vadd.f32 -1.0, %v531_v49 }
 0x1b4   :  { %535 = vrot.lane.b32.xlu0 %v3896_v51, %s5020_s1 }
 0x1b8   :  { %444 = vrot.lane.b32.xlu0 %v3892_v52, %s5020_s1 }
 0x226   :  { %v536_v53 = vpop.permute.xlu0 %535 }
 0x227   :  { %v538_v54 = vmul.f32 %v4587_v48, %v536_v53 }
 0x229   :  { %540 = vrot.lane.b32.xlu1 %v538_v54, %s5032_s4 }
 0x22a   :  { %v445_v55 = vpop.permute.xlu0 %444 }
 0x22b   :  { %v447_v56 = vmul.f32 %v4585_v47, %v445_v55 }
 0x22d   :  { %449 = vrot.lane.b32.xlu1 %v447_v56, %s5032_s4 }
 0x29b   :  { %v541_v58 = vpop.permute.xlu1 %540 }
 0x29c   :  { %v543_v59 = vadd.f32 %v541_v58, %v533_v57 }
 0x29e   :  { %4588 = vtanh.f32 %v543_v59 }
 0x29f   :  { %v450_v61 = vpop.permute.xlu1 %449 }
 0x2a0   :  { %v452_v62 = vadd.f32 %v450_v61, %v442_v60 }
 0x2a2   :  { %4590 = vtanh.f32 %v452_v62 }
 0x2a8   :  { %v4589_v63 = vpop.eup %4588 }
 0x2a9   :  { %546 = vrot.lane.b32.xlu0 %v4589_v63, %s5020_s1 }
 0x2ac   :  { %v4591_v0 = vpop.eup %4590 }
 0x2ad   :  { %455 = vrot.lane.b32.xlu1 %v4591_v0, %s5020_s1 }
 0x31b   :  { %v547_v1 = vpop.permute.xlu0 %546 }
 0x31c   :  { %v549_v2 = vmul.f32 %v4587_v48, %v547_v1 }
 0x31e   :  { %551 = vrot.lane.b32.xlu0 %v549_v2, %s5032_s4 }
 0x31f   :  { %v456_v3 = vpop.permute.xlu1 %455 }
 0x320   :  { %v458_v4 = vmul.f32 %v4585_v47, %v456_v3 }
 0x322   :  { %460 = vrot.lane.b32.xlu1 %v458_v4, %s5032_s4  ;;  %556 = vrot.lane.b32.xlu0 %v543_v59, %s5033_s7 }
 0x326   :  { %465 = vrot.lane.b32.xlu0 %v452_v62, %s5033_s7 }
 0x390   :  { %v552_v7 = vpop.permute.xlu0 %551 }
 0x391   :  { %v5363_v8 = vsel %vm182_vm2, %v552_v7, 0.0 }
 0x392   :  { %563 = vst.msk [vmem:[#allocation3 + $0x8] sm:$0xc0] %vm562_vm3, %v5363_v8  ;;  %v656_v9 = vpack.c.bf16 %v5363_v8, %v5363_v8 }
 0x394   :  { %v658_v10 = vrot.slane %v656_v9, 3  ;;  %v461_v11 = vpop.permute.xlu1 %460  ;;  %v557_v12 = vpop.permute.xlu0 %556 }
 0x395   :  { %v5372_v13 = vsel %vm181_vm4, %v461_v11, 0.0  ;;  %v5376_v20 = vsel %vm182_vm2, %v557_v12, 0.0  ;;  %v741_v11 = vrot.slane %v5363_v8, 2 }
 0x396   :  { %561 = vst.msk [vmem:[#allocation2] sm:$0x3] %vm560_vm5, %v5372_v13  ;;  %v564_v21 = vpack.c.bf16 %v5372_v13, %v5372_v13  ;;  %v715_v22 = vrot.slane %v5376_v20, 2  ;;  %4195 = vmatmul.mubr.msk.bf16.vlgmr.msra.gmra.mrb[8].mxu1 %vm210_vm0, %v658_v10 }
 0x397   :  { %4207 = vmatpush3.bf16.msra.mxu1 %v5288_v14  ;;  %4210 = vmatprep.mubr.msk.bf16.mxu1 %vm5030_vm1, %v5029_v16 }
 0x398   :  { %4187 = vmatmul.mubr.msk.bf16.vlgmr.msra.gmra.mrb[8].mxu0 %vm210_vm0, %v564_v21  ;;  %716 = vrot.lane.b32.xlu0 %v715_v22, %s5032_s4  ;;  %v466_v23 = vpop.permute.xlu0 %465 }
 0x399   :  { %v5393_v24 = vsel %vm181_vm4, %v466_v23, 0.0  ;;  %4208 = vmatprep.subr.bf16.mxu1 %v5029_v16  ;;  %4199 = vmatpush3.bf16.msra.mxu0 %v5291_v15 }
 0x39a   :  { %v621_v27 = vrot.slane %v5393_v24, 6  ;;  %4200 = vmatprep.subr.bf16.mxu0 %v5029_v16  ;;  %4202 = vmatprep.mubr.msk.bf16.mxu0 %vm5030_vm1, %v5029_v16 }
 0x39b   :  { %4209 = vmatpush3.bf16.msra.mxu1 %v5300_v17 }
 0x39c   :  { %622 = vrot.lane.b32.xlu0 %v621_v27, %s5032_s4  ;;  %4222 = vmatprep.subr.bf16.mxu1 %v5029_v16 }
 0x39d   :  { %4201 = vmatpush3.bf16.msra.mxu0 %v5305_v18 }
 0x39e   :  { %4214 = vmatprep.subr.bf16.mxu0 %v5029_v16 }
 0x40a   :  { %v717_v58 = vpop.permute.xlu0 %716 }
 0x40e   :  { %v623_v62 = vpop.permute.xlu0 %622 }
 0x469   :  { %v696_v29 = vpop.f32.mrb[8].mxu1 }
 0x46a   :  { %v703_v31 = vrot.slane %v696_v29, 4  ;;  %v4196_v32 = vpop.f32.mrb[9].mxu1  ;;  %v647_v29 = vrot.slane %v5372_v13, 6 }
 0x46b   :  { %v602_v33 = vpop.f32.mrb[8].mxu0  ;;  %v699_v34 = vpop.f32.mrb[10].mxu1 }
 0x46c   :  { %v705_v35 = vadd.f32 %v703_v31, %v5342_v30  ;;  %v609_v36 = vrot.slane %v602_v33, 6  ;;  %v4188_v37 = vpop.f32.mrb[9].mxu0  ;;  %v4197_v38 = vpop.f32.mrb[11].mxu1 }
 0x46d   :  { %v605_v39 = vpop.f32.mrb[10].mxu0 }
 0x46e   :  { %v3901_v40 = vmul.f32 -1.442695, %v705_v35  ;;  %v611_v41 = vadd.f32 %v609_v36, %v5340_v28  ;;  %v4189_v42 = vpop.f32.mrb[11].mxu0 }
 0x470   :  { %4592 = vpow2.f32 %v3901_v40  ;;  %v3898_v43 = vmul.f32 -1.442695, %v611_v41 }
 0x472   :  { %4594 = vpow2.f32 %v3898_v43 }
 0x47a   :  { %v4593_v44 = vpop.eup %4592 }
 0x47b   :  { %v709_v45 = vadd.f32 1.0, %v4593_v44 }
 0x47c   :  { %v4595_v46 = vpop.eup %4594 }
 0x47d   :  { %4596 = vrcp.f32 %v709_v45  ;;  %v615_v47 = vadd.f32 1.0, %v4595_v46 }
 0x47f   :  { %4598 = vrcp.f32 %v615_v47 }
 0x487   :  { %v4597_v48 = vpop.eup %4596 }
 0x488   :  { %v712_v49 = vmul.f32 2.0, %v4597_v48  ;;  %v719_v59 = vmul.f32 %v4597_v48, %v717_v58 }
 0x489   :  { %v4599_v50 = vpop.eup %4598 }
 0x48a   :  { %v3902_v51 = vadd.f32 -1.0, %v712_v49  ;;  %v618_v52 = vmul.f32 2.0, %v4599_v50  ;;  %v625_v63 = vmul.f32 %v4599_v50, %v623_v62 }
 0x48c   :  { %721 = vrot.lane.b32.xlu1 %v3902_v51, %s5020_s1  ;;  %v3899_v53 = vadd.f32 -1.0, %v618_v52 }
 0x490   :  { %627 = vrot.lane.b32.xlu1 %v3899_v53, %s5020_s1 }
 0x4fe   :  { %v722_v54 = vpop.permute.xlu1 %721 }
 0x4ff   :  { %v724_v55 = vmul.f32 %v4597_v48, %v722_v54 }
 0x501   :  { %726 = vrot.lane.b32.xlu1 %v724_v55, %s5032_s4 }
 0x502   :  { %v628_v56 = vpop.permute.xlu1 %627 }
 0x503   :  { %v630_v57 = vmul.f32 %v4599_v50, %v628_v56 }
 0x505   :  { %632 = vrot.lane.b32.xlu1 %v630_v57, %s5032_s4 }
 0x573   :  { %v727_v60 = vpop.permute.xlu1 %726 }
 0x574   :  { %v729_v61 = vadd.f32 %v727_v60, %v719_v59 }
 0x576   :  { %4600 = vtanh.f32 %v729_v61 }
 0x577   :  { %v633_v0 = vpop.permute.xlu1 %632 }
 0x578   :  { %v635_v1 = vadd.f32 %v633_v0, %v625_v63 }
 0x57a   :  { %4602 = vtanh.f32 %v635_v1 }
 0x580   :  { %v4601_v2 = vpop.eup %4600 }
 0x581   :  { %732 = vrot.lane.b32.xlu0 %v4601_v2, %s5020_s1 }
 0x584   :  { %v4603_v3 = vpop.eup %4602 }
 0x585   :  { %638 = vrot.lane.b32.xlu1 %v4603_v3, %s5020_s1 }
 0x5f3   :  { %v733_v4 = vpop.permute.xlu0 %732 }
 0x5f4   :  { %v735_v7 = vmul.f32 %v4597_v48, %v733_v4 }
 0x5f6   :  { %737 = vrot.lane.b32.xlu0 %v735_v7, %s5032_s4 }
 0x5f7   :  { %v639_v9 = vpop.permute.xlu1 %638 }
 0x5f8   :  { %v641_v10 = vmul.f32 %v4599_v50, %v639_v9 }
 0x5fa   :  { %643 = vrot.lane.b32.xlu1 %v641_v10, %s5032_s4  ;;  %745 = vrot.lane.b32.xlu0 %v729_v61, %s5033_s7 }
 0x5fe   :  { %651 = vrot.lane.b32.xlu0 %v635_v1, %s5033_s7 }
 0x668   :  { %v738_v12 = vpop.permute.xlu0 %737 }
 0x669   :  { %v5423_v21 = vsel %vm182_vm2, %v738_v12, %v741_v11 }
 0x66a   :  { %753 = vst.msk [vmem:[#allocation3 + $0x8] sm:$0x30] %vm752_vm6, %v5423_v21  ;;  %v848_v23 = vpack.c.bf16 %v5423_v21, %v5423_v21 }
 0x66c   :  { %v850_v31 = vrot.slane %v848_v23, 2  ;;  %v644_v32 = vpop.permute.xlu1 %643  ;;  %v746_v33 = vpop.permute.xlu0 %745 }
 0x66d   :  { %v5432_v8 = vsel %vm181_vm4, %v644_v32, %v647_v29  ;;  %v5438_v34 = vsel %vm182_vm2, %v746_v33, %v715_v22  ;;  %v933_v33 = vrot.slane %v5423_v21, 2 }
 0x66e   :  { %751 = vst.msk [vmem:[#allocation2] sm:$0xc] %vm750_vm7, %v5432_v8  ;;  %v754_v13 = vpack.c.bf16 %v5432_v8, %v5432_v8  ;;  %v907_v35 = vrot.slane %v5438_v34, 2  ;;  %4211 = vmatmul.mubr.msk.bf16.vlgmr.msra.gmra.mrb[12].mxu1 %vm210_vm0, %v850_v31 }
 0x66f   :  { %4223 = vmatpush3.bf16.msra.mxu1 %v5288_v14  ;;  %4226 = vmatprep.mubr.msk.bf16.mxu1 %vm5030_vm1, %v5029_v16 }
 0x670   :  { %v756_v20 = vrot.slane %v754_v13, 1  ;;  %908 = vrot.lane.b32.xlu0 %v907_v35, %s5032_s4  ;;  %v652_v22 = vpop.permute.xlu0 %651  ;;  %4224 = vmatprep.subr.bf16.mxu1 %v5029_v16 }
 0x671   :  { %v5457_v36 = vsel %vm181_vm4, %v652_v22, %v621_v27 }
 0x672   :  { %v813_v37 = vrot.slane %v5457_v36, 6  ;;  %4203 = vmatmul.mubr.msk.bf16.vlgmr.msra.gmra.mrb[12].mxu0 %vm210_vm0, %v756_v20 }
 0x673   :  { %4225 = vmatpush3.bf16.msra.mxu1 %v5300_v17  ;;  %4215 = vmatpush3.bf16.msra.mxu0 %v5291_v15 }
 0x674   :  { %814 = vrot.lane.b32.xlu0 %v813_v37, %s5032_s4  ;;  %4216 = vmatprep.subr.bf16.mxu0 %v5029_v16 }
 0x675   :  { %4218 = vmatprep.mubr.msk.bf16.mxu0 %vm5030_vm1, %v5029_v16  ;;  %4238 = vmatprep.subr.bf16.mxu1 %v5029_v16 }
 0x677   :  { %4217 = vmatpush3.bf16.msra.mxu0 %v5305_v18 }
 0x678   :  { %4230 = vmatprep.subr.bf16.mxu0 %v5029_v16 }
 0x6e2   :  { %v909_v0 = vpop.permute.xlu0 %908 }
 0x6e6   :  { %v815_v4 = vpop.permute.xlu0 %814 }
 0x741   :  { %v888_v24 = vpop.f32.mrb[12].mxu1 }
 0x742   :  { %v895_v27 = vrot.slane %v888_v24, 6  ;;  %v4212_v38 = vpop.f32.mrb[13].mxu1  ;;  %v839_v24 = vrot.slane %v5432_v8, 6 }
 0x743   :  { %v891_v39 = vpop.f32.mrb[14].mxu1 }
 0x744   :  { %v897_v40 = vadd.f32 %v895_v27, %v5342_v30  ;;  %v4213_v41 = vpop.f32.mrb[15].mxu1 }
 0x745   :  { %v794_v42 = vpop.f32.mrb[12].mxu0 }
 0x746   :  { %v3907_v43 = vmul.f32 -1.442695, %v897_v40  ;;  %v801_v44 = vrot.slane %v794_v42, 4  ;;  %v4204_v45 = vpop.f32.mrb[13].mxu0 }
 0x747   :  { %v797_v46 = vpop.f32.mrb[14].mxu0 }
 0x748   :  { %4604 = vpow2.f32 %v3907_v43  ;;  %v803_v47 = vadd.f32 %v801_v44, %v5340_v28  ;;  %v4205_v48 = vpop.f32.mrb[15].mxu0 }
 0x74a   :  { %v3904_v49 = vmul.f32 -1.442695, %v803_v47 }
 0x74c   :  { %4606 = vpow2.f32 %v3904_v49 }
 0x752   :  { %v4605_v50 = vpop.eup %4604 }
 0x753   :  { %v901_v51 = vadd.f32 1.0, %v4605_v50 }
 0x755   :  { %4608 = vrcp.f32 %v901_v51 }
 0x756   :  { %v4607_v52 = vpop.eup %4606 }
 0x757   :  { %v807_v53 = vadd.f32 1.0, %v4607_v52 }
 0x759   :  { %4610 = vrcp.f32 %v807_v53 }
 0x75f   :  { %v4609_v54 = vpop.eup %4608 }
 0x760   :  { %v904_v55 = vmul.f32 2.0, %v4609_v54  ;;  %v911_v1 = vmul.f32 %v4609_v54, %v909_v0 }
 0x762   :  { %v3908_v56 = vadd.f32 -1.0, %v904_v55 }
 0x763   :  { %v4611_v57 = vpop.eup %4610 }
 0x764   :  { %913 = vrot.lane.b32.xlu1 %v3908_v56, %s5020_s1  ;;  %v810_v58 = vmul.f32 2.0, %v4611_v57  ;;  %v817_v7 = vmul.f32 %v4611_v57, %v815_v4 }
 0x766   :  { %v3905_v59 = vadd.f32 -1.0, %v810_v58 }
 0x768   :  { %819 = vrot.lane.b32.xlu1 %v3905_v59, %s5020_s1 }
 0x7d6   :  { %v914_v60 = vpop.permute.xlu1 %913 }
 0x7d7   :  { %v916_v61 = vmul.f32 %v4609_v54, %v914_v60 }
 0x7d9   :  { %918 = vrot.lane.b32.xlu1 %v916_v61, %s5032_s4 }
 0x7da   :  { %v820_v62 = vpop.permute.xlu1 %819 }
 0x7db   :  { %v822_v63 = vmul.f32 %v4611_v57, %v820_v62 }
 0x7dd   :  { %824 = vrot.lane.b32.xlu1 %v822_v63, %s5032_s4 }
 0x84b   :  { %v919_v2 = vpop.permute.xlu1 %918 }
 0x84c   :  { %v921_v3 = vadd.f32 %v919_v2, %v911_v1 }
 0x84e   :  { %4612 = vtanh.f32 %v921_v3 }
 0x84f   :  { %v825_v9 = vpop.permute.xlu1 %824 }
 0x850   :  { %v827_v10 = vadd.f32 %v825_v9, %v817_v7 }
 0x852   :  { %4614 = vtanh.f32 %v827_v10 }
 0x858   :  { %v4613_v11 = vpop.eup %4612 }
 0x859   :  { %924 = vrot.lane.b32.xlu0 %v4613_v11, %s5020_s1 }
 0x85c   :  { %v4615_v12 = vpop.eup %4614 }
 0x85d   :  { %830 = vrot.lane.b32.xlu1 %v4615_v12, %s5020_s1 }
 0x8cb   :  { %v925_v23 = vpop.permute.xlu0 %924 }
 0x8cc   :  { %v927_v29 = vmul.f32 %v4609_v54, %v925_v23 }
 0x8ce   :  { %929 = vrot.lane.b32.xlu0 %v927_v29, %s5032_s4 }
 0x8cf   :  { %v831_v31 = vpop.permute.xlu1 %830 }
 0x8d0   :  { %v833_v32 = vmul.f32 %v4611_v57, %v831_v31 }
 0x8d2   :  { %835 = vrot.lane.b32.xlu1 %v833_v32, %s5032_s4  ;;  %937 = vrot.lane.b32.xlu0 %v921_v3, %s5033_s7 }
 0x8d6   :  { %843 = vrot.lane.b32.xlu0 %v827_v10, %s5033_s7 }
 0x940   :  { %v930_v13 = vpop.permute.xlu0 %929 }
 0x941   :  { %v5487_v20 = vsel %vm182_vm2, %v930_v13, %v933_v33 }
 0x942   :  { %943 = vst.msk [vmem:[#allocation3 + $0x8] sm:$0xc] %vm750_vm7, %v5487_v20  ;;  %v1038_v22 = vpack.c.bf16 %v5487_v20, %v5487_v20 }
 0x944   :  { %v1040_v27 = vrot.slane %v1038_v22, 1  ;;  %v836_v38 = vpop.permute.xlu1 %835  ;;  %v938_v39 = vpop.permute.xlu0 %937 }
 0x945   :  { %v5496_v40 = vsel %vm181_vm4, %v836_v38, %v839_v24  ;;  %v5502_v21 = vsel %vm182_vm2, %v938_v39, %v907_v35  ;;  %v1120_v24 = vrot.slane %v5487_v20, 2 }
 0x946   :  { %942 = vst.msk [vmem:[#allocation2] sm:$0x30] %vm752_vm6, %v5496_v40  ;;  %v944_v41 = vpack.c.bf16 %v5496_v40, %v5496_v40  ;;  %v1094_v8 = vrot.slane %v5502_v21, 2  ;;  %4227 = vmatmul.mubr.msk.bf16.vlgmr.msra.gmra.mrb[16].mxu1 %vm210_vm0, %v1040_v27 }
 0x947   :  { %4239 = vmatpush3.bf16.msra.mxu1 %v5288_v14  ;;  %4242 = vmatprep.mubr.msk.bf16.mxu1 %vm5030_vm1, %v5029_v16 }
 0x948   :  { %v946_v34 = vrot.slane %v944_v41, 2  ;;  %1095 = vrot.lane.b32.xlu0 %v1094_v8, %s5032_s4  ;;  %v844_v35 = vpop.permute.xlu0 %843  ;;  %4240 = vmatprep.subr.bf16.mxu1 %v5029_v16 }
 0x949   :  { %v5521_v42 = vsel %vm181_vm4, %v844_v35, %v813_v37 }
 0x94a   :  { %v1003_v43 = vrot.slane %v5521_v42, 6  ;;  %4219 = vmatmul.mubr.msk.bf16.vlgmr.msra.gmra.mrb[16].mxu0 %vm210_vm0, %v946_v34  ;;  %v1029_v34 = vrot.slane %v5496_v40, 6 }
 0x94b   :  { %4241 = vmatpush3.bf16.msra.mxu1 %v5300_v17  ;;  %4231 = vmatpush3.bf16.msra.mxu0 %v5291_v15 }
 0x94c   :  { %1004 = vrot.lane.b32.xlu0 %v1003_v43, %s5032_s4  ;;  %4232 = vmatprep.subr.bf16.mxu0 %v5029_v16 }
 0x94d   :  { %4234 = vmatprep.mubr.msk.bf16.mxu0 %vm5030_vm1, %v5029_v16  ;;  %4254 = vmatprep.subr.bf16.mxu1 %v5029_v16 }
 0x94f   :  { %4233 = vmatpush3.bf16.msra.mxu0 %v5305_v18 }
 0x950   :  { %4246 = vmatprep.subr.bf16.mxu0 %v5029_v16 }
 0x9ba   :  { %v1096_v3 = vpop.permute.xlu0 %1095 }
 0x9be   :  { %v1005_v10 = vpop.permute.xlu0 %1004 }
 0xa19   :  { %v1078_v36 = vpop.f32.mrb[16].mxu1 }
 0xa1a   :  { %v1084_v37 = vadd.f32 %v1078_v36, %v5342_v30  ;;  %v4228_v44 = vpop.f32.mrb[17].mxu1 }
 0xa1b   :  { %v1081_v45 = vpop.f32.mrb[18].mxu1 }
 0xa1c   :  { %v3913_v46 = vmul.f32 -1.442695, %v1084_v37  ;;  %v4229_v47 = vpop.f32.mrb[19].mxu1 }
 0xa1d   :  { %v984_v48 = vpop.f32.mrb[16].mxu0 }
 0xa1e   :  { %4616 = vpow2.f32 %v3913_v46  ;;  %v991_v49 = vrot.slane %v984_v48, 2  ;;  %v4220_v50 = vpop.f32.mrb[17].mxu0 }
 0xa1f   :  { %v987_v51 = vpop.f32.mrb[18].mxu0 }
 0xa20   :  { %v993_v52 = vadd.f32 %v991_v49, %v5340_v28  ;;  %v4221_v53 = vpop.f32.mrb[19].mxu0 }
 0xa22   :  { %v3910_v54 = vmul.f32 -1.442695, %v993_v52 }
 0xa24   :  { %4618 = vpow2.f32 %v3910_v54 }
 0xa28   :  { %v4617_v55 = vpop.eup %4616 }
 0xa29   :  { %v1088_v56 = vadd.f32 1.0, %v4617_v55 }
 0xa2b   :  { %4620 = vrcp.f32 %v1088_v56 }
 0xa2e   :  { %v4619_v57 = vpop.eup %4618 }
 0xa2f   :  { %v997_v58 = vadd.f32 1.0, %v4619_v57 }
 0xa31   :  { %4622 = vrcp.f32 %v997_v58 }
 0xa35   :  { %v4621_v30 = vpop.eup %4620 }
 0xa36   :  { %v1091_v59 = vmul.f32 2.0, %v4621_v30  ;;  %v1098_v4 = vmul.f32 %v4621_v30, %v1096_v3 }
 0xa38   :  { %v3914_v60 = vadd.f32 -1.0, %v1091_v59 }
 0xa3a   :  { %1100 = vrot.lane.b32.xlu1 %v3914_v60, %s5020_s1 }
 0xa3b   :  { %v4623_v61 = vpop.eup %4622 }
 0xa3c   :  { %v1000_v62 = vmul.f32 2.0, %v4623_v61  ;;  %v1007_v11 = vmul.f32 %v4623_v61, %v1005_v10 }
 0xa3e   :  { %v3911_v63 = vadd.f32 -1.0, %v1000_v62 }
 0xa40   :  { %1009 = vrot.lane.b32.xlu1 %v3911_v63, %s5020_s1 }
 0xaac   :  { %v1101_v28 = vpop.permute.xlu1 %1100 }
 0xaad   :  { %v1103_v0 = vmul.f32 %v4621_v30, %v1101_v28 }
 0xaaf   :  { %1105 = vrot.lane.b32.xlu1 %v1103_v0, %s5032_s4 }
 0xab2   :  { %v1010_v1 = vpop.permute.xlu1 %1009 }
 0xab3   :  { %v1012_v2 = vmul.f32 %v4623_v61, %v1010_v1 }
 0xab5   :  { %1014 = vrot.lane.b32.xlu1 %v1012_v2, %s5032_s4 }
 0xb21   :  { %v1106_v7 = vpop.permute.xlu1 %1105 }
 0xb22   :  { %v1108_v9 = vadd.f32 %v1106_v7, %v1098_v4 }
 0xb24   :  { %4624 = vtanh.f32 %v1108_v9 }
 0xb27   :  { %v1015_v12 = vpop.permute.xlu1 %1014 }
 0xb28   :  { %v1017_v23 = vadd.f32 %v1015_v12, %v1007_v11 }
 0xb2a   :  { %4626 = vtanh.f32 %v1017_v23 }
 0xb2e   :  { %v4625_v29 = vpop.eup %4624 }
 0xb2f   :  { %1111 = vrot.lane.b32.xlu0 %v4625_v29, %s5020_s1 }
 0xb34   :  { %v4627_v31 = vpop.eup %4626 }
 0xb35   :  { %1020 = vrot.lane.b32.xlu1 %v4627_v31, %s5020_s1 }
 0xba1   :  { %v1112_v32 = vpop.permute.xlu0 %1111 }
 0xba2   :  { %v1114_v33 = vmul.f32 %v4621_v30, %v1112_v32 }
 0xba4   :  { %1116 = vrot.lane.b32.xlu0 %v1114_v33, %s5032_s4 }
 0xba7   :  { %v1021_v13 = vpop.permute.xlu1 %1020 }
 0xba8   :  { %v1023_v22 = vmul.f32 %v4623_v61, %v1021_v13  ;;  %1124 = vrot.lane.b32.xlu0 %v1108_v9, %s5033_s7 }
 0xbaa   :  { %1025 = vrot.lane.b32.xlu1 %v1023_v22, %s5032_s4 }
 0xbac   :  { %1033 = vrot.lane.b32.xlu0 %v1017_v23, %s5033_s7 }
 0xc16   :  { %v1117_v27 = vpop.permute.xlu0 %1116 }
 0xc17   :  { %v5551_v38 = vsel %vm182_vm2, %v1117_v27, %v1120_v24 }
 0xc18   :  { %1130 = vst.msk [vmem:[#allocation3 + $0x8] sm:$0x3] %vm560_vm5, %v5551_v38  ;;  %v1222_v39 = vpack.c.bf16 %v5551_v38, %v5551_v38 }
 0xc1a   :  { %4243 = vmatmul.mubr.msk.bf16.vlgmr.msra.gmra.mrb[20].mxu1 %vm210_vm0, %v1222_v39  ;;  %v1125_v41 = vpop.permute.xlu0 %1124  ;;  %v1305_v39 = vrot.slane %v5551_v38, 2 }
 0xc1b   :  { %v5563_v20 = vsel %vm182_vm2, %v1125_v41, %v1094_v8  ;;  %4255 = vmatpush3.bf16.msra.mxu1 %v5288_v14  ;;  %4258 = vmatprep.mubr.msk.bf16.mxu1 %vm5030_vm1, %v5029_v16 }
 0xc1c   :  { %v1279_v35 = vrot.slane %v5563_v20, 2  ;;  %v1026_v36 = vpop.permute.xlu1 %1025  ;;  %4256 = vmatprep.subr.bf16.mxu1 %v5029_v16 }
 0xc1d   :  { %v5572_v37 = vsel %vm181_vm4, %v1026_v36, %v1029_v34 }
 0xc1e   :  { %1129 = vst.msk [vmem:[#allocation2] sm:$0xc0] %vm562_vm3, %v5572_v37  ;;  %v1131_v40 = vpack.c.bf16 %v5572_v37, %v5572_v37  ;;  %1280 = vrot.lane.b32.xlu0 %v1279_v35, %s5032_s4  ;;  %v1034_v21 = vpop.permute.xlu0 %1033 }
 0xc1f   :  { %v5585_v8 = vsel %vm181_vm4, %v1034_v21, %v1003_v43  ;;  %4257 = vmatpush3.bf16.msra.mxu1 %v5300_v17 }
 0xc20   :  { %v1133_v44 = vrot.slane %v1131_v40, 3  ;;  %v1187_v45 = vrot.slane %v5585_v8, 6  ;;  %4270 = vmatprep.subr.bf16.mxu1 %v5029_v16 }
 0xc22   :  { %4235 = vmatmul.mubr.msk.bf16.vlgmr.msra.gmra.mrb[20].mxu0 %vm210_vm0, %v1133_v44  ;;  %1188 = vrot.lane.b32.xlu0 %v1187_v45, %s5032_s4  ;;  %v1213_v44 = vrot.slane %v5572_v37, 6 }
 0xc23   :  { %4247 = vmatpush3.bf16.msra.mxu0 %v5291_v15  ;;  %4250 = vmatprep.mubr.msk.bf16.mxu0 %vm5030_vm1, %v5029_v16 }
 0xc24   :  { %4248 = vmatprep.subr.bf16.mxu0 %v5029_v16 }
 0xc27   :  { %4249 = vmatpush3.bf16.msra.mxu0 %v5305_v18 }
 0xc28   :  { %4262 = vmatprep.subr.bf16.mxu0 %v5029_v16 }
 0xc90   :  { %v1281_v7 = vpop.permute.xlu0 %1280 }
 0xc94   :  { %v1189_v12 = vpop.permute.xlu0 %1188 }
 0xced   :  { %v1260_v42 = vpop.f32.mrb[20].mxu1 }
 0xcee   :  { %v1267_v43 = vrot.slane %v1260_v42, 2  ;;  %v4244_v46 = vpop.f32.mrb[21].mxu1 }
 0xcef   :  { %v1263_v47 = vpop.f32.mrb[22].mxu1 }
 0xcf0   :  { %v1269_v48 = vadd.f32 %v1267_v43, %v5336_v25  ;;  %v4245_v49 = vpop.f32.mrb[23].mxu1 }
 0xcf2   :  { %v3919_v50 = vmul.f32 -1.442695, %v1269_v48 }
 0xcf4   :  { %4628 = vpow2.f32 %v3919_v50 }
 0xcf5   :  { %v1171_v51 = vpop.f32.mrb[20].mxu0 }
 0xcf6   :  { %v1177_v52 = vadd.f32 %v1171_v51, %v5338_v26  ;;  %v4236_v53 = vpop.f32.mrb[21].mxu0 }
 0xcf7   :  { %v1174_v54 = vpop.f32.mrb[22].mxu0 }
 0xcf8   :  { %v3916_v55 = vmul.f32 -1.442695, %v1177_v52  ;;  %v4237_v56 = vpop.f32.mrb[23].mxu0 }
 0xcfa   :  { %4630 = vpow2.f32 %v3916_v55 }
 0xcfe   :  { %v4629_v57 = vpop.eup %4628 }
 0xcff   :  { %v1273_v58 = vadd.f32 1.0, %v4629_v57 }
 0xd01   :  { %4632 = vrcp.f32 %v1273_v58 }
 0xd04   :  { %v4631_v30 = vpop.eup %4630 }
 0xd05   :  { %v1181_v59 = vadd.f32 1.0, %v4631_v30 }
 0xd07   :  { %4634 = vrcp.f32 %v1181_v59 }
 0xd0b   :  { %v4633_v60 = vpop.eup %4632 }
 0xd0c   :  { %v1276_v61 = vmul.f32 2.0, %v4633_v60  ;;  %v1283_v9 = vmul.f32 %v4633_v60, %v1281_v7 }
 0xd0e   :  { %v3920_v62 = vadd.f32 -1.0, %v1276_v61 }
 0xd10   :  { %1285 = vrot.lane.b32.xlu1 %v3920_v62, %s5020_s1 }
 0xd11   :  { %v4635_v63 = vpop.eup %4634 }
 0xd12   :  { %v1184_v28 = vmul.f32 2.0, %v4635_v63  ;;  %v1191_v23 = vmul.f32 %v4635_v63, %v1189_v12 }
 0xd14   :  { %v3917_v0 = vadd.f32 -1.0, %v1184_v28 }
 0xd16   :  { %1193 = vrot.lane.b32.xlu1 %v3917_v0, %s5020_s1 }
 0xd82   :  { %v1286_v1 = vpop.permute.xlu1 %1285 }
 0xd83   :  { %v1288_v2 = vmul.f32 %v4633_v60, %v1286_v1 }
 0xd85   :  { %1290 = vrot.lane.b32.xlu1 %v1288_v2, %s5032_s4 }
 0xd88   :  { %v1194_v3 = vpop.permute.xlu1 %1193 }
 0xd89   :  { %v1196_v4 = vmul.f32 %v4635_v63, %v1194_v3 }
 0xd8b   :  { %1198 = vrot.lane.b32.xlu1 %v1196_v4, %s5032_s4 }
 0xdf7   :  { %v1291_v10 = vpop.permute.xlu1 %1290 }
 0xdf8   :  { %v1293_v11 = vadd.f32 %v1291_v10, %v1283_v9 }
 0xdfa   :  { %4636 = vtanh.f32 %v1293_v11 }
 0xdfd   :  { %v1199_v29 = vpop.permute.xlu1 %1198 }
 0xdfe   :  { %v1201_v31 = vadd.f32 %v1199_v29, %v1191_v23 }
 0xe00   :  { %4638 = vtanh.f32 %v1201_v31 }
 0xe04   :  { %v4637_v32 = vpop.eup %4636 }
 0xe05   :  { %1296 = vrot.lane.b32.xlu0 %v4637_v32, %s5020_s1 }
 0xe0a   :  { %v4639_v33 = vpop.eup %4638 }
 0xe0b   :  { %1204 = vrot.lane.b32.xlu1 %v4639_v33, %s5020_s1 }
 0xe77   :  { %v1297_v13 = vpop.permute.xlu0 %1296 }
 0xe78   :  { %v1299_v22 = vmul.f32 %v4633_v60, %v1297_v13 }
 0xe7a   :  { %1301 = vrot.lane.b32.xlu0 %v1299_v22, %s5032_s4 }
 0xe7d   :  { %v1205_v24 = vpop.permute.xlu1 %1204 }
 0xe7e   :  { %v1207_v27 = vmul.f32 %v4635_v63, %v1205_v24  ;;  %1309 = vrot.lane.b32.xlu0 %v1293_v11, %s5033_s7 }
 0xe80   :  { %1209 = vrot.lane.b32.xlu1 %v1207_v27, %s5032_s4 }
 0xe82   :  { %1217 = vrot.lane.b32.xlu0 %v1201_v31, %s5033_s7 }
 0xeec   :  { %v1302_v41 = vpop.permute.xlu0 %1301 }
 0xeed   :  { %v5615_v34 = vsel %vm181_vm4, %v1302_v41, %v1305_v39 }
 0xeee   :  { %1315 = vst.msk [vmem:[#allocation3] sm:$0xc0] %vm562_vm3, %v5615_v34  ;;  %v1408_v36 = vpack.c.bf16 %v5615_v34, %v5615_v34  ;;  %v1493_v27 = vrot.slane %v5615_v34, 2 }
 0xef0   :  { %v1410_v40 = vrot.slane %v1408_v36, 3  ;;  %v1310_v21 = vpop.permute.xlu0 %1309 }
 0xef1   :  { %v5626_v38 = vsel %vm181_vm4, %v1310_v21, %v1279_v35 }
 0xef2   :  { %v1467_v42 = vrot.slane %v5626_v38, 2  ;;  %v1210_v43 = vpop.permute.xlu1 %1209  ;;  %4259 = vmatmul.mubr.msk.bf16.vlgmr.msra.gmra.mrb[24].mxu1 %vm210_vm0, %v1410_v40 }
 0xef3   :  { %v5632_v46 = vsel %vm182_vm2, %v1210_v43, %v1213_v44  ;;  %4271 = vmatpush3.bf16.msra.mxu1 %v5288_v14  ;;  %4274 = vmatprep.mubr.msk.bf16.mxu1 %vm5030_vm1, %v5029_v16 }
 0xef4   :  { %1314 = vst.msk [vmem:[#allocation2 + $0x8] sm:$0x3] %vm560_vm5, %v5632_v46  ;;  %v1316_v20 = vpack.c.bf16 %v5632_v46, %v5632_v46  ;;  %1468 = vrot.lane.b32.xlu0 %v1467_v42, %s5032_s4  ;;  %v1218_v35 = vpop.permute.xlu0 %1217  ;;  %4272 = vmatprep.subr.bf16.mxu1 %v5029_v16  ;;  %v1399_v40 = vrot.slane %v5632_v46, 6 }
 0xef5   :  { %v5649_v14 = vsel %vm182_vm2, %v1218_v35, %v1187_v45 }
 0xef6   :  { %v1373_v37 = vrot.slane %v5649_v14, 6  ;;  %4251 = vmatmul.mubr.msk.bf16.vlgmr.msra.gmra.mrb[24].mxu0 %vm210_vm0, %v1316_v20  ;;  %v4779_v14 = vld [vmem:[#allocation10 + $0x8] sm:$0xff]  }
 0xef7   :  { %4273 = vmatpush3.bf16.msra.mxu1 %v5300_v17  ;;  %4263 = vmatpush3.bf16.msra.mxu0 %v5291_v15 }
 0xef8   :  { %1374 = vrot.lane.b32.xlu0 %v1373_v37, %s5032_s4  ;;  %4264 = vmatprep.subr.bf16.mxu0 %v5029_v16 }
 0xef9   :  { %4266 = vmatprep.mubr.msk.bf16.mxu0 %vm5030_vm1, %v5029_v16  ;;  %4286 = vmatprep.subr.bf16.mxu1 %v5029_v16 }
 0xefb   :  { %4265 = vmatpush3.bf16.msra.mxu0 %v5305_v18 }
 0xefc   :  { %4278 = vmatprep.subr.bf16.mxu0 %v5029_v16 }
 0xf66   :  { %v1469_v4 = vpop.permute.xlu0 %1468 }
 0xf6a   :  { %v1375_v11 = vpop.permute.xlu0 %1374 }
 0xfc5   :  { %v1448_v8 = vpop.f32.mrb[24].mxu1 }
 0xfc6   :  { %v1455_v45 = vrot.slane %v1448_v8, 4  ;;  %v4260_v17 = vpop.f32.mrb[25].mxu1  ;;  %v4776_v8 = vld [vmem:[%s6276_s6] sm:$0xff]  }
 0xfc7   :  { %v1451_v47 = vpop.f32.mrb[26].mxu1 }
 0xfc8   :  { %v1457_v15 = vadd.f32 %v1455_v45, %v5336_v25  ;;  %v4261_v48 = vpop.f32.mrb[27].mxu1  ;;  %v4777_v47 = vld [vmem:[%s6276_s6 + $0x8] sm:$0xff]  }
 0xfc9   :  { %v1354_v49 = vpop.f32.mrb[24].mxu0 }
 0xfca   :  { %v3925_v50 = vmul.f32 -1.442695, %v1457_v15  ;;  %v1361_v51 = vrot.slane %v1354_v49, 6  ;;  %v4252_v52 = vpop.f32.mrb[25].mxu0  ;;  %v4778_v15 = vld [vmem:[#allocation10] sm:$0xff]  }
 0xfcb   :  { %v1357_v53 = vpop.f32.mrb[26].mxu0 }
 0xfcc   :  { %4640 = vpow2.f32 %v3925_v50  ;;  %v1363_v54 = vadd.f32 %v1361_v51, %v5338_v26  ;;  %v4253_v55 = vpop.f32.mrb[27].mxu0 }
 0xfce   :  { %v3922_v56 = vmul.f32 -1.442695, %v1363_v54 }
 0xfd0   :  { %4642 = vpow2.f32 %v3922_v56 }
 0xfd6   :  { %v4641_v18 = vpop.eup %4640 }
 0xfd7   :  { %v1461_v57 = vadd.f32 1.0, %v4641_v18 }
 0xfd9   :  { %4644 = vrcp.f32 %v1461_v57 }
 0xfda   :  { %v4643_v58 = vpop.eup %4642 }
 0xfdb   :  { %v1367_v30 = vadd.f32 1.0, %v4643_v58 }
 0xfdd   :  { %4646 = vrcp.f32 %v1367_v30 }
 0xfe3   :  { %v4645_v59 = vpop.eup %4644 }
 0xfe4   :  { %v1464_v60 = vmul.f32 2.0, %v4645_v59  ;;  %v1471_v7 = vmul.f32 %v4645_v59, %v1469_v4 }
 0xfe6   :  { %v3926_v61 = vadd.f32 -1.0, %v1464_v60 }
 0xfe7   :  { %v4647_v62 = vpop.eup %4646 }
 0xfe8   :  { %1473 = vrot.lane.b32.xlu1 %v3926_v61, %s5020_s1  ;;  %v1370_v63 = vmul.f32 2.0, %v4647_v62  ;;  %v1377_v12 = vmul.f32 %v4647_v62, %v1375_v11 }
 0xfea   :  { %v3923_v28 = vadd.f32 -1.0, %v1370_v63 }
 0xfec   :  { %1379 = vrot.lane.b32.xlu1 %v3923_v28, %s5020_s1 }
0x105a   :  { %v1474_v0 = vpop.permute.xlu1 %1473 }
0x105b   :  { %v1476_v1 = vmul.f32 %v4645_v59, %v1474_v0 }
0x105d   :  { %1478 = vrot.lane.b32.xlu1 %v1476_v1, %s5032_s4 }
0x105e   :  { %v1380_v2 = vpop.permute.xlu1 %1379 }
0x105f   :  { %v1382_v3 = vmul.f32 %v4647_v62, %v1380_v2 }
0x1061   :  { %1384 = vrot.lane.b32.xlu1 %v1382_v3, %s5032_s4 }
0x10cf   :  { %v1479_v9 = vpop.permute.xlu1 %1478 }
0x10d0   :  { %v1481_v10 = vadd.f32 %v1479_v9, %v1471_v7 }
0x10d2   :  { %4648 = vtanh.f32 %v1481_v10 }
0x10d3   :  { %v1385_v23 = vpop.permute.xlu1 %1384 }
0x10d4   :  { %v1387_v29 = vadd.f32 %v1385_v23, %v1377_v12 }
0x10d6   :  { %4650 = vtanh.f32 %v1387_v29 }
0x10dc   :  { %v4649_v31 = vpop.eup %4648 }
0x10dd   :  { %1484 = vrot.lane.b32.xlu0 %v4649_v31, %s5020_s1 }
0x10e0   :  { %v4651_v32 = vpop.eup %4650 }
0x10e1   :  { %1390 = vrot.lane.b32.xlu1 %v4651_v32, %s5020_s1 }
0x114f   :  { %v1485_v33 = vpop.permute.xlu0 %1484 }
0x1150   :  { %v1487_v13 = vmul.f32 %v4645_v59, %v1485_v33 }
0x1152   :  { %1489 = vrot.lane.b32.xlu0 %v1487_v13, %s5032_s4 }
0x1153   :  { %v1391_v22 = vpop.permute.xlu1 %1390 }
0x1154   :  { %v1393_v24 = vmul.f32 %v4647_v62, %v1391_v22 }
0x1156   :  { %1395 = vrot.lane.b32.xlu1 %v1393_v24, %s5032_s4  ;;  %1497 = vrot.lane.b32.xlu0 %v1481_v10, %s5033_s7 }
0x115a   :  { %1403 = vrot.lane.b32.xlu0 %v1387_v29, %s5033_s7 }
0x11c4   :  { %v1490_v39 = vpop.permute.xlu0 %1489 }
0x11c5   :  { %v5679_v41 = vsel %vm181_vm4, %v1490_v39, %v1493_v27 }
0x11c6   :  { %1503 = vst.msk [vmem:[#allocation3] sm:$0x30] %vm752_vm6, %v5679_v41  ;;  %v1598_v36 = vpack.c.bf16 %v5679_v41, %v5679_v41 }
0x11c8   :  { %v1600_v21 = vrot.slane %v1598_v36, 2  ;;  %v1396_v44 = vpop.permute.xlu1 %1395  ;;  %v1498_v43 = vpop.permute.xlu0 %1497 }
0x11c9   :  { %v5688_v20 = vsel %vm182_vm2, %v1396_v44, %v1399_v40  ;;  %v5694_v34 = vsel %vm181_vm4, %v1498_v43, %v1467_v42 }
0x11ca   :  { %1502 = vst.msk [vmem:[#allocation2 + $0x8] sm:$0xc] %vm750_vm7, %v5688_v20  ;;  %v1504_v35 = vpack.c.bf16 %v5688_v20, %v5688_v20  ;;  %v1657_v46 = vrot.slane %v5694_v34, 2  ;;  %4275 = vmatmul.mubr.msk.bf16.vlgmr.msra.gmra.mrb[28].mxu1 %vm210_vm0, %v1600_v21  ;;  %v1683_v21 = vrot.slane %v5679_v41, 2 }
0x11cb   :  { %4287 = vmatpush3.bf16.msra.mxu1 %v4776_v8  ;;  %4290 = vmatprep.mubr.msk.bf16.mxu1 %vm5030_vm1, %v5029_v16  ;;  %v1589_v8 = vrot.slane %v5688_v20, 6 }
0x11cc   :  { %v1506_v38 = vrot.slane %v1504_v35, 1  ;;  %1658 = vrot.lane.b32.xlu0 %v1657_v46, %s5032_s4  ;;  %v1404_v42 = vpop.permute.xlu0 %1403  ;;  %4288 = vmatprep.subr.bf16.mxu1 %v5029_v16 }
0x11cd   :  { %v5715_v45 = vsel %vm182_vm2, %v1404_v42, %v1373_v37 }
0x11ce   :  { %v1563_v17 = vrot.slane %v5715_v45, 6  ;;  %4267 = vmatmul.mubr.msk.bf16.vlgmr.msra.gmra.mrb[28].mxu0 %vm210_vm0, %v1506_v38 }
0x11cf   :  { %4289 = vmatpush3.bf16.msra.mxu1 %v4777_v47  ;;  %4279 = vmatpush3.bf16.msra.mxu0 %v4778_v15 }
0x11d0   :  { %1564 = vrot.lane.b32.xlu0 %v1563_v17, %s5032_s4  ;;  %4280 = vmatprep.subr.bf16.mxu0 %v5029_v16 }
0x11d1   :  { %4282 = vmatprep.mubr.msk.bf16.mxu0 %vm5030_vm1, %v5029_v16 }
0x11d3   :  { %4281 = vmatpush3.bf16.msra.mxu0 %v4779_v14 }
0x123e   :  { %v1659_v11 = vpop.permute.xlu0 %1658 }
0x1242   :  { %v1565_v31 = vpop.permute.xlu0 %1564 }
0x129d   :  { %v1638_v37 = vpop.f32.mrb[28].mxu1 }
0x129e   :  { %v1645_v48 = vrot.slane %v1638_v37, 6  ;;  %v4276_v49 = vpop.f32.mrb[29].mxu1 }
0x129f   :  { %v1641_v50 = vpop.f32.mrb[30].mxu1 }
0x12a0   :  { %v1647_v51 = vadd.f32 %v1645_v48, %v5336_v25  ;;  %v4277_v52 = vpop.f32.mrb[31].mxu1 }
0x12a1   :  { %v1544_v53 = vpop.f32.mrb[28].mxu0 }
0x12a2   :  { %v3931_v54 = vmul.f32 -1.442695, %v1647_v51  ;;  %v1551_v55 = vrot.slane %v1544_v53, 4  ;;  %v4268_v56 = vpop.f32.mrb[29].mxu0 }
0x12a3   :  { %v1547_v18 = vpop.f32.mrb[30].mxu0 }
0x12a4   :  { %4652 = vpow2.f32 %v3931_v54  ;;  %v1553_v57 = vadd.f32 %v1551_v55, %v5338_v26  ;;  %v4269_v58 = vpop.f32.mrb[31].mxu0 }
0x12a6   :  { %v3928_v30 = vmul.f32 -1.442695, %v1553_v57 }
0x12a8   :  { %4654 = vpow2.f32 %v3928_v30 }
0x12ae   :  { %v4653_v59 = vpop.eup %4652 }
0x12af   :  { %v1651_v60 = vadd.f32 1.0, %v4653_v59 }
0x12b1   :  { %4656 = vrcp.f32 %v1651_v60 }
0x12b2   :  { %v4655_v61 = vpop.eup %4654 }
0x12b3   :  { %v1557_v62 = vadd.f32 1.0, %v4655_v61 }
0x12b5   :  { %4658 = vrcp.f32 %v1557_v62 }
0x12bb   :  { %v4657_v63 = vpop.eup %4656 }
0x12bc   :  { %v1654_v28 = vmul.f32 2.0, %v4657_v63  ;;  %v1661_v12 = vmul.f32 %v4657_v63, %v1659_v11 }
0x12be   :  { %v3932_v0 = vadd.f32 -1.0, %v1654_v28 }
0x12bf   :  { %v4659_v1 = vpop.eup %4658 }
0x12c0   :  { %1663 = vrot.lane.b32.xlu1 %v3932_v0, %s5020_s1  ;;  %v1560_v2 = vmul.f32 2.0, %v4659_v1  ;;  %v1567_v32 = vmul.f32 %v4659_v1, %v1565_v31 }
0x12c2   :  { %v3929_v3 = vadd.f32 -1.0, %v1560_v2 }
0x12c4   :  { %1569 = vrot.lane.b32.xlu1 %v3929_v3, %s5020_s1 }
0x1332   :  { %v1664_v4 = vpop.permute.xlu1 %1663 }
0x1333   :  { %v1666_v7 = vmul.f32 %v4657_v63, %v1664_v4 }
0x1335   :  { %1668 = vrot.lane.b32.xlu1 %v1666_v7, %s5032_s4 }
0x1336   :  { %v1570_v9 = vpop.permute.xlu1 %1569 }
0x1337   :  { %v1572_v10 = vmul.f32 %v4659_v1, %v1570_v9 }
0x1339   :  { %1574 = vrot.lane.b32.xlu1 %v1572_v10, %s5032_s4 }
0x13a7   :  { %v1669_v23 = vpop.permute.xlu1 %1668 }
0x13a8   :  { %v1671_v29 = vadd.f32 %v1669_v23, %v1661_v12 }
0x13aa   :  { %4660 = vtanh.f32 %v1671_v29 }
0x13ab   :  { %v1575_v33 = vpop.permute.xlu1 %1574 }
0x13ac   :  { %v1577_v13 = vadd.f32 %v1575_v33, %v1567_v32 }
0x13ae   :  { %4662 = vtanh.f32 %v1577_v13 }
0x13b4   :  { %v4661_v22 = vpop.eup %4660 }
0x13b5   :  { %1674 = vrot.lane.b32.xlu0 %v4661_v22, %s5020_s1  ;;  %v1878_v22 = vld [vmem:[#allocation13 + $0x28] sm:$0xff] }
0x13b8   :  { %v4663_v24 = vpop.eup %4662 }
0x13b9   :  { %1580 = vrot.lane.b32.xlu1 %v4663_v24, %s5020_s1  ;;  %v1885_v24 = vld [vmem:[#allocation15 + $0x20] sm:$0xff] }
0x1427   :  { %v1675_v27 = vpop.permute.xlu0 %1674 }
0x1428   :  { %v1677_v39 = vmul.f32 %v4657_v63, %v1675_v27 }
0x142a   :  { %1679 = vrot.lane.b32.xlu0 %v1677_v39, %s5032_s4  ;;  %v1886_v39 = vld [vmem:[#allocation15 + $0x28] sm:$0xff] }
0x142b   :  { %v1581_v36 = vpop.permute.xlu1 %1580 }
0x142c   :  { %v1583_v40 = vmul.f32 %v4659_v1, %v1581_v36  ;;  %v4520_v36 = vpack.c.bf16 %v1886_v39, %v1885_v24 }
0x142e   :  { %1585 = vrot.lane.b32.xlu1 %v1583_v40, %s5032_s4  ;;  %1687 = vrot.lane.b32.xlu0 %v1671_v29, %s5033_s7  ;;  %v1879_v40 = vld [vmem:[#allocation13 + $0x30] sm:$0xff] }
0x142f   :  { %4521 = vmatprep.subr.bf16.mxu1 %v4520_v36 }
0x1432   :  { %1593 = vrot.lane.b32.xlu0 %v1577_v13, %s5033_s7  ;;  %v1877_v13 = vld [vmem:[#allocation13 + $0x20] sm:$0xff] }
0x1433   :  { %v4504_v27 = vpack.c.bf16 %v1878_v22, %v1877_v13 }
0x1435   :  { %4505 = vmatprep.subr.bf16.mxu0 %v4504_v27 }
0x149c   :  { %v1680_v44 = vpop.permute.xlu0 %1679 }
0x149d   :  { %v5743_v43 = vsel %vm181_vm4, %v1680_v44, %v1683_v21  ;;  %v1880_v21 = vld [vmem:[#allocation13 + $0x38] sm:$0xff]  ;;  %v1887_v44 = vld [vmem:[#allocation15 + $0x30] sm:$0xff] }
0x149e   :  { %1693 = vst.msk [vmem:[#allocation3] sm:$0xc] %vm750_vm7, %v5743_v43  ;;  %v1782_v35 = vpack.c.bf16 %v5743_v43, %v5743_v43 }
0x14a0   :  { %v1784_v38 = vrot.slane %v1782_v35, 1  ;;  %v1586_v42 = vpop.permute.xlu1 %1585  ;;  %v1688_v47 = vpop.permute.xlu0 %1687  ;;  %v4508_v35 = vpack.c.bf16 %v1880_v21, %v1879_v40 }
0x14a1   :  { %v5752_v15 = vsel %vm182_vm2, %v1586_v42, %v1589_v8  ;;  %v1691_v41 = vsel %vm181_vm4, %v1688_v47, %v1657_v46  ;;  %v1888_v8 = vld [vmem:[#allocation15 + $0x38] sm:$0xff]  ;;  %v1873_v42 = vld [vmem:[#allocation13] sm:$0xff]  ;;  %v1874_v47 = vld [vmem:[#allocation13 + $0x8] sm:$0xff] }
0x14a2   :  { %1692 = vst.msk [vmem:[#allocation2 + $0x8] sm:$0x30] %vm752_vm6, %v5752_v15  ;;  %v1694_v14 = vpack.c.bf16 %v5752_v15, %v5752_v15  ;;  %v1838_v37 = vrot.slane %v1691_v41, 2  ;;  %4291 = vmatmul.mubr.msk.bf16.vlgmr.msra.gmra.mrb[32].mxu1 %vm210_vm0, %v1784_v38  ;;  %v4524_v38 = vpack.c.bf16 %v1888_v8, %v1887_v44  ;;  %v1881_v41 = vld [vmem:[#allocation15] sm:$0xff] }
0x14a3   :  { %4523 = vmatpush3.bf16.msra.mxu1 %v4520_v36 }
0x14a4   :  { %v1696_v20 = vrot.slane %v1694_v14, 2  ;;  %1839 = vrot.lane.b32.xlu0 %v1838_v37, %s5032_s4  ;;  %v1594_v48 = vpop.permute.xlu0 %1593  ;;  %4525 = vmatprep.subr.bf16.mxu1 %v4524_v38  ;;  %v4512_v14 = vpack.c.bf16 %v1874_v47, %v1873_v42  ;;  %v1882_v37 = vld [vmem:[#allocation15 + $0x8] sm:$0xff] }
0x14a5   :  { %v1597_v34 = vsel %vm182_vm2, %v1594_v48, %v1563_v17 }
0x14a6   :  { %v1753_v49 = vrot.slane %v1597_v34, 6  ;;  %4283 = vmatmul.mubr.msk.bf16.vlgmr.msra.gmra.mrb[32].mxu0 %vm210_vm0, %v1696_v20  ;;  %v4528_v20 = vpack.c.bf16 %v1882_v37, %v1881_v41 }
0x14a7   :  { %4507 = vmatpush3.bf16.msra.mxu0 %v4504_v27  ;;  %4527 = vmatpush3.bf16.msra.mxu1 %v4524_v38 }
0x14a8   :  { %1754 = vrot.lane.b32.xlu0 %v1753_v49, %s5032_s4  ;;  %4509 = vmatprep.subr.bf16.mxu0 %v4508_v35 }
0x14a9   :  { %4529 = vmatprep.subr.bf16.mxu1 %v4528_v20 }
0x14ab   :  { %4511 = vmatpush3.bf16.msra.mxu0 %v4508_v35 }
0x14ac   :  { %4513 = vmatprep.subr.bf16.mxu0 %v4512_v14 }
0x1516   :  { %v1840_v7 = vpop.permute.xlu0 %1839 }
0x151a   :  { %v1755_v12 = vpop.permute.xlu0 %1754 }
0x1575   :  { %v1822_v46 = vpop.f32.mrb[32].mxu1 }
0x1576   :  { %v1828_v50 = vadd.f32 %v1822_v46, %v5336_v25  ;;  %v4292_v51 = vpop.f32.mrb[33].mxu1 }
0x1577   :  { %v1825_v52 = vpop.f32.mrb[34].mxu1 }
0x1578   :  { %v3937_v53 = vmul.f32 -1.442695, %v1828_v50  ;;  %v4293_v54 = vpop.f32.mrb[35].mxu1  ;;  %v1864_v50 = vrot.slane %v5743_v43, 2  ;;  %v1872_v43 = vld [vmem:[#allocation3 + $0x8] sm:$0xff] }
0x1579   :  { %v1734_v55 = vpop.f32.mrb[32].mxu0 }
0x157a   :  { %4664 = vpow2.f32 %v3937_v53  ;;  %v1741_v56 = vrot.slane %v1734_v55, 2  ;;  %v4284_v18 = vpop.f32.mrb[33].mxu0  ;;  %v1779_v53 = vrot.slane %v5752_v15, 6  ;;  %v1875_v55 = vld [vmem:[#allocation13 + $0x10] sm:$0xff] }
0x157b   :  { %v1737_v45 = vpop.f32.mrb[34].mxu0  ;;  %v1876_v18 = vld [vmem:[#allocation13 + $0x18] sm:$0xff]  ;;  %v1869_v15 = vld [vmem:[#allocation2] sm:$0xff] }
0x157c   :  { %v1743_v57 = vadd.f32 %v1741_v56, %v5338_v26  ;;  %v4285_v17 = vpop.f32.mrb[35].mxu0  ;;  %v1883_v45 = vld [vmem:[#allocation15 + $0x10] sm:$0xff] }
0x157e   :  { %v3934_v58 = vmul.f32 -1.442695, %v1743_v57  ;;  %v1884_v57 = vld [vmem:[#allocation15 + $0x18] sm:$0xff] }
0x1580   :  { %4666 = vpow2.f32 %v3934_v58  ;;  %v4516_v58 = vpack.c.bf16 %v1876_v18, %v1875_v55 }
0x1584   :  { %v4665_v30 = vpop.eup %4664 }
0x1585   :  { %v1832_v59 = vadd.f32 1.0, %v4665_v30  ;;  %v4532_v30 = vpack.c.bf16 %v1884_v57, %v1883_v45 }
0x1587   :  { %4668 = vrcp.f32 %v1832_v59  ;;  %v5797_v59 = vld [vmem:[%s6279_s9] sm:$0xff]  }
0x158a   :  { %v4667_v60 = vpop.eup %4666 }
0x158b   :  { %v1747_v61 = vadd.f32 1.0, %v4667_v60  ;;  %v5799_v60 = vld [vmem:[#allocation16] sm:$0xff]  }
0x158d   :  { %4670 = vrcp.f32 %v1747_v61 }
0x1591   :  { %v4669_v25 = vpop.eup %4668 }
0x1592   :  { %v1835_v62 = vmul.f32 2.0, %v4669_v25  ;;  %v1842_v9 = vmul.f32 %v4669_v25, %v1840_v7 }
0x1594   :  { %v3938_v63 = vadd.f32 -1.0, %v1835_v62  ;;  %v5812_v62 = vld [vmem:[#allocation16 + $0x8] sm:$0xff]  }
0x1596   :  { %1844 = vrot.lane.b32.xlu1 %v3938_v63, %s5020_s1  ;;  %v3948_v63 = vld [vmem:[%s6283_s13] ss:$0 sm:$0xff] }
0x1597   :  { %v4671_v28 = vpop.eup %4670 }
0x1598   :  { %v1750_v0 = vmul.f32 2.0, %v4671_v28  ;;  %v1757_v23 = vmul.f32 %v4671_v28, %v1755_v12 }
0x159a   :  { %v3935_v1 = vadd.f32 -1.0, %v1750_v0 }
0x159c   :  { %1759 = vrot.lane.b32.xlu1 %v3935_v1, %s5020_s1 }
0x1608   :  { %v1845_v26 = vpop.permute.xlu1 %1844 }
0x1609   :  { %v1847_v2 = vmul.f32 %v4669_v25, %v1845_v26 }
0x160b   :  { %1849 = vrot.lane.b32.xlu1 %v1847_v2, %s5032_s4 }
0x160e   :  { %v1760_v3 = vpop.permute.xlu1 %1759 }
0x160f   :  { %v1762_v4 = vmul.f32 %v4671_v28, %v1760_v3 }
0x1611   :  { %1764 = vrot.lane.b32.xlu1 %v1762_v4, %s5032_s4 }
0x167d   :  { %v1850_v10 = vpop.permute.xlu1 %1849 }
0x167e   :  { %v1852_v11 = vadd.f32 %v1850_v10, %v1842_v9 }
0x1680   :  { %4672 = vtanh.f32 %v1852_v11 }
0x1683   :  { %v1765_v29 = vpop.permute.xlu1 %1764 }
0x1684   :  { %v1767_v31 = vadd.f32 %v1765_v29, %v1757_v23 }
0x1686   :  { %4674 = vtanh.f32 %v1767_v31 }
0x168a   :  { %v4673_v32 = vpop.eup %4672 }
0x168b   :  { %1855 = vrot.lane.b32.xlu0 %v4673_v32, %s5020_s1 }
0x1690   :  { %v4675_v33 = vpop.eup %4674 }
0x1691   :  { %1770 = vrot.lane.b32.xlu1 %v4675_v33, %s5020_s1 }
0x16fd   :  { %v1856_v48 = vpop.permute.xlu0 %1855 }
0x16fe   :  { %v1858_v34 = vmul.f32 %v4669_v25, %v1856_v48  ;;  %v5810_v25 = vld [vmem:[%s6279_s9 + $0x8] sm:$0xff]  }
0x1700   :  { %1860 = vrot.lane.b32.xlu0 %v1858_v34, %s5032_s4 }
0x1703   :  { %v1771_v49 = vpop.permute.xlu1 %1770 }
0x1704   :  { %v1773_v46 = vmul.f32 %v4671_v28, %v1771_v49 }
0x1706   :  { %1775 = vrot.lane.b32.xlu1 %v1773_v46, %s5032_s4 }
0x1772   :  { %v1861_v51 = vpop.permute.xlu0 %1860 }
0x1773   :  { %v1866_v52 = vsel %vm181_vm4, %v1861_v51, %v1864_v50 }
0x1774   :  { %1868 = vst.msk [vmem:[#allocation3] sm:$0x3] %vm560_vm5, %v1866_v52 }
0x1778   :  { %v1776_v54 = vpop.permute.xlu1 %1775 }
0x1779   :  { %v1781_v56 = vsel %vm182_vm2, %v1776_v54, %v1779_v53 }
0x177a   :  { %1867 = vst.msk [vmem:[#allocation2 + $0x8] sm:$0xc0] %vm562_vm3, %v1781_v56 }
0x177b   :  { %v1871_v17 = vld [vmem:[#allocation3] sm:$0xff] }
0x177c   :  { %4302 = vmatprep.mubr.msk.f32.mxu0 %vm210_vm0, %v1871_v17  ;;  %4324 = vmatprep.mubr.msk.f32.mxu1 %vm210_vm0, %v1871_v17 }
0x177d   :  { %4303 = vmatmul.mubr.msk.f32.vlgmr.msra.gmra.mrb[2].mxu0 %vm210_vm0, %v1872_v43  ;;  %4325 = vmatmul.mubr.msk.f32.vlgmr.msra.gmra.mrb[2].mxu1 %vm210_vm0, %v1872_v43 }
0x177e   :  { %4515 = vmatpush3.bf16.msra.mxu0 %v4512_v14  ;;  %4531 = vmatpush3.bf16.msra.mxu1 %v4528_v20 }
0x177f   :  { %4313 = vmatprep.mubr.msk.f32.mxu0 %vm210_vm0, %v1869_v15  ;;  %4335 = vmatprep.mubr.msk.f32.mxu1 %vm210_vm0, %v1869_v15 }
0x1780   :  { %4517 = vmatprep.subr.bf16.mxu0 %v4516_v58  ;;  %4533 = vmatprep.subr.bf16.mxu1 %v4532_v30 }
0x1781   :  { %v1870_v61 = vld [vmem:[#allocation2 + $0x8] sm:$0xff] }
0x1782   :  { %4519 = vmatpush3.bf16.msra.mxu0 %v4516_v58  ;;  %4535 = vmatpush3.bf16.msra.mxu1 %v4532_v30 }
0x1783   :  { %4338 = vmatprep.subr.bf16.mxu0 %v5029_v16  ;;  %4346 = vmatprep.subr.bf16.mxu1 %v5029_v16 }
0x1785   :  { %4314 = vmatmul.mubr.msk.f32.vlgmr.msra.gmra.mrb[2].mxu0 %vm210_vm0, %v1870_v61  ;;  %4336 = vmatmul.mubr.msk.f32.vlgmr.msra.gmra.mrb[2].mxu1 %vm210_vm0, %v1870_v61 }
0x1786   :  { %4339 = vmatpush3.bf16.msra.mxu0 %v5797_v59  ;;  %4347 = vmatpush3.bf16.msra.mxu1 %v5799_v60 }
0x1787   :  { %4340 = vmatprep.subr.bf16.mxu0 %v5029_v16  ;;  %4348 = vmatprep.subr.bf16.mxu1 %v5029_v16 }
0x1788   :  { %4342 = vmatprep.mubr.msk.bf16.mxu0 %vm5030_vm1, %v5029_v16  ;;  %4350 = vmatprep.mubr.msk.bf16.mxu1 %vm5030_vm1, %v5029_v16 }
0x178a   :  { %4341 = vmatpush3.bf16.msra.mxu0 %v5810_v25  ;;  %4349 = vmatpush3.bf16.msra.mxu1 %v5812_v62 }
0x178b   :  { %4354 = vmatprep.subr.bf16.mxu0 %v5029_v16  ;;  %4362 = vmatprep.subr.bf16.mxu1 %v5029_v16 }
0x178d   :  { %4343 = vmatmul.mubr.bf16.vlgmr.msra.gmra.mrb[36].mxu0 %v5031_v19  ;;  %4351 = vmatmul.mubr.bf16.vlgmr.msra.gmra.mrb[36].mxu1 %v5031_v19  ;;  %v3943_v19 = vld [vmem:[%s6280_s10] ss:$0 sm:$0xff] }
0x178e   :  { %4355 = vmatpush3.bf16.msra.mxu0 %v5797_v59  ;;  %4363 = vmatpush3.bf16.msra.mxu1 %v5799_v60 }
0x178f   :  { %4356 = vmatprep.subr.bf16.mxu0 %v5029_v16  ;;  %4358 = vmatprep.mubr.msk.bf16.mxu0 %vm5030_vm1, %v5029_v16 }
0x1790   :  { %4364 = vmatprep.subr.bf16.mxu1 %v5029_v16  ;;  %4366 = vmatprep.mubr.msk.bf16.mxu1 %vm5030_vm1, %v5029_v16 }
0x1792   :  { %4357 = vmatpush3.bf16.msra.mxu0 %v5810_v25  ;;  %4365 = vmatpush3.bf16.msra.mxu1 %v5812_v62 }
0x1793   :  { %4370 = vmatprep.subr.bf16.mxu0 %v5029_v16  ;;  %4378 = vmatprep.subr.bf16.mxu1 %v5029_v16 }
0x1858   :  { %v4315_v28 = vpop.f32.mrb[2].mxu0  ;;  %v4337_v0 = vpop.f32.mrb[2].mxu1 }
0x1859   :  { %v5844_v1 = vadd.f32 %v4315_v28, %v3943_v19  ;;  %v2042_v26 = vpop.f32.mrb[3].mxu0  ;;  %v2201_v2 = vpop.f32.mrb[3].mxu1  ;;  %v5850_v10 = vadd.f32 %v4337_v0, %v3948_v63 }
0x185a   :  { %v5846_v3 = vadd.f32 %v3948_v63, %v2201_v2  ;;  %v5848_v4 = vadd.f32 %v3943_v19, %v2042_v26 }
0x1860   :  { %v2265_v7 = vpop.f32.mrb[36].mxu0  ;;  %v2353_v9 = vpop.f32.mrb[36].mxu1 }
0x1861   :  { %v2271_v11 = vadd.f32 %v2265_v7, %v5848_v4  ;;  %v2360_v12 = vrot.slane %v2353_v9, 2  ;;  %v4344_v23 = vpop.f32.mrb[37].mxu0  ;;  %v4352_v29 = vpop.f32.mrb[37].mxu1 }
0x1862   :  { %v2268_v31 = vpop.f32.mrb[38].mxu0  ;;  %v2356_v32 = vpop.f32.mrb[38].mxu1 }
0x1863   :  { %v3951_v33 = vmul.f32 -1.442695, %v2271_v11  ;;  %v2362_v13 = vadd.f32 %v2360_v12, %v5850_v10  ;;  %v4345_v22 = vpop.f32.mrb[39].mxu0  ;;  %v4353_v24 = vpop.f32.mrb[39].mxu1 }
0x1865   :  { %4676 = vpow2.f32 %v3951_v33  ;;  %v3955_v27 = vmul.f32 -1.442695, %v2362_v13 }
0x1867   :  { %4678 = vpow2.f32 %v3955_v27 }
0x186f   :  { %v4677_v39 = vpop.eup %4676 }
0x1870   :  { %v2275_v36 = vadd.f32 1.0, %v4677_v39 }
0x1871   :  { %v4679_v40 = vpop.eup %4678 }
0x1872   :  { %4680 = vrcp.f32 %v2275_v36  ;;  %v2366_v21 = vadd.f32 1.0, %v4679_v40 }
0x1874   :  { %4682 = vrcp.f32 %v2366_v21 }
0x187c   :  { %v4681_v44 = vpop.eup %4680 }
0x187d   :  { %v2278_v35 = vmul.f32 2.0, %v4681_v44  ;;  %v2280_v48 = vmul.f32 0.0, %v4681_v44 }
0x187e   :  { %v4683_v8 = vpop.eup %4682 }
0x187f   :  { %v3952_v38 = vadd.f32 -1.0, %v2278_v35  ;;  %v2369_v42 = vmul.f32 2.0, %v4683_v8  ;;  %v2371_v46 = vmul.f32 0.0, %v4683_v8 }
0x1881   :  { %2282 = vrot.lane.b32.xlu0 %v3952_v38, %s5020_s1  ;;  %v3956_v47 = vadd.f32 -1.0, %v2369_v42 }
0x1883   :  { %2373 = vrot.lane.b32.xlu1 %v3956_v47, %s5020_s1 }
0x18f3   :  { %v2283_v41 = vpop.permute.xlu0 %2282 }
0x18f4   :  { %v2285_v14 = vmul.f32 %v4681_v44, %v2283_v41 }
0x18f5   :  { %v2374_v37 = vpop.permute.xlu1 %2373 }
0x18f6   :  { %v2376_v20 = vmul.f32 %v4683_v8, %v2374_v37  ;;  %2287 = vrot.lane.b32.xlu0 %v2285_v14, %s5032_s4 }
0x18f8   :  { %2378 = vrot.lane.b32.xlu1 %v2376_v20, %s5032_s4 }
0x1968   :  { %v2288_v34 = vpop.permute.xlu0 %2287 }
0x1969   :  { %v2290_v49 = vadd.f32 %v2288_v34, %v2280_v48 }
0x196a   :  { %v2379_v50 = vpop.permute.xlu1 %2378 }
0x196b   :  { %4684 = vtanh.f32 %v2290_v49  ;;  %v2381_v51 = vadd.f32 %v2379_v50, %v2371_v46 }
0x196d   :  { %4686 = vtanh.f32 %v2381_v51 }
0x1975   :  { %v4685_v52 = vpop.eup %4684 }
0x1976   :  { %2293 = vrot.lane.b32.xlu0 %v4685_v52, %s5020_s1 }
0x1977   :  { %v4687_v53 = vpop.eup %4686 }
0x1978   :  { %2384 = vrot.lane.b32.xlu1 %v4687_v53, %s5020_s1 }
0x19e8   :  { %v2294_v54 = vpop.permute.xlu0 %2293 }
0x19e9   :  { %v2296_v55 = vmul.f32 %v4681_v44, %v2294_v54 }
0x19ea   :  { %v2385_v56 = vpop.permute.xlu1 %2384 }
0x19eb   :  { %v2387_v18 = vmul.f32 %v4683_v8, %v2385_v56  ;;  %2298 = vrot.lane.b32.xlu0 %v2296_v55, %s5032_s4 }
0x19ed   :  { %2389 = vrot.lane.b32.xlu1 %v2387_v18, %s5032_s4 }
0x19ef   :  { %2303 = vrot.lane.b32.xlu0 %v2290_v49, %s5033_s7 }
0x19f3   :  { %2394 = vrot.lane.b32.xlu0 %v2381_v51, %s5033_s7 }
0x1a5d   :  { %v2299_v45 = vpop.permute.xlu0 %2298 }
0x1a5e   :  { %v5866_v57 = vsel %vm181_vm4, %v2299_v45, 0.0 }
0x1a5f   :  { %v2398_v17 = vpack.c.bf16 %v5866_v57, %v5866_v57  ;;  %v2390_v43 = vpop.permute.xlu1 %2389 }
0x1a60   :  { %v5872_v58 = vsel %vm182_vm2, %v2390_v43, 0.0  ;;  %v2481_v43 = vrot.slane %v5866_v57, 6 }
0x1a61   :  { %v2490_v30 = vpack.c.bf16 %v5872_v58, %v5872_v58  ;;  %4359 = vmatmul.mubr.msk.bf16.vlgmr.msra.gmra.mrb[40].mxu0 %vm210_vm0, %v2398_v17  ;;  %v2304_v15 = vpop.permute.xlu0 %2303 }
0x1a62   :  { %v5879_v61 = vsel %vm181_vm4, %v2304_v15, 0.0  ;;  %4371 = vmatpush3.bf16.msra.mxu0 %v5797_v59  ;;  %4374 = vmatprep.mubr.msk.bf16.mxu0 %vm5030_vm1, %v5029_v16 }
0x1a63   :  { %v2492_v19 = vrot.slane %v2490_v30, 3  ;;  %v2455_v63 = vrot.slane %v5879_v61, 6  ;;  %4372 = vmatprep.subr.bf16.mxu0 %v5029_v16 }
0x1a65   :  { %4367 = vmatmul.mubr.msk.bf16.vlgmr.msra.gmra.mrb[40].mxu1 %vm210_vm0, %v2492_v19  ;;  %2456 = vrot.lane.b32.xlu0 %v2455_v63, %s5032_s4  ;;  %v2395_v28 = vpop.permute.xlu0 %2394 }
0x1a66   :  { %v5892_v0 = vsel %vm182_vm2, %v2395_v28, 0.0  ;;  %4373 = vmatpush3.bf16.msra.mxu0 %v5810_v25  ;;  %4379 = vmatpush3.bf16.msra.mxu1 %v5799_v60  ;;  %v2575_v28 = vrot.slane %v5872_v58, 2 }
0x1a67   :  { %v2549_v26 = vrot.slane %v5892_v0, 2  ;;  %4380 = vmatprep.subr.bf16.mxu1 %v5029_v16  ;;  %4382 = vmatprep.mubr.msk.bf16.mxu1 %vm5030_vm1, %v5029_v16 }
0x1a68   :  { %4386 = vmatprep.subr.bf16.mxu0 %v5029_v16 }
0x1a69   :  { %2550 = vrot.lane.b32.xlu0 %v2549_v26, %s5032_s4 }
0x1a6a   :  { %4381 = vmatpush3.bf16.msra.mxu1 %v5812_v62 }
0x1a6b   :  { %4394 = vmatprep.subr.bf16.mxu1 %v5029_v16 }
0x1ad7   :  { %v2457_v48 = vpop.permute.xlu0 %2456 }
0x1adb   :  { %v2551_v50 = vpop.permute.xlu0 %2550 }
0x1b34   :  { %v2436_v2 = vpop.f32.mrb[40].mxu0 }
0x1b35   :  { %v2443_v7 = vrot.slane %v2436_v2, 6  ;;  %v4360_v9 = vpop.f32.mrb[41].mxu0 }
0x1b36   :  { %v2439_v11 = vpop.f32.mrb[42].mxu0 }
0x1b37   :  { %v2445_v12 = vadd.f32 %v2443_v7, %v5848_v4  ;;  %v4361_v23 = vpop.f32.mrb[43].mxu0 }
0x1b38   :  { %v2530_v29 = vpop.f32.mrb[40].mxu1 }
0x1b39   :  { %v3958_v31 = vmul.f32 -1.442695, %v2445_v12  ;;  %v2537_v32 = vrot.slane %v2530_v29, 4  ;;  %v4368_v33 = vpop.f32.mrb[41].mxu1 }
0x1b3a   :  { %v2533_v13 = vpop.f32.mrb[42].mxu1 }
0x1b3b   :  { %4688 = vpow2.f32 %v3958_v31  ;;  %v2539_v22 = vadd.f32 %v2537_v32, %v5850_v10  ;;  %v4369_v24 = vpop.f32.mrb[43].mxu1 }
0x1b3d   :  { %v3961_v27 = vmul.f32 -1.442695, %v2539_v22 }
0x1b3f   :  { %4690 = vpow2.f32 %v3961_v27 }
0x1b45   :  { %v4689_v39 = vpop.eup %4688 }
0x1b46   :  { %v2449_v36 = vadd.f32 1.0, %v4689_v39 }
0x1b48   :  { %4692 = vrcp.f32 %v2449_v36 }
0x1b49   :  { %v4691_v40 = vpop.eup %4690 }
0x1b4a   :  { %v2543_v21 = vadd.f32 1.0, %v4691_v40 }
0x1b4c   :  { %4694 = vrcp.f32 %v2543_v21 }
0x1b52   :  { %v4693_v44 = vpop.eup %4692 }
0x1b53   :  { %v2452_v35 = vmul.f32 2.0, %v4693_v44  ;;  %v2459_v34 = vmul.f32 %v4693_v44, %v2457_v48 }
0x1b55   :  { %v3959_v8 = vadd.f32 -1.0, %v2452_v35 }
0x1b56   :  { %v4695_v38 = vpop.eup %4694 }
0x1b57   :  { %2461 = vrot.lane.b32.xlu1 %v3959_v8, %s5020_s1  ;;  %v2546_v42 = vmul.f32 2.0, %v4695_v38  ;;  %v2553_v51 = vmul.f32 %v4695_v38, %v2551_v50 }
0x1b59   :  { %v3962_v47 = vadd.f32 -1.0, %v2546_v42 }
0x1b5b   :  { %2555 = vrot.lane.b32.xlu1 %v3962_v47, %s5020_s1 }
0x1bc9   :  { %v2462_v41 = vpop.permute.xlu1 %2461 }
0x1bca   :  { %v2464_v14 = vmul.f32 %v4693_v44, %v2462_v41 }
0x1bcc   :  { %2466 = vrot.lane.b32.xlu1 %v2464_v14, %s5032_s4 }
0x1bcd   :  { %v2556_v37 = vpop.permute.xlu1 %2555 }
0x1bce   :  { %v2558_v20 = vmul.f32 %v4695_v38, %v2556_v37 }
0x1bd0   :  { %2560 = vrot.lane.b32.xlu1 %v2558_v20, %s5032_s4 }
0x1c3e   :  { %v2467_v49 = vpop.permute.xlu1 %2466 }
0x1c3f   :  { %v2469_v46 = vadd.f32 %v2467_v49, %v2459_v34 }
0x1c41   :  { %4696 = vtanh.f32 %v2469_v46 }
0x1c42   :  { %v2561_v52 = vpop.permute.xlu1 %2560 }
0x1c43   :  { %v2563_v53 = vadd.f32 %v2561_v52, %v2553_v51 }
0x1c45   :  { %4698 = vtanh.f32 %v2563_v53 }
0x1c4b   :  { %v4697_v54 = vpop.eup %4696 }
0x1c4c   :  { %2472 = vrot.lane.b32.xlu0 %v4697_v54, %s5020_s1 }
0x1c4f   :  { %v4699_v55 = vpop.eup %4698 }
0x1c50   :  { %2566 = vrot.lane.b32.xlu1 %v4699_v55, %s5020_s1 }
0x1cbe   :  { %v2473_v56 = vpop.permute.xlu0 %2472 }
0x1cbf   :  { %v2475_v18 = vmul.f32 %v4693_v44, %v2473_v56 }
0x1cc1   :  { %2477 = vrot.lane.b32.xlu0 %v2475_v18, %s5032_s4 }
0x1cc2   :  { %v2567_v45 = vpop.permute.xlu1 %2566 }
0x1cc3   :  { %v2569_v17 = vmul.f32 %v4695_v38, %v2567_v45 }
0x1cc5   :  { %2571 = vrot.lane.b32.xlu1 %v2569_v17, %s5032_s4  ;;  %2485 = vrot.lane.b32.xlu0 %v2469_v46, %s5033_s7 }
0x1cc9   :  { %2579 = vrot.lane.b32.xlu0 %v2563_v53, %s5033_s7 }
0x1d33   :  { %v2478_v30 = vpop.permute.xlu0 %2477 }
0x1d34   :  { %v5921_v15 = vsel %vm181_vm4, %v2478_v30, %v2481_v43 }
0x1d35   :  { %v2584_v19 = vpack.c.bf16 %v5921_v15, %v5921_v15 }
0x1d37   :  { %v2586_v2 = vrot.slane %v2584_v19, 1  ;;  %v2572_v7 = vpop.permute.xlu1 %2571  ;;  %v2486_v9 = vpop.permute.xlu0 %2485 }
0x1d38   :  { %v5928_v11 = vsel %vm182_vm2, %v2572_v7, %v2575_v28  ;;  %v5934_v57 = vsel %vm181_vm4, %v2486_v9, %v2455_v63  ;;  %v2669_v7 = vrot.slane %v5921_v15, 6 }
0x1d39   :  { %v2678_v12 = vpack.c.bf16 %v5928_v11, %v5928_v11  ;;  %v2643_v23 = vrot.slane %v5934_v57, 6  ;;  %4375 = vmatmul.mubr.msk.bf16.vlgmr.msra.gmra.mrb[44].mxu0 %vm210_vm0, %v2586_v2 }
0x1d3a   :  { %4387 = vmatpush3.bf16.msra.mxu0 %v5797_v59  ;;  %4390 = vmatprep.mubr.msk.bf16.mxu0 %vm5030_vm1, %v5029_v16 }
0x1d3b   :  { %v2680_v58 = vrot.slane %v2678_v12, 2  ;;  %2644 = vrot.lane.b32.xlu0 %v2643_v23, %s5032_s4  ;;  %v2580_v61 = vpop.permute.xlu0 %2579  ;;  %4388 = vmatprep.subr.bf16.mxu0 %v5029_v16 }
0x1d3c   :  { %v5951_v63 = vsel %vm182_vm2, %v2580_v61, %v2549_v26  ;;  %v2763_v61 = vrot.slane %v5928_v11, 2 }
0x1d3d   :  { %v2737_v29 = vrot.slane %v5951_v63, 2  ;;  %4383 = vmatmul.mubr.msk.bf16.vlgmr.msra.gmra.mrb[44].mxu1 %vm210_vm0, %v2680_v58 }
0x1d3e   :  { %4389 = vmatpush3.bf16.msra.mxu0 %v5810_v25  ;;  %4395 = vmatpush3.bf16.msra.mxu1 %v5799_v60 }
0x1d3f   :  { %2738 = vrot.lane.b32.xlu0 %v2737_v29, %s5032_s4  ;;  %4396 = vmatprep.subr.bf16.mxu1 %v5029_v16 }
0x1d40   :  { %4398 = vmatprep.mubr.msk.bf16.mxu1 %vm5030_vm1, %v5029_v16  ;;  %4402 = vmatprep.subr.bf16.mxu0 %v5029_v16 }
0x1d42   :  { %4397 = vmatpush3.bf16.msra.mxu1 %v5812_v62 }
0x1d43   :  { %4410 = vmatprep.subr.bf16.mxu1 %v5029_v16 }
0x1dad   :  { %v2645_v51 = vpop.permute.xlu0 %2644 }
0x1db1   :  { %v2739_v55 = vpop.permute.xlu0 %2738 }
0x1e0c   :  { %v2624_v0 = vpop.f32.mrb[44].mxu0 }
0x1e0d   :  { %v2631_v26 = vrot.slane %v2624_v0, 4  ;;  %v4376_v31 = vpop.f32.mrb[45].mxu0 }
0x1e0e   :  { %v2627_v32 = vpop.f32.mrb[46].mxu0 }
0x1e0f   :  { %v2633_v33 = vadd.f32 %v2631_v26, %v5848_v4  ;;  %v4377_v13 = vpop.f32.mrb[47].mxu0 }
0x1e10   :  { %v2718_v22 = vpop.f32.mrb[44].mxu1 }
0x1e11   :  { %v3964_v24 = vmul.f32 -1.442695, %v2633_v33  ;;  %v2725_v27 = vrot.slane %v2718_v22, 6  ;;  %v4384_v39 = vpop.f32.mrb[45].mxu1 }
0x1e12   :  { %v2721_v36 = vpop.f32.mrb[46].mxu1 }
0x1e13   :  { %4700 = vpow2.f32 %v3964_v24  ;;  %v2727_v40 = vadd.f32 %v2725_v27, %v5850_v10  ;;  %v4385_v21 = vpop.f32.mrb[47].mxu1 }
0x1e15   :  { %v3967_v44 = vmul.f32 -1.442695, %v2727_v40 }
0x1e17   :  { %4702 = vpow2.f32 %v3967_v44 }
0x1e1d   :  { %v4701_v35 = vpop.eup %4700 }
0x1e1e   :  { %v2637_v8 = vadd.f32 1.0, %v4701_v35 }
0x1e20   :  { %4704 = vrcp.f32 %v2637_v8 }
0x1e21   :  { %v4703_v38 = vpop.eup %4702 }
0x1e22   :  { %v2731_v42 = vadd.f32 1.0, %v4703_v38 }
0x1e24   :  { %4706 = vrcp.f32 %v2731_v42 }
0x1e2a   :  { %v4705_v47 = vpop.eup %4704 }
0x1e2b   :  { %v2640_v41 = vmul.f32 2.0, %v4705_v47  ;;  %v2647_v52 = vmul.f32 %v4705_v47, %v2645_v51 }
0x1e2d   :  { %v3965_v14 = vadd.f32 -1.0, %v2640_v41 }
0x1e2e   :  { %v4707_v37 = vpop.eup %4706 }
0x1e2f   :  { %2649 = vrot.lane.b32.xlu1 %v3965_v14, %s5020_s1  ;;  %v2734_v20 = vmul.f32 2.0, %v4707_v37  ;;  %v2741_v56 = vmul.f32 %v4707_v37, %v2739_v55 }
0x1e31   :  { %v3968_v48 = vadd.f32 -1.0, %v2734_v20 }
0x1e33   :  { %2743 = vrot.lane.b32.xlu1 %v3968_v48, %s5020_s1 }
0x1ea1   :  { %v2650_v34 = vpop.permute.xlu1 %2649 }
0x1ea2   :  { %v2652_v49 = vmul.f32 %v4705_v47, %v2650_v34 }
0x1ea4   :  { %2654 = vrot.lane.b32.xlu1 %v2652_v49, %s5032_s4 }
0x1ea5   :  { %v2744_v46 = vpop.permute.xlu1 %2743 }
0x1ea6   :  { %v2746_v50 = vmul.f32 %v4707_v37, %v2744_v46 }
0x1ea8   :  { %2748 = vrot.lane.b32.xlu1 %v2746_v50, %s5032_s4 }
0x1f16   :  { %v2655_v53 = vpop.permute.xlu1 %2654 }
0x1f17   :  { %v2657_v54 = vadd.f32 %v2655_v53, %v2647_v52 }
0x1f19   :  { %4708 = vtanh.f32 %v2657_v54 }
0x1f1a   :  { %v2749_v18 = vpop.permute.xlu1 %2748 }
0x1f1b   :  { %v2751_v45 = vadd.f32 %v2749_v18, %v2741_v56 }
0x1f1d   :  { %4710 = vtanh.f32 %v2751_v45 }
0x1f23   :  { %v4709_v17 = vpop.eup %4708 }
0x1f24   :  { %2660 = vrot.lane.b32.xlu0 %v4709_v17, %s5020_s1 }
0x1f27   :  { %v4711_v43 = vpop.eup %4710 }
0x1f28   :  { %2754 = vrot.lane.b32.xlu1 %v4711_v43, %s5020_s1 }
0x1f96   :  { %v2661_v30 = vpop.permute.xlu0 %2660 }
0x1f97   :  { %v2663_v19 = vmul.f32 %v4705_v47, %v2661_v30 }
0x1f99   :  { %2665 = vrot.lane.b32.xlu0 %v2663_v19, %s5032_s4 }
0x1f9a   :  { %v2755_v28 = vpop.permute.xlu1 %2754 }
0x1f9b   :  { %v2757_v2 = vmul.f32 %v4707_v37, %v2755_v28 }
0x1f9d   :  { %2759 = vrot.lane.b32.xlu1 %v2757_v2, %s5032_s4  ;;  %2673 = vrot.lane.b32.xlu0 %v2657_v54, %s5033_s7 }
0x1fa1   :  { %2767 = vrot.lane.b32.xlu1 %v2751_v45, %s5033_s7 }
0x200b   :  { %v2666_v9 = vpop.permute.xlu0 %2665 }
0x200c   :  { %v5981_v12 = vsel %vm181_vm4, %v2666_v9, %v2669_v7 }
0x200d   :  { %v2772_v58 = vpack.c.bf16 %v5981_v12, %v5981_v12 }
0x200f   :  { %v2774_v0 = vrot.slane %v2772_v58, 2  ;;  %v2760_v26 = vpop.permute.xlu1 %2759  ;;  %v2674_v37 = vpop.permute.xlu0 %2673  ;;  %v2857_v58 = vrot.slane %v5981_v12, 6 }
0x2010   :  { %v5988_v31 = vsel %vm182_vm2, %v2760_v26, %v2763_v61 }
0x2011   :  { %v2866_v32 = vpack.c.bf16 %v5988_v31, %v5988_v31  ;;  %4391 = vmatmul.mubr.msk.bf16.vlgmr.msra.gmra.mrb[48].mxu0 %vm210_vm0, %v2774_v0 }
0x2012   :  { %4403 = vmatpush3.bf16.msra.mxu0 %v5797_v59  ;;  %4406 = vmatprep.mubr.msk.bf16.mxu0 %vm5030_vm1, %v5029_v16 }
0x2013   :  { %v2868_v15 = vrot.slane %v2866_v32, 1  ;;  %4404 = vmatprep.subr.bf16.mxu0 %v5029_v16  ;;  %v2768_v49 = vpop.permute.xlu1 %2767  ;;  %v2948_v32 = vrot.slane %v5988_v31, 2 }
0x2014   :  { %v6021_v51 = vsel %vm182_vm2, %v2768_v49, %v2737_v29 }
0x2015   :  { %4399 = vmatmul.mubr.msk.bf16.vlgmr.msra.gmra.mrb[48].mxu1 %vm210_vm0, %v2868_v15  ;;  %v2922_v57 = vrot.slane %v6021_v51, 2 }
0x2016   :  { %4411 = vmatpush3.bf16.msra.mxu1 %v5799_v60  ;;  %4405 = vmatpush3.bf16.msra.mxu0 %v5810_v25 }
0x2017   :  { %4412 = vmatprep.subr.bf16.mxu1 %v5029_v16  ;;  %4414 = vmatprep.mubr.msk.bf16.mxu1 %vm5030_vm1, %v5029_v16 }
0x2018   :  { %4418 = vmatprep.subr.bf16.mxu0 %v5029_v16 }
0x201a   :  { %4413 = vmatpush3.bf16.msra.mxu1 %v5812_v62 }
0x201b   :  { %4426 = vmatprep.subr.bf16.mxu1 %v5029_v16 }
0x20e4   :  { %v2812_v11 = vpop.f32.mrb[48].mxu0 }
0x20e5   :  { %v2819_v33 = vrot.slane %v2812_v11, 2  ;;  %v4392_v13 = vpop.f32.mrb[49].mxu0 }
0x20e6   :  { %v2815_v22 = vpop.f32.mrb[50].mxu0 }
0x20e7   :  { %v2821_v24 = vadd.f32 %v2819_v33, %v5848_v4  ;;  %v4393_v27 = vpop.f32.mrb[51].mxu0 }
0x20e8   :  { %v2906_v39 = vpop.f32.mrb[48].mxu1 }
0x20e9   :  { %v3970_v36 = vmul.f32 -1.442695, %v2821_v24  ;;  %v2912_v40 = vadd.f32 %v2906_v39, %v5850_v10  ;;  %v4400_v21 = vpop.f32.mrb[49].mxu1  ;;  %v6012_v10 = vsel %vm181_vm4, %v2674_v37, %v2643_v23 }
0x20ea   :  { %v2909_v44 = vpop.f32.mrb[50].mxu1  ;;  %v2831_v50 = vrot.slane %v6012_v10, 6 }
0x20eb   :  { %4712 = vpow2.f32 %v3970_v36  ;;  %v3973_v35 = vmul.f32 -1.442695, %v2912_v40  ;;  %v4401_v8 = vpop.f32.mrb[51].mxu1 }
0x20ed   :  { %4714 = vpow2.f32 %v3973_v35 }
0x20f5   :  { %v4713_v38 = vpop.eup %4712 }
0x20f6   :  { %v2825_v42 = vadd.f32 1.0, %v4713_v38 }
0x20f7   :  { %v4715_v47 = vpop.eup %4714 }
0x20f8   :  { %4716 = vrcp.f32 %v2825_v42  ;;  %v2916_v41 = vadd.f32 1.0, %v4715_v47 }
0x20fa   :  { %4718 = vrcp.f32 %v2916_v41 }
0x2102   :  { %v4717_v14 = vpop.eup %4716 }
0x2103   :  { %v2828_v4 = vmul.f32 2.0, %v4717_v14 }
0x2104   :  { %v4719_v20 = vpop.eup %4718 }
0x2105   :  { %v3971_v48 = vadd.f32 -1.0, %v2828_v4  ;;  %v2919_v34 = vmul.f32 2.0, %v4719_v20 }
0x2107   :  { %2837 = vrot.lane.b32.xlu0 %v3971_v48, %s5020_s1  ;;  %v3974_v46 = vadd.f32 -1.0, %v2919_v34 }
0x2109   :  { %2928 = vrot.lane.b32.xlu1 %v3974_v46, %s5020_s1 }
0x210b   :  { %2832 = vrot.lane.b32.xlu0 %v2831_v50, %s5032_s4 }
0x210f   :  { %2923 = vrot.lane.b32.xlu0 %v2922_v57, %s5032_s4 }
0x2179   :  { %v2838_v23 = vpop.permute.xlu0 %2837 }
0x217a   :  { %v2840_v52 = vmul.f32 %v4717_v14, %v2838_v23 }
0x217b   :  { %v2929_v53 = vpop.permute.xlu1 %2928 }
0x217c   :  { %2842 = vrot.lane.b32.xlu1 %v2840_v52, %s5032_s4  ;;  %v2931_v63 = vmul.f32 %v4719_v20, %v2929_v53 }
0x217d   :  { %v2833_v29 = vpop.permute.xlu0 %2832 }
0x217e   :  { %v2835_v54 = vmul.f32 %v4717_v14, %v2833_v29 }
0x2180   :  { %2933 = vrot.lane.b32.xlu1 %v2931_v63, %s5032_s4 }
0x2181   :  { %v2924_v55 = vpop.permute.xlu0 %2923 }
0x2182   :  { %v2926_v45 = vmul.f32 %v4719_v20, %v2924_v55 }
0x21ee   :  { %v2843_v56 = vpop.permute.xlu1 %2842 }
0x21ef   :  { %v2845_v18 = vadd.f32 %v2843_v56, %v2835_v54 }
0x21f1   :  { %4720 = vtanh.f32 %v2845_v18 }
0x21f2   :  { %v2934_v17 = vpop.permute.xlu1 %2933 }
0x21f3   :  { %v2936_v43 = vadd.f32 %v2934_v17, %v2926_v45 }
0x21f5   :  { %4722 = vtanh.f32 %v2936_v43 }
0x21fb   :  { %v4721_v30 = vpop.eup %4720 }
0x21fc   :  { %2848 = vrot.lane.b32.xlu0 %v4721_v30, %s5020_s1 }
0x21ff   :  { %v4723_v19 = vpop.eup %4722 }
0x2200   :  { %2939 = vrot.lane.b32.xlu1 %v4723_v19, %s5020_s1 }
0x226e   :  { %v2849_v28 = vpop.permute.xlu0 %2848 }
0x226f   :  { %v2851_v2 = vmul.f32 %v4717_v14, %v2849_v28 }
0x2271   :  { %2853 = vrot.lane.b32.xlu0 %v2851_v2, %s5032_s4 }
0x2272   :  { %v2940_v7 = vpop.permute.xlu1 %2939 }
0x2273   :  { %v2942_v9 = vmul.f32 %v4719_v20, %v2940_v7 }
0x2275   :  { %2944 = vrot.lane.b32.xlu1 %v2942_v9, %s5032_s4  ;;  %2861 = vrot.lane.b32.xlu0 %v2845_v18, %s5033_s7 }
0x2279   :  { %2952 = vrot.lane.b32.xlu1 %v2936_v43, %s5033_s7 }
0x22e3   :  { %v2854_v61 = vpop.permute.xlu0 %2853 }
0x22e4   :  { %v6041_v0 = vsel %vm181_vm4, %v2854_v61, %v2857_v58 }
0x22e5   :  { %v2957_v26 = vpack.c.bf16 %v6041_v0, %v6041_v0  ;;  %v3039_v61 = vrot.slane %v6041_v0, 6 }
0x22e7   :  { %v2959_v15 = vrot.slane %v2957_v26, 3  ;;  %v2945_v11 = vpop.permute.xlu1 %2944  ;;  %v2862_v4 = vpop.permute.xlu0 %2861 }
0x22e8   :  { %v6048_v33 = vsel %vm182_vm2, %v2945_v11, %v2948_v32  ;;  %v2865_v49 = vsel %vm181_vm4, %v2862_v4, %v2831_v50 }
0x22e9   :  { %v3048_v13 = vpack.c.bf16 %v6048_v33, %v6048_v33  ;;  %4407 = vmatmul.mubr.msk.bf16.vlgmr.msra.gmra.mrb[52].mxu0 %vm210_vm0, %v2959_v15  ;;  %v3013_v52 = vrot.slane %v2865_v49, 6  ;;  %v3131_v11 = vrot.slane %v6048_v33, 2 }
0x22ea   :  { %4419 = vmatpush3.bf16.msra.mxu0 %v5797_v59  ;;  %4422 = vmatprep.mubr.msk.bf16.mxu0 %vm5030_vm1, %v5029_v16 }
0x22eb   :  { %4415 = vmatmul.mubr.msk.bf16.vlgmr.msra.gmra.mrb[52].mxu1 %vm210_vm0, %v3048_v13  ;;  %4420 = vmatprep.subr.bf16.mxu0 %v5029_v16  ;;  %v2953_v46 = vpop.permute.xlu1 %2952 }
0x22ec   :  { %4427 = vmatpush3.bf16.msra.mxu1 %v5799_v60  ;;  %4430 = vmatprep.mubr.msk.bf16.mxu1 %vm5030_vm1, %v5029_v16  ;;  %v2956_v63 = vsel %vm182_vm2, %v2953_v46, %v2922_v57 }
0x22ed   :  { %4428 = vmatprep.subr.bf16.mxu1 %v5029_v16  ;;  %v3105_v29 = vrot.slane %v2956_v63, 2 }
0x22ee   :  { %4421 = vmatpush3.bf16.msra.mxu0 %v5810_v25 }
0x22ef   :  { %4434 = vmatprep.subr.bf16.mxu0 %v5029_v16 }
0x22f0   :  { %4429 = vmatpush3.bf16.msra.mxu1 %v5812_v62 }
0x22f1   :  { %4442 = vmatprep.subr.bf16.mxu1 %v5029_v16 }
0x23bc   :  { %v2997_v12 = vpop.f32.mrb[52].mxu0 }
0x23bd   :  { %v3003_v31 = vadd.f32 %v2997_v12, %v5844_v1  ;;  %v4408_v22 = vpop.f32.mrb[53].mxu0 }
0x23be   :  { %v3000_v24 = vpop.f32.mrb[54].mxu0  ;;  %v3086_v27 = vpop.f32.mrb[52].mxu1 }
0x23bf   :  { %v3976_v39 = vmul.f32 -1.442695, %v3003_v31  ;;  %v3093_v36 = vrot.slane %v3086_v27, 2  ;;  %v4409_v40 = vpop.f32.mrb[55].mxu0  ;;  %v4416_v21 = vpop.f32.mrb[53].mxu1 }
0x23c0   :  { %v3089_v44 = vpop.f32.mrb[54].mxu1 }
0x23c1   :  { %4724 = vpow2.f32 %v3976_v39  ;;  %v3095_v35 = vadd.f32 %v3093_v36, %v5846_v3  ;;  %v4417_v8 = vpop.f32.mrb[55].mxu1 }
0x23c3   :  { %v3979_v38 = vmul.f32 -1.442695, %v3095_v35 }
0x23c5   :  { %4726 = vpow2.f32 %v3979_v38 }
0x23cb   :  { %v4725_v42 = vpop.eup %4724 }
0x23cc   :  { %v3007_v47 = vadd.f32 1.0, %v4725_v42 }
0x23ce   :  { %4728 = vrcp.f32 %v3007_v47 }
0x23cf   :  { %v4727_v41 = vpop.eup %4726 }
0x23d0   :  { %v3099_v14 = vadd.f32 1.0, %v4727_v41 }
0x23d2   :  { %4730 = vrcp.f32 %v3099_v14 }
0x23d8   :  { %v4729_v37 = vpop.eup %4728 }
0x23d9   :  { %v3010_v20 = vmul.f32 2.0, %v4729_v37 }
0x23db   :  { %v3977_v48 = vadd.f32 -1.0, %v3010_v20 }
0x23dc   :  { %v4731_v34 = vpop.eup %4730 }
0x23dd   :  { %3019 = vrot.lane.b32.xlu0 %v3977_v48, %s5020_s1  ;;  %v3102_v23 = vmul.f32 2.0, %v4731_v34 }
0x23df   :  { %v3980_v53 = vadd.f32 -1.0, %v3102_v23 }
0x23e1   :  { %3111 = vrot.lane.b32.xlu1 %v3980_v53, %s5020_s1  ;;  %3014 = vrot.lane.b32.xlu0 %v3013_v52, %s5032_s4 }
0x23e5   :  { %3106 = vrot.lane.b32.xlu0 %v3105_v29, %s5032_s4 }
0x244f   :  { %v3020_v10 = vpop.permute.xlu0 %3019 }
0x2450   :  { %v3022_v50 = vmul.f32 %v4729_v37, %v3020_v10 }
0x2452   :  { %3024 = vrot.lane.b32.xlu1 %v3022_v50, %s5032_s4 }
0x2453   :  { %v3112_v54 = vpop.permute.xlu1 %3111  ;;  %v3015_v56 = vpop.permute.xlu0 %3014 }
0x2454   :  { %v3114_v55 = vmul.f32 %v4731_v34, %v3112_v54  ;;  %v3017_v51 = vmul.f32 %v4729_v37, %v3015_v56 }
0x2456   :  { %3116 = vrot.lane.b32.xlu1 %v3114_v55, %s5032_s4 }
0x2457   :  { %v3107_v18 = vpop.permute.xlu0 %3106 }
0x2458   :  { %v3109_v17 = vmul.f32 %v4731_v34, %v3107_v18 }
0x24c4   :  { %v3025_v45 = vpop.permute.xlu1 %3024 }
0x24c5   :  { %v3027_v57 = vadd.f32 %v3025_v45, %v3017_v51 }
0x24c7   :  { %4732 = vtanh.f32 %v3027_v57 }
0x24c8   :  { %v3117_v43 = vpop.permute.xlu1 %3116 }
0x24c9   :  { %v3119_v30 = vadd.f32 %v3117_v43, %v3109_v17 }
0x24cb   :  { %4734 = vtanh.f32 %v3119_v30 }
0x24d1   :  { %v4733_v19 = vpop.eup %4732 }
0x24d2   :  { %3030 = vrot.lane.b32.xlu0 %v4733_v19, %s5020_s1 }
0x24d5   :  { %v4735_v28 = vpop.eup %4734 }
0x24d6   :  { %3122 = vrot.lane.b32.xlu1 %v4735_v28, %s5020_s1 }
0x2544   :  { %v3031_v2 = vpop.permute.xlu0 %3030 }
0x2545   :  { %v3033_v7 = vmul.f32 %v4729_v37, %v3031_v2 }
0x2547   :  { %3035 = vrot.lane.b32.xlu0 %v3033_v7, %s5032_s4 }
0x2548   :  { %v3123_v9 = vpop.permute.xlu1 %3122 }
0x2549   :  { %v3125_v58 = vmul.f32 %v4731_v34, %v3123_v9 }
0x254b   :  { %3127 = vrot.lane.b32.xlu1 %v3125_v58, %s5032_s4  ;;  %3043 = vrot.lane.b32.xlu0 %v3027_v57, %s5033_s7 }
0x254f   :  { %3135 = vrot.lane.b32.xlu0 %v3119_v30, %s5033_s7 }
0x25b9   :  { %v3036_v26 = vpop.permute.xlu0 %3035 }
0x25ba   :  { %v6091_v32 = vsel %vm182_vm2, %v3036_v26, %v3039_v61 }
0x25bb   :  { %v3140_v15 = vpack.c.bf16 %v6091_v32, %v6091_v32  ;;  %v3223_v9 = vrot.slane %v6091_v32, 6 }
0x25bd   :  { %v3128_v13 = vpop.permute.xlu1 %3127  ;;  %4423 = vmatmul.mubr.msk.bf16.vlgmr.msra.gmra.mrb[56].mxu0 %vm210_vm0, %v3140_v15  ;;  %v3044_v12 = vpop.permute.xlu0 %3043 }
0x25be   :  { %v6099_v31 = vsel %vm181_vm4, %v3128_v13, %v3131_v11  ;;  %v6103_v0 = vsel %vm182_vm2, %v3044_v12, %v3013_v52  ;;  %4435 = vmatpush3.bf16.msra.mxu0 %v5797_v59  ;;  %4438 = vmatprep.mubr.msk.bf16.mxu0 %vm5030_vm1, %v5029_v16 }
0x25bf   :  { %v3232_v33 = vpack.c.bf16 %v6099_v31, %v6099_v31  ;;  %v3197_v22 = vrot.slane %v6103_v0, 6  ;;  %4436 = vmatprep.subr.bf16.mxu0 %v5029_v16  ;;  %v3317_v13 = vrot.slane %v6099_v31, 2 }
0x25c1   :  { %v3234_v24 = vrot.slane %v3232_v33, 3  ;;  %3198 = vrot.lane.b32.xlu0 %v3197_v22, %s5032_s4  ;;  %v3136_v27 = vpop.permute.xlu0 %3135 }
0x25c2   :  { %v6117_v39 = vsel %vm181_vm4, %v3136_v27, %v3105_v29  ;;  %4437 = vmatpush3.bf16.msra.mxu0 %v5810_v25  ;;  %v4780_v27 = vld [vmem:[%s6279_s9] sm:$0xff]  }
0x25c3   :  { %v3291_v59 = vrot.slane %v6117_v39, 2  ;;  %4431 = vmatmul.mubr.msk.bf16.vlgmr.msra.gmra.mrb[56].mxu1 %vm210_vm0, %v3234_v24  ;;  %4450 = vmatprep.subr.bf16.mxu0 %v5029_v16  ;;  %v4783_v39 = vld [vmem:[#allocation16 + $0x8] sm:$0xff]  }
0x25c4   :  { %4443 = vmatpush3.bf16.msra.mxu1 %v5799_v60  ;;  %4446 = vmatprep.mubr.msk.bf16.mxu1 %vm5030_vm1, %v5029_v16 }
0x25c5   :  { %3292 = vrot.lane.b32.xlu0 %v3291_v59, %s5032_s4  ;;  %4444 = vmatprep.subr.bf16.mxu1 %v5029_v16 }
0x25c8   :  { %4445 = vmatpush3.bf16.msra.mxu1 %v5812_v62 }
0x25c9   :  { %4458 = vmatprep.subr.bf16.mxu1 %v5029_v16 }
0x2633   :  { %v3199_v54 = vpop.permute.xlu0 %3198 }
0x2637   :  { %v3293_v18 = vpop.permute.xlu0 %3292 }
0x2690   :  { %v3178_v25 = vpop.f32.mrb[56].mxu0 }
0x2691   :  { %v3185_v36 = vrot.slane %v3178_v25, 6  ;;  %v4424_v40 = vpop.f32.mrb[57].mxu0 }
0x2692   :  { %v3181_v21 = vpop.f32.mrb[58].mxu0  ;;  %v4781_v40 = vld [vmem:[%s6279_s9 + $0x8] sm:$0xff]  }
0x2693   :  { %v3187_v44 = vadd.f32 %v3185_v36, %v5844_v1  ;;  %v4425_v60 = vpop.f32.mrb[59].mxu0  ;;  %v4782_v21 = vld [vmem:[#allocation16] sm:$0xff]  }
0x2695   :  { %v3982_v35 = vmul.f32 -1.442695, %v3187_v44 }
0x2696   :  { %v3272_v8 = vpop.f32.mrb[56].mxu1 }
0x2697   :  { %4736 = vpow2.f32 %v3982_v35  ;;  %v3279_v38 = vrot.slane %v3272_v8, 4  ;;  %v4432_v42 = vpop.f32.mrb[57].mxu1 }
0x2698   :  { %v3275_v47 = vpop.f32.mrb[58].mxu1 }
0x2699   :  { %v3281_v41 = vadd.f32 %v3279_v38, %v5846_v3  ;;  %v4433_v14 = vpop.f32.mrb[59].mxu1 }
0x269b   :  { %v3985_v37 = vmul.f32 -1.442695, %v3281_v41 }
0x269d   :  { %4738 = vpow2.f32 %v3985_v37 }
0x26a1   :  { %v4737_v62 = vpop.eup %4736 }
0x26a2   :  { %v3191_v4 = vadd.f32 1.0, %v4737_v62 }
0x26a4   :  { %4740 = vrcp.f32 %v3191_v4 }
0x26a7   :  { %v4739_v20 = vpop.eup %4738 }
0x26a8   :  { %v3285_v48 = vadd.f32 1.0, %v4739_v20 }
0x26aa   :  { %4742 = vrcp.f32 %v3285_v48 }
0x26ae   :  { %v4741_v34 = vpop.eup %4740 }
0x26af   :  { %v3194_v49 = vmul.f32 2.0, %v4741_v34  ;;  %v3201_v55 = vmul.f32 %v4741_v34, %v3199_v54 }
0x26b1   :  { %v3983_v46 = vadd.f32 -1.0, %v3194_v49 }
0x26b3   :  { %3203 = vrot.lane.b32.xlu1 %v3983_v46, %s5020_s1 }
0x26b4   :  { %v4743_v23 = vpop.eup %4742 }
0x26b5   :  { %v3288_v52 = vmul.f32 2.0, %v4743_v23  ;;  %v3295_v45 = vmul.f32 %v4743_v23, %v3293_v18 }
0x26b7   :  { %v3986_v53 = vadd.f32 -1.0, %v3288_v52 }
0x26b9   :  { %3297 = vrot.lane.b32.xlu1 %v3986_v53, %s5020_s1 }
0x2725   :  { %v3204_v63 = vpop.permute.xlu1 %3203 }
0x2726   :  { %v3206_v29 = vmul.f32 %v4741_v34, %v3204_v63 }
0x2728   :  { %3208 = vrot.lane.b32.xlu1 %v3206_v29, %s5032_s4 }
0x272b   :  { %v3298_v10 = vpop.permute.xlu1 %3297 }
0x272c   :  { %v3300_v50 = vmul.f32 %v4743_v23, %v3298_v10 }
0x272e   :  { %3302 = vrot.lane.b32.xlu1 %v3300_v50, %s5032_s4 }
0x279a   :  { %v3209_v56 = vpop.permute.xlu1 %3208 }
0x279b   :  { %v3211_v51 = vadd.f32 %v3209_v56, %v3201_v55 }
0x279d   :  { %4744 = vtanh.f32 %v3211_v51 }
0x27a0   :  { %v3303_v57 = vpop.permute.xlu1 %3302 }
0x27a1   :  { %v3305_v17 = vadd.f32 %v3303_v57, %v3295_v45 }
0x27a3   :  { %4746 = vtanh.f32 %v3305_v17 }
0x27a7   :  { %v4745_v43 = vpop.eup %4744 }
0x27a8   :  { %3214 = vrot.lane.b32.xlu0 %v4745_v43, %s5020_s1 }
0x27ad   :  { %v4747_v30 = vpop.eup %4746 }
0x27ae   :  { %3308 = vrot.lane.b32.xlu1 %v4747_v30, %s5020_s1 }
0x281a   :  { %v3215_v19 = vpop.permute.xlu0 %3214 }
0x281b   :  { %v3217_v28 = vmul.f32 %v4741_v34, %v3215_v19 }
0x281d   :  { %3219 = vrot.lane.b32.xlu0 %v3217_v28, %s5032_s4 }
0x2820   :  { %v3309_v2 = vpop.permute.xlu1 %3308 }
0x2821   :  { %v3311_v7 = vmul.f32 %v4743_v23, %v3309_v2  ;;  %3227 = vrot.lane.b32.xlu0 %v3211_v51, %s5033_s7 }
0x2823   :  { %3313 = vrot.lane.b32.xlu1 %v3311_v7, %s5032_s4 }
0x2825   :  { %3321 = vrot.lane.b32.xlu0 %v3305_v17, %s5033_s7 }
0x288f   :  { %v3220_v58 = vpop.permute.xlu0 %3219 }
0x2890   :  { %v6147_v61 = vsel %vm182_vm2, %v3220_v58, %v3223_v9 }
0x2891   :  { %v3326_v26 = vpack.c.bf16 %v6147_v61, %v6147_v61 }
0x2893   :  { %v3328_v15 = vrot.slane %v3326_v26, 1  ;;  %v3228_v11 = vpop.permute.xlu0 %3227 }
0x2894   :  { %v6156_v12 = vsel %vm182_vm2, %v3228_v11, %v3197_v22 }
0x2895   :  { %v3385_v32 = vrot.slane %v6156_v12, 6  ;;  %v3314_v33 = vpop.permute.xlu1 %3313  ;;  %4439 = vmatmul.mubr.msk.bf16.vlgmr.msra.gmra.mrb[60].mxu0 %vm210_vm0, %v3328_v15  ;;  %v3411_v15 = vrot.slane %v6147_v61, 6 }
0x2896   :  { %v6162_v24 = vsel %vm181_vm4, %v3314_v33, %v3317_v13  ;;  %4451 = vmatpush3.bf16.msra.mxu0 %v4780_v27  ;;  %4454 = vmatprep.mubr.msk.bf16.mxu0 %vm5030_vm1, %v5029_v16 }
0x2897   :  { %v3420_v31 = vpack.c.bf16 %v6162_v24, %v6162_v24  ;;  %3386 = vrot.lane.b32.xlu0 %v3385_v32, %s5032_s4  ;;  %v3322_v0 = vpop.permute.xlu0 %3321  ;;  %4452 = vmatprep.subr.bf16.mxu0 %v5029_v16 }
0x2898   :  { %v6179_v22 = vsel %vm181_vm4, %v3322_v0, %v3291_v59 }
0x2899   :  { %v3422_v25 = vrot.slane %v3420_v31, 2  ;;  %v3479_v36 = vrot.slane %v6179_v22, 2  ;;  %v3505_v31 = vrot.slane %v6162_v24, 2 }
0x289a   :  { %4453 = vmatpush3.bf16.msra.mxu0 %v4781_v40 }
0x289b   :  { %4447 = vmatmul.mubr.msk.bf16.vlgmr.msra.gmra.mrb[60].mxu1 %vm210_vm0, %v3422_v25  ;;  %3480 = vrot.lane.b32.xlu0 %v3479_v36, %s5032_s4 }
0x289c   :  { %4459 = vmatpush3.bf16.msra.mxu1 %v4782_v21  ;;  %4462 = vmatprep.mubr.msk.bf16.mxu1 %vm5030_vm1, %v5029_v16 }
0x289d   :  { %4460 = vmatprep.subr.bf16.mxu1 %v5029_v16 }
0x28a0   :  { %4461 = vmatpush3.bf16.msra.mxu1 %v4783_v39 }
0x2909   :  { %v3387_v51 = vpop.permute.xlu0 %3386 }
0x290d   :  { %v3481_v17 = vpop.permute.xlu0 %3480 }
0x2968   :  { %v3366_v59 = vpop.f32.mrb[60].mxu0 }
0x2969   :  { %v3373_v44 = vrot.slane %v3366_v59, 4  ;;  %v4440_v60 = vpop.f32.mrb[61].mxu0 }
0x296a   :  { %v3369_v35 = vpop.f32.mrb[62].mxu0 }
0x296b   :  { %v3375_v8 = vadd.f32 %v3373_v44, %v5844_v1  ;;  %v4441_v38 = vpop.f32.mrb[63].mxu0 }
0x296d   :  { %v3988_v42 = vmul.f32 -1.442695, %v3375_v8 }
0x296e   :  { %v3460_v47 = vpop.f32.mrb[60].mxu1 }
0x296f   :  { %4748 = vpow2.f32 %v3988_v42  ;;  %v3467_v41 = vrot.slane %v3460_v47, 6  ;;  %v4448_v14 = vpop.f32.mrb[61].mxu1 }
0x2970   :  { %v3463_v37 = vpop.f32.mrb[62].mxu1 }
0x2971   :  { %v3469_v62 = vadd.f32 %v3467_v41, %v5846_v3  ;;  %v4449_v4 = vpop.f32.mrb[63].mxu1 }
0x2973   :  { %v3991_v20 = vmul.f32 -1.442695, %v3469_v62 }
0x2975   :  { %4750 = vpow2.f32 %v3991_v20 }
0x2979   :  { %v4749_v48 = vpop.eup %4748 }
0x297a   :  { %v3379_v34 = vadd.f32 1.0, %v4749_v48 }
0x297c   :  { %4752 = vrcp.f32 %v3379_v34 }
0x297f   :  { %v4751_v49 = vpop.eup %4750 }
0x2980   :  { %v3473_v46 = vadd.f32 1.0, %v4751_v49 }
0x2982   :  { %4754 = vrcp.f32 %v3473_v46 }
0x2986   :  { %v4753_v23 = vpop.eup %4752 }
0x2987   :  { %v3382_v52 = vmul.f32 2.0, %v4753_v23  ;;  %v3389_v18 = vmul.f32 %v4753_v23, %v3387_v51 }
0x2989   :  { %v3989_v53 = vadd.f32 -1.0, %v3382_v52 }
0x298b   :  { %3391 = vrot.lane.b32.xlu1 %v3989_v53, %s5020_s1 }
0x298c   :  { %v4755_v63 = vpop.eup %4754 }
0x298d   :  { %v3476_v29 = vmul.f32 2.0, %v4755_v63  ;;  %v3483_v43 = vmul.f32 %v4755_v63, %v3481_v17  ;;  %v3688_v17 = vld [vmem:[#allocation18 + $0x8] sm:$0xff] }
0x298f   :  { %v3992_v10 = vadd.f32 -1.0, %v3476_v29 }
0x2991   :  { %3485 = vrot.lane.b32.xlu1 %v3992_v10, %s5020_s1 }
0x29fd   :  { %v3392_v50 = vpop.permute.xlu1 %3391 }
0x29fe   :  { %v3394_v54 = vmul.f32 %v4753_v23, %v3392_v50 }
0x2a00   :  { %3396 = vrot.lane.b32.xlu1 %v3394_v54, %s5032_s4 }
0x2a03   :  { %v3486_v55 = vpop.permute.xlu1 %3485 }
0x2a04   :  { %v3488_v56 = vmul.f32 %v4755_v63, %v3486_v55 }
0x2a06   :  { %3490 = vrot.lane.b32.xlu1 %v3488_v56, %s5032_s4 }
0x2a72   :  { %v3397_v45 = vpop.permute.xlu1 %3396 }
0x2a73   :  { %v3399_v57 = vadd.f32 %v3397_v45, %v3389_v18 }
0x2a75   :  { %4756 = vtanh.f32 %v3399_v57 }
0x2a78   :  { %v3491_v30 = vpop.permute.xlu1 %3490 }
0x2a79   :  { %v3493_v19 = vadd.f32 %v3491_v30, %v3483_v43  ;;  %v3691_v43 = vld [vmem:[#allocation18 + $0x20] sm:$0xff]  ;;  %v5034_v30 = vmov 0.0|0.0  }
0x2a7a   :  { %4542 = vmatprep.subr.bf16.mxu1 %v5034_v30  ;;  %4536 = vmatprep.subr.bf16.mxu0 %v5034_v30 }
0x2a7b   :  { %4758 = vtanh.f32 %v3493_v19 }
0x2a7f   :  { %v4757_v28 = vpop.eup %4756 }
0x2a80   :  { %3402 = vrot.lane.b32.xlu0 %v4757_v28, %s5020_s1  ;;  %v3692_v28 = vld [vmem:[#allocation18 + $0x28] sm:$0xff] }
0x2a85   :  { %v4759_v2 = vpop.eup %4758 }
0x2a86   :  { %3496 = vrot.lane.b32.xlu1 %v4759_v2, %s5020_s1  ;;  %v4537_v2 = vpack.c.bf16 %v3692_v28, %v3691_v43 }
0x2af2   :  { %v3403_v7 = vpop.permute.xlu0 %3402 }
0x2af3   :  { %v3405_v9 = vmul.f32 %v4753_v23, %v3403_v7 }
0x2af5   :  { %3407 = vrot.lane.b32.xlu0 %v3405_v9, %s5032_s4 }
0x2af8   :  { %v3497_v58 = vpop.permute.xlu1 %3496 }
0x2af9   :  { %v3499_v26 = vmul.f32 %v4755_v63, %v3497_v58  ;;  %3415 = vrot.lane.b32.xlu0 %v3399_v57, %s5033_s7  ;;  %v3687_v57 = vld [vmem:[#allocation18] sm:$0xff]  ;;  %v3689_v58 = vld [vmem:[#allocation18 + $0x10] sm:$0xff] }
0x2afb   :  { %3501 = vrot.lane.b32.xlu1 %v3499_v26, %s5032_s4  ;;  %v3690_v26 = vld [vmem:[#allocation18 + $0x18] sm:$0xff] }
0x2aff   :  { %3509 = vrot.lane.b32.xlu1 %v3493_v19, %s5033_s7  ;;  %v4543_v19 = vpack.c.bf16 %v3688_v17, %v3687_v57 }
0x2b67   :  { %v3408_v11 = vpop.permute.xlu0 %3407 }
0x2b68   :  { %v6207_v13 = vsel %vm182_vm2, %v3408_v11, %v3411_v15  ;;  %v4546_v15 = vpack.c.bf16 %v3690_v26, %v3689_v58  ;;  %v3693_v11 = vld [vmem:[#allocation18 + $0x30] sm:$0xff] }
0x2b69   :  { %v3514_v33 = vpack.c.bf16 %v6207_v13, %v6207_v13 }
0x2b6b   :  { %v3516_v27 = vrot.slane %v3514_v33, 2  ;;  %v3416_v48 = vpop.permute.xlu0 %3415  ;;  %v3694_v33 = vld [vmem:[#allocation18 + $0x38] sm:$0xff] }
0x2b6d   :  { %v3502_v0 = vpop.permute.xlu1 %3501  ;;  %4455 = vmatmul.mubr.msk.bf16.vlgmr.msra.gmra.mrb[64].mxu0 %vm210_vm0, %v3516_v27  ;;  %v4540_v27 = vpack.c.bf16 %v3694_v33, %v3693_v11 }
0x2b6e   :  { %v6215_v25 = vsel %vm181_vm4, %v3502_v0, %v3505_v31  ;;  %4474 = vmatprep.mubr.msk.f32.mxu0 %vm5030_vm1, %v5029_v16  ;;  %4538 = vmatpush3.bf16.msra.mxu0 %v4537_v2 }
0x2b6f   :  { %v3602_v61 = vpack.c.bf16 %v6215_v25, %v6215_v25  ;;  %4539 = vmatprep.subr.bf16.mxu0 %v5034_v30 }
0x2b71   :  { %v3604_v40 = vrot.slane %v3602_v61, 1  ;;  %v3510_v46 = vpop.permute.xlu1 %3509 }
0x2b72   :  { %v3513_v63 = vsel %vm181_vm4, %v3510_v46, %v3479_v36  ;;  %4541 = vmatpush3.bf16.msra.mxu0 %v4540_v27 }
0x2b73   :  { %4463 = vmatmul.mubr.msk.bf16.vlgmr.msra.gmra.mrb[64].mxu1 %vm210_vm0, %v3604_v40  ;;  %v3658_v29 = vrot.slane %v3513_v63, 2 }
0x2b74   :  { %4485 = vmatprep.mubr.msk.f32.mxu1 %vm5030_vm1, %v5029_v16  ;;  %4544 = vmatpush3.bf16.msra.mxu1 %v4543_v19 }
0x2b75   :  { %4545 = vmatprep.subr.bf16.mxu1 %v5034_v30 }
0x2b78   :  { %4547 = vmatpush3.bf16.msra.mxu1 %v4546_v15 }
0x2c40   :  { %v3554_v24 = vpop.f32.mrb[64].mxu0 }
0x2c41   :  { %v3561_v21 = vrot.slane %v3554_v24, 2  ;;  %v4456_v39 = vpop.f32.mrb[65].mxu0  ;;  %v3599_v24 = vrot.slane %v6207_v13, 6  ;;  %v4001_v13 = vld [vmem:[%s6285_s15] ss:$0 sm:$0xff]  ;;  %s3870_s15 = sshll.u32 %s5035_s11, 4  ;;  %s3871_s15 = int_to_ptr.vmem [resolvable:$true] %s3870_s15 }
0x2c42   :  { %v3557_v59 = vpop.f32.mrb[66].mxu0  ;;  %s4982_s12 = scalar_lea.vmem %s3871_s15, 32  ;;  %p4987_p3 = scmp.lt.s32.totalorder %s3871_s15, %s3871_s15 }
0x2c43   :  { %v3563_v44 = vadd.f32 %v3561_v21, %v5844_v1  ;;  %v4457_v60 = vpop.f32.mrb[67].mxu0  ;;  %p4983_p2 = scmp.ne.s32.totalorder %s3871_s15, %s4982_s12  ;;  %p4988_p4 = scmp.lt.s32.totalorder %s4982_s12, %s4982_s12 }
0x2c45   :  { %v3994_v35 = vmul.f32 -1.442695, %v3563_v44  ;;  %v3684_v44 = vrot.slane %v6215_v25, 2  ;;  %p4989_p5 = por %p4988_p4, %p4987_p3 }
0x2c46   :  { %v3642_v8 = vpop.f32.mrb[64].mxu1 }
0x2c47   :  { %4760 = vpow2.f32 %v3994_v35  ;;  %v3648_v38 = vadd.f32 %v3642_v8, %v5846_v3  ;;  %v4464_v42 = vpop.f32.mrb[65].mxu1  ;;  %v3419_v3 = vsel %vm182_vm2, %v3416_v48, %v3385_v32  ;;  %p4990_p6 = pnand %p4989_p5, %p4983_p2 }
0x2c48   :  { %v3645_v47 = vpop.f32.mrb[66].mxu1  ;;  %v3573_v52 = vrot.slane %v3419_v3, 6 }
0x2c49   :  { %v3997_v41 = vmul.f32 -1.442695, %v3648_v38  ;;  %v4465_v14 = vpop.f32.mrb[67].mxu1 }
0x2c4b   :  { %4762 = vpow2.f32 %v3997_v41 }
0x2c51   :  { %v4761_v37 = vpop.eup %4760 }
0x2c52   :  { %v3567_v62 = vadd.f32 1.0, %v4761_v37 }
0x2c54   :  { %4764 = vrcp.f32 %v3567_v62 }
0x2c55   :  { %v4763_v16 = vpop.eup %4762 }
0x2c56   :  { %v3652_v4 = vadd.f32 1.0, %v4763_v16 }
0x2c58   :  { %4766 = vrcp.f32 %v3652_v4 }
0x2c5e   :  { %v4765_v20 = vpop.eup %4764 }
0x2c5f   :  { %v3570_v1 = vmul.f32 2.0, %v4765_v20 }
0x2c61   :  { %v3995_v34 = vadd.f32 -1.0, %v3570_v1 }
0x2c62   :  { %v4767_v49 = vpop.eup %4766 }
0x2c63   :  { %3579 = vrot.lane.b32.xlu0 %v3995_v34, %s5020_s1  ;;  %v3655_v23 = vmul.f32 2.0, %v4767_v49 }
0x2c65   :  { %v3998_v53 = vadd.f32 -1.0, %v3655_v23 }
0x2c67   :  { %3664 = vrot.lane.b32.xlu1 %v3998_v53, %s5020_s1  ;;  %3574 = vrot.lane.b32.xlu0 %v3573_v52, %s5032_s4 }
0x2c6b   :  { %3659 = vrot.lane.b32.xlu0 %v3658_v29, %s5032_s4 }
0x2cd5   :  { %v3580_v12 = vpop.permute.xlu0 %3579 }
0x2cd6   :  { %v3582_v32 = vmul.f32 %v4765_v20, %v3580_v12 }
0x2cd8   :  { %3584 = vrot.lane.b32.xlu1 %v3582_v32, %s5032_s4 }
0x2cd9   :  { %v3665_v10 = vpop.permute.xlu1 %3664  ;;  %v3575_v54 = vpop.permute.xlu0 %3574 }
0x2cda   :  { %v3667_v50 = vmul.f32 %v4767_v49, %v3665_v10  ;;  %v3577_v22 = vmul.f32 %v4765_v20, %v3575_v54 }
0x2cdc   :  { %3669 = vrot.lane.b32.xlu1 %v3667_v50, %s5032_s4 }
0x2cdd   :  { %v3660_v55 = vpop.permute.xlu0 %3659 }
0x2cde   :  { %v3662_v51 = vmul.f32 %v4767_v49, %v3660_v55 }
0x2d4a   :  { %v3585_v56 = vpop.permute.xlu1 %3584 }
0x2d4b   :  { %v3587_v36 = vadd.f32 %v3585_v56, %v3577_v22 }
0x2d4d   :  { %4768 = vtanh.f32 %v3587_v36 }
0x2d4e   :  { %v3670_v18 = vpop.permute.xlu1 %3669 }
0x2d4f   :  { %v3672_v45 = vadd.f32 %v3670_v18, %v3662_v51 }
0x2d51   :  { %4770 = vtanh.f32 %v3672_v45 }
0x2d57   :  { %v4769_v7 = vpop.eup %4768 }
0x2d58   :  { %3590 = vrot.lane.b32.xlu0 %v4769_v7, %s5020_s1 }
0x2d5b   :  { %v4771_v9 = vpop.eup %4770 }
0x2d5c   :  { %3675 = vrot.lane.b32.xlu1 %v4771_v9, %s5020_s1 }
0x2dca   :  { %v3591_v31 = vpop.permute.xlu0 %3590 }
0x2dcb   :  { %v3593_v0 = vmul.f32 %v4765_v20, %v3591_v31 }
0x2dcd   :  { %3595 = vrot.lane.b32.xlu0 %v3593_v0, %s5032_s4 }
0x2dce   :  { %v3676_v61 = vpop.permute.xlu1 %3675 }
0x2dcf   :  { %v3678_v40 = vmul.f32 %v4767_v49, %v3676_v61 }
0x2dd1   :  { %3680 = vrot.lane.b32.xlu1 %v3678_v40, %s5032_s4 }
0x2e3f   :  { %v3596_v21 = vpop.permute.xlu0 %3595 }
0x2e40   :  { %v3601_v39 = vsel %vm182_vm2, %v3596_v21, %v3599_v24 }
0x2e41   :  { %v3769_v59 = vrot.slane %v3601_v39, 6 }
0x2e43   :  { %v3681_v60 = vpop.permute.xlu1 %3680  ;;  %4486 = vmatmul.mubr.msk.f32.vlgmr.msra.gmra.mrb[68].mxu1 %vm210_vm0, %v3769_v59 }
0x2e44   :  { %v3686_v35 = vsel %vm181_vm4, %v3681_v60, %v3684_v44 }
0x2e45   :  { %4475 = vmatmul.mubr.msk.f32.vlgmr.msra.gmra.mrb[68].mxu0 %vm210_vm0, %v3686_v35 }
0x2f16   :  { %v3838_v8 = vpop.f32.mrb[68].mxu1 }
0x2f17   :  { %v4487_v38 = vpop.f32.mrb[69].mxu1 }
0x2f18   :  { %v3764_v42 = vpop.f32.mrb[68].mxu0 }
0x2f19   :  { %v3839_v5 = vadd.f32 %v3838_v8, %v3764_v42  ;;  %v4476_v47 = vpop.f32.mrb[69].mxu0 }
0x2f1b   :  { %v3849_v41 = vadd.f32 %v4001_v13, %v3839_v5 }
0x2f1d   :  { %v3851_v25 = vsel %vm3850_vm8, %v3849_v41, -inf }
0x2f1e   :  { %3852 = vmax.xlane.f32.xlu0 %v3851_v25 }
0x2fab   :  { %v3853_v14 = vpop.xlane.xlu0 %3852 }
0x2fac   :  { %v3854_v37 = vsub.f32 %v3849_v41, %v3853_v14 }
0x2fae   :  { %v3855_v6 = vmul.f32 1.442695, %v3854_v37 }
0x2fb0   :  { %4772 = vpow2.f32 %v3855_v6 }
0x2fba   :  { %v4773_v62 = vpop.eup %4772 }
0x2fbb   :  { %v3857_v16 = vsel %vm3850_vm8, %v4773_v62, 0.0 }
0x2fbc   :  { %3858 = vadd.xlane.f32.xlu1 %v3857_v16 }
0x3049   :  { %v3859_v4 = vpop.xlane.xlu1 %3858 }
0x304a   :  { %4774 = vlog2.f32 %v3859_v4 }
0x3054   :  { %v4775_v20 = vpop.eup %4774 }
0x3055   :  { %v3861_v48 = vmul.f32 0.6931472, %v4775_v20 }
0x3057   :  { %v3862_v1 = vsub.f32 %v3854_v37, %v3861_v48 }
0x3059   :  { %3863 = vst.msk [vmem:[#allocation19] sm:$0x3] %vm3850_vm8, %v3862_v1 }
0x305a   :  { %4993 = shalt.err (!%p4990_p6)
}
0x305b   :  { %s6298_s17 = sld [smem:[#allocation27_spill]] }
0x3061   :  { %s4994_s20 = scalar_lea.hbm %s6298_s17, 32 }
0x3062   :  { %p4995_p7 = scmp.ne.s32.totalorder %s6298_s17, %s4994_s20  ;;  %p4998_p8 = scmp.lt.u32.totalorder %s4994_s20, %s6298_s17 }
0x3064   :  { %p5000_p9 = pnand %p4998_p8, %p4995_p7 }
0x3066   :  { %5003 = shalt.err (!%p5000_p9)
}
0x3067   :  { %3873 = dma.vmem_to_hbm [thread:$0]  %s3871_s15, 32, %s6298_s17, [#allocation6]  }
0x3068   :  { %5014 = dma.done.wait [#allocation6], 32  }
0x3069   :  { %5015 = vsyncadd [#allocation6], 4294967264 }
0x306a   :  { %3877 = vsyncpa [#allocation5], 1 }
0x306b   :  { %3878 = vsyncpa [#allocation8], 1 }
0x306c   :  { %3879 = vsyncpa [#allocation11], 1 }
0x306d   :  { %3880 = vsyncpa [#allocation14], 1 }
0x306e   :  { %3881 = vsyncpa [#allocation17], 1 }
0x306f   :  { %3882 = vsyncpa [#allocation6], 1 }

</bundles_post_ra>
